<compile_context>
chip_gen: v7x
topology: tpu7x:2x2x1
jax: 0.10.0
libtpu: 0.0.40
codegen_flags: <defaults>
</compile_context>

<pallas_src>
import functools

import jax
import jax.numpy as jnp
from jax.experimental import pallas as pl
from jax.experimental.pallas import tpu as pltpu

K = 3                 # conv kernel size
PAD = (K - 1) // 2    # = 1, 'same' padding


def residual_conv_block_kernel(x_ref, x_hbm, w_ref, bias_ref, gamma_ref,
                               beta_ref, o_ref, halo_ref, sem_ref, *, eps):
    # x_ref   : (1, T_tile, D)   auto-pipelined sequence tile (native dtype)
    # x_hbm   : (B, T, D)        full input, memory_space=ANY (HBM), for halo rows
    # w_ref   : (K*D, D)         fused conv weights ([w0; w1; w2] stacked on rows)
    # bias/gamma/beta : (1, D)
    # o_ref   : (1, T_tile, D)
    # halo_ref: (2*PAD, D) VMEM scratch, sem_ref: 2 DMA semaphores
    b = pl.program_id(0)
    t = pl.program_id(1)
    nt = pl.num_programs(1)
    t_tile = x_ref.shape[1]
    seq_len = x_hbm.shape[1]

    # ---- fetch the +/-1-row halo with two tiny manual DMAs (clamped at the
    #      sequence edges; the out-of-range rows are masked to zero below).
    left_row = jnp.maximum(t * t_tile - PAD, 0)
    right_row = jnp.minimum(t * t_tile + t_tile, seq_len - 1)
    cp_l = pltpu.make_async_copy(x_hbm.at[b, pl.ds(left_row, PAD), :],
                                 halo_ref.at[pl.ds(0, PAD), :], sem_ref.at[0])
    cp_r = pltpu.make_async_copy(x_hbm.at[b, pl.ds(right_row, PAD), :],
                                 halo_ref.at[pl.ds(PAD, PAD), :], sem_ref.at[1])
    cp_l.start()
    cp_r.start()

    xt = x_ref[0]                                   # (T_tile, D), native dtype

    cp_l.wait()
    cp_r.wait()
    halo = halo_ref[...]                            # (2, D)

    # zero-padding semantics at the sequence boundaries ('same' conv)
    left = jnp.where(t > 0, halo[0:PAD, :], 0).astype(xt.dtype)        # (1, D)
    right = jnp.where(t + 1 < nt, halo[PAD:2 * PAD, :], 0).astype(xt.dtype)

    # shifted rows: prev[i] = x[i-1], nxt[i] = x[i+1]  (halo rows at the ends)
    prev = jnp.concatenate([left, xt[:-1, :]], axis=0)                 # (T_tile, D)
    nxt = jnp.concatenate([xt[1:, :], right], axis=0)                  # (T_tile, D)

    # ---- fused 3-tap conv: one (T_tile, 3D) @ (3D, D) MXU matmul, f32 accumulate
    xin = jnp.concatenate([prev, xt, nxt], axis=-1)                    # (T_tile, 3D)
    acc = jnp.dot(xin, w_ref[...], preferred_element_type=jnp.float32)
    acc = acc + bias_ref[0].astype(jnp.float32)[None, :]

    # ---- residual add + LayerNorm(model_dim) in f32
    r = xt.astype(jnp.float32) + acc
    mean = jnp.mean(r, axis=-1, keepdims=True)
    var = jnp.mean(jnp.square(r - mean), axis=-1, keepdims=True)
    y = (r - mean) * jax.lax.rsqrt(var + eps)
    y = (y * gamma_ref[0].astype(jnp.float32)[None, :]
         + beta_ref[0].astype(jnp.float32)[None, :])

    o_ref[0] = y.astype(o_ref.dtype)


def _pick_t_tile(T, D, itemsize):
    """Largest 128-multiple tile dividing T that fits a ~40 MiB VMEM budget."""
    for cand in (512, 256, 128):
        if T % cand == 0:
            est = (4 * cand * D * itemsize          # x + out, double-buffered
                   + 3 * cand * D * itemsize        # fused (T,3D) matmul operand
                   + 4 * cand * D * 4               # f32 acc / LayerNorm temps
                   + 2 * K * D * D * itemsize)      # weights (worst case 2 bufs)
            if est <= 40 * 1024 * 1024:
                return cand
    return T


def _build_call(B, T, D, Tt, dtype, eps, single_buffer_consts):
    n_t = T // Tt
    const_kw = {}
    if single_buffer_consts and hasattr(pl, "Buffered"):
        # constant index_map -> no re-DMA needed; single buffer halves their VMEM
        const_kw = dict(pipeline_mode=pl.Buffered(1))

    itemsize = jnp.dtype(dtype).itemsize
    cost = pl.CostEstimate(
        flops=2 * B * T * (K * D) * D,
        transcendentals=B * T,                       # rsqrt per row
        bytes_accessed=2 * B * T * D * itemsize + K * D * D * itemsize,
    )

    kernel = functools.partial(residual_conv_block_kernel, eps=eps)

    return pl.pallas_call(
        kernel,
        out_shape=jax.ShapeDtypeStruct((B, T, D), dtype),
        grid=(B, n_t),
        in_specs=[
            pl.BlockSpec((1, Tt, D), lambda b, t: (b, t, 0)),      # seq tile
            pl.BlockSpec(memory_space=pl.ANY),                     # raw x (halo DMA)
            pl.BlockSpec((K * D, D), lambda b, t: (0, 0), **const_kw),
            pl.BlockSpec((1, D), lambda b, t: (0, 0), **const_kw),
            pl.BlockSpec((1, D), lambda b, t: (0, 0), **const_kw),
            pl.BlockSpec((1, D), lambda b, t: (0, 0), **const_kw),
        ],
        out_specs=pl.BlockSpec((1, Tt, D), lambda b, t: (b, t, 0)),
        scratch_shapes=[
            pltpu.VMEM((2 * PAD, D), dtype),                       # halo rows
            pltpu.SemaphoreType.DMA((2,)),
        ],
        compiler_params=pltpu.CompilerParams(
            dimension_semantics=("parallel", "parallel"),
            vmem_limit_bytes=48 * 1024 * 1024,
        ),
        cost_estimate=cost,
    )


def residual_conv_block(x, weight, bias, gamma, beta, *, eps=1e-5, t_tile=None):
    """x: [B, T, D]; weight: [K, D, D] (tap-major); bias/gamma/beta: [D]."""
    B, T, D = x.shape
    assert weight.shape == (K, D, D)
    Tt = t_tile if t_tile is not None else _pick_t_tile(T, D, x.dtype.itemsize)
    assert T % Tt == 0, "T must be divisible by the sequence tile"
    assert Tt == T or Tt % 8 == 0, "sequence tile must be sublane-aligned"

    # fused conv weights: rows [w0; w1; w2] to match concat([x_{i-1}, x_i, x_{i+1}])
    w2d = weight.reshape(K * D, D)
    args = (x, x, w2d, bias.reshape(1, D), gamma.reshape(1, D), beta.reshape(1, D))

    try:
        return _build_call(B, T, D, Tt, x.dtype, eps, True)(*args)
    except Exception:
        # pl.Buffered(1) single-buffering not supported by this Pallas build;
        # fall back to default double-buffered constants.
        return _build_call(B, T, D, Tt, x.dtype, eps, False)(*args)


def reference(x, weight, bias, gamma, beta, *, eps=1e-5):
    B, T, D = x.shape
    xp = jnp.pad(x, ((0, 0), (PAD, PAD), (0, 0)))
    y = sum(jnp.einsum("btd,de->bte", xp[:, k:k + T, :], weight[k])
            for k in range(K)) + bias
    r = x + y
    mean = r.mean(-1, keepdims=True)
    var = ((r - mean) ** 2).mean(-1, keepdims=True)
    return (r - mean) / jnp.sqrt(var + eps) * gamma + beta


if __name__ == "__main__":
    # small but lane-dense (D multiple of 128); two sequence tiles so the
    # cross-tile halo path is exercised.
    B, T, D = 2, 256, 128

    key = jax.random.PRNGKey(0)
    kx, kw, kb = jax.random.split(key, 3)
    x = jax.random.normal(kx, (B, T, D), dtype=jnp.float32)
    weight = jax.random.normal(kw, (K, D, D), dtype=jnp.float32) * 0.05
    bias = jax.random.normal(kb, (D,), dtype=jnp.float32) * 0.05
    gamma = jnp.ones((D,), dtype=jnp.float32)     # LayerNorm default init
    beta = jnp.zeros((D,), dtype=jnp.float32)

    out = residual_conv_block(x, weight, bias, gamma, beta, t_tile=128)
    out = jax.block_until_ready(out)

    ref = reference(x, weight, bias, gamma, beta)
    assert out.shape == (B, T, D)
    # tolerance accounts for default-precision (bf16-pass) f32 MXU matmuls vs XLA einsum
    max_err = float(jnp.max(jnp.abs(out - ref)))
    assert jnp.allclose(out, ref, rtol=2e-2, atol=2e-2), f"max abs err {max_err}"

    print("KERNEL_OK")
</pallas_src>

<mosaic_0001>
module attributes {stable_mosaic.version = 11 : i64} {
  func.func @residual_conv_block_kernel(%arg0: i32, %arg1: i32, %arg2: memref<1x128x128xf32, #tpu.memory_space<vmem>>, %arg3: memref<2x256x128xf32, #tpu.memory_space<any>>, %arg4: memref<384x128xf32, #tpu.memory_space<vmem>>, %arg5: memref<1x128xf32, #tpu.memory_space<vmem>>, %arg6: memref<1x128xf32, #tpu.memory_space<vmem>>, %arg7: memref<1x128xf32, #tpu.memory_space<vmem>>, %arg8: memref<1x128x128xf32, #tpu.memory_space<vmem>>, %arg9: memref<2x128xf32, #tpu.memory_space<vmem>>, %arg10: memref<2x!tpu.dma_semaphore, #tpu.memory_space<semaphore_mem>>) attributes {dimension_semantics = [#tpu.dimension_semantics<parallel>, #tpu.dimension_semantics<parallel>], iteration_bounds = array<i64: 2, 2>, scalar_prefetch = 0 : i64, scratch_operands = 2 : i64, tpu.core_type = #tpu.core_type<tc>, window_params = [{transform_indices = @transform_0, window_bounds = array<i64: 1, 128, 128>}, {}, {pipeline_mode = #tpu.pipeline_mode<synchronous>, transform_indices = @transform_2, window_bounds = array<i64: 384, 128>}, {pipeline_mode = #tpu.pipeline_mode<synchronous>, transform_indices = @transform_3, window_bounds = array<i64: 1, 128>}, {pipeline_mode = #tpu.pipeline_mode<synchronous>, transform_indices = @transform_4, window_bounds = array<i64: 1, 128>}, {pipeline_mode = #tpu.pipeline_mode<synchronous>, transform_indices = @transform_5, window_bounds = array<i64: 1, 128>}, {transform_indices = @transform_6, window_bounds = array<i64: 1, 128, 128>}]} {
    %c128_i32 = arith.constant 128 : i32
    %0 = arith.muli %arg1, %c128_i32 : i32
    %c1_i32 = arith.constant 1 : i32
    %1 = arith.subi %0, %c1_i32 : i32
    %c0_i32 = arith.constant 0 : i32
    %2 = arith.maxsi %1, %c0_i32 : i32
    %c128_i32_0 = arith.constant 128 : i32
    %3 = arith.muli %arg1, %c128_i32_0 : i32
    %c128_i32_1 = arith.constant 128 : i32
    %4 = arith.addi %3, %c128_i32_1 : i32
    %c255_i32 = arith.constant 255 : i32
    %5 = arith.minsi %4, %c255_i32 : i32
    %c0_i32_2 = arith.constant 0 : i32
    %c0_i32_3 = arith.constant 0 : i32
    %6 = tpu.memref_slice %arg3[%arg0, %2, %c0_i32_3] : memref<2x256x128xf32, #tpu.memory_space<any>> -> memref<1x1x128xf32, #tpu.memory_space<any>>
    %7 = tpu.memref_squeeze %6 : memref<1x1x128xf32, #tpu.memory_space<any>> -> memref<1x128xf32, #tpu.memory_space<any>>
    %c0_i32_4 = arith.constant 0 : i32
    %c0_i32_5 = arith.constant 0 : i32
    %8 = tpu.memref_slice %arg9[%c0_i32_4, %c0_i32_5] : memref<2x128xf32, #tpu.memory_space<vmem>> -> memref<1x128xf32, #tpu.memory_space<vmem>>
    %9 = tpu.memref_slice %arg10[%c0_i32_2] : memref<2x!tpu.dma_semaphore, #tpu.memory_space<semaphore_mem>> -> memref<1x!tpu.dma_semaphore, #tpu.memory_space<semaphore_mem>>
    %10 = tpu.memref_squeeze %9 : memref<1x!tpu.dma_semaphore, #tpu.memory_space<semaphore_mem>> -> memref<!tpu.dma_semaphore, #tpu.memory_space<semaphore_mem>>
    tpu.enqueue_dma source(%7 : memref<1x128xf32, #tpu.memory_space<any>>) target(%8 : memref<1x128xf32, #tpu.memory_space<vmem>>) target_semaphore(%10 : memref<!tpu.dma_semaphore, #tpu.memory_space<semaphore_mem>>)
    %c1_i32_6 = arith.constant 1 : i32
    %c0_i32_7 = arith.constant 0 : i32
    %11 = tpu.memref_slice %arg3[%arg0, %5, %c0_i32_7] : memref<2x256x128xf32, #tpu.memory_space<any>> -> memref<1x1x128xf32, #tpu.memory_space<any>>
    %12 = tpu.memref_squeeze %11 : memref<1x1x128xf32, #tpu.memory_space<any>> -> memref<1x128xf32, #tpu.memory_space<any>>
    %c1_i32_8 = arith.constant 1 : i32
    %c0_i32_9 = arith.constant 0 : i32
    %13 = tpu.memref_slice %arg9[%c1_i32_8, %c0_i32_9] : memref<2x128xf32, #tpu.memory_space<vmem>> -> memref<1x128xf32, #tpu.memory_space<vmem>>
    %14 = tpu.memref_slice %arg10[%c1_i32_6] : memref<2x!tpu.dma_semaphore, #tpu.memory_space<semaphore_mem>> -> memref<1x!tpu.dma_semaphore, #tpu.memory_space<semaphore_mem>>
    %15 = tpu.memref_squeeze %14 : memref<1x!tpu.dma_semaphore, #tpu.memory_space<semaphore_mem>> -> memref<!tpu.dma_semaphore, #tpu.memory_space<semaphore_mem>>
    tpu.enqueue_dma source(%12 : memref<1x128xf32, #tpu.memory_space<any>>) target(%13 : memref<1x128xf32, #tpu.memory_space<vmem>>) target_semaphore(%15 : memref<!tpu.dma_semaphore, #tpu.memory_space<semaphore_mem>>)
    %c0 = arith.constant 0 : index
    %c0_10 = arith.constant 0 : index
    %c0_11 = arith.constant 0 : index
    %16 = vector.load %arg2[%c0, %c0_10, %c0_11] : memref<1x128x128xf32, #tpu.memory_space<vmem>>, vector<1x128x128xf32>
    %17 = vector.shape_cast %16 : vector<1x128x128xf32> to vector<128x128xf32>
    %c0_i32_12 = arith.constant 0 : i32
    %c0_i32_13 = arith.constant 0 : i32
    %18 = tpu.memref_slice %arg3[%arg0, %2, %c0_i32_13] : memref<2x256x128xf32, #tpu.memory_space<any>> -> memref<1x1x128xf32, #tpu.memory_space<any>>
    %19 = tpu.memref_squeeze %18 : memref<1x1x128xf32, #tpu.memory_space<any>> -> memref<1x128xf32, #tpu.memory_space<any>>
    %c0_i32_14 = arith.constant 0 : i32
    %c0_i32_15 = arith.constant 0 : i32
    %20 = tpu.memref_slice %arg9[%c0_i32_14, %c0_i32_15] : memref<2x128xf32, #tpu.memory_space<vmem>> -> memref<1x128xf32, #tpu.memory_space<vmem>>
    %21 = tpu.memref_slice %arg10[%c0_i32_12] : memref<2x!tpu.dma_semaphore, #tpu.memory_space<semaphore_mem>> -> memref<1x!tpu.dma_semaphore, #tpu.memory_space<semaphore_mem>>
    %22 = tpu.memref_squeeze %21 : memref<1x!tpu.dma_semaphore, #tpu.memory_space<semaphore_mem>> -> memref<!tpu.dma_semaphore, #tpu.memory_space<semaphore_mem>>
    tpu.wait_dma2 semaphore(%22 : memref<!tpu.dma_semaphore, #tpu.memory_space<semaphore_mem>>) src(%19 : memref<1x128xf32, #tpu.memory_space<any>>) dst(%20 : memref<1x128xf32, #tpu.memory_space<vmem>>)
    %c1_i32_16 = arith.constant 1 : i32
    %c0_i32_17 = arith.constant 0 : i32
    %23 = tpu.memref_slice %arg3[%arg0, %5, %c0_i32_17] : memref<2x256x128xf32, #tpu.memory_space<any>> -> memref<1x1x128xf32, #tpu.memory_space<any>>
    %24 = tpu.memref_squeeze %23 : memref<1x1x128xf32, #tpu.memory_space<any>> -> memref<1x128xf32, #tpu.memory_space<any>>
    %c1_i32_18 = arith.constant 1 : i32
    %c0_i32_19 = arith.constant 0 : i32
    %25 = tpu.memref_slice %arg9[%c1_i32_18, %c0_i32_19] : memref<2x128xf32, #tpu.memory_space<vmem>> -> memref<1x128xf32, #tpu.memory_space<vmem>>
    %26 = tpu.memref_slice %arg10[%c1_i32_16] : memref<2x!tpu.dma_semaphore, #tpu.memory_space<semaphore_mem>> -> memref<1x!tpu.dma_semaphore, #tpu.memory_space<semaphore_mem>>
    %27 = tpu.memref_squeeze %26 : memref<1x!tpu.dma_semaphore, #tpu.memory_space<semaphore_mem>> -> memref<!tpu.dma_semaphore, #tpu.memory_space<semaphore_mem>>
    tpu.wait_dma2 semaphore(%27 : memref<!tpu.dma_semaphore, #tpu.memory_space<semaphore_mem>>) src(%24 : memref<1x128xf32, #tpu.memory_space<any>>) dst(%25 : memref<1x128xf32, #tpu.memory_space<vmem>>)
    %c0_20 = arith.constant 0 : index
    %c0_21 = arith.constant 0 : index
    %28 = vector.load %arg9[%c0_20, %c0_21] : memref<2x128xf32, #tpu.memory_space<vmem>>, vector<2x128xf32>
    %c0_i32_22 = arith.constant 0 : i32
    %29 = arith.cmpi sgt, %arg1, %c0_i32_22 : i32
    %30 = vector.extract_strided_slice %28 {offsets = [0, 0], sizes = [1, 128], strides = [1, 1]} : vector<2x128xf32> to vector<1x128xf32>
    %c0_i32_23 = arith.constant 0 : i32
    %31 = arith.sitofp %c0_i32_23 : i32 to f32
    %32 = vector.broadcast %31 : f32 to vector<1x128xf32>
    %33 = arith.select %29, %30, %32 : vector<1x128xf32>
    %c1_i32_24 = arith.constant 1 : i32
    %34 = arith.addi %arg1, %c1_i32_24 : i32
    %c2_i32 = arith.constant 2 : i32
    %35 = arith.cmpi slt, %34, %c2_i32 : i32
    %36 = vector.extract_strided_slice %28 {offsets = [1, 0], sizes = [1, 128], strides = [1, 1]} : vector<2x128xf32> to vector<1x128xf32>
    %c0_i32_25 = arith.constant 0 : i32
    %37 = arith.sitofp %c0_i32_25 : i32 to f32
    %38 = vector.broadcast %37 : f32 to vector<1x128xf32>
    %39 = arith.select %35, %36, %38 : vector<1x128xf32>
    %40 = vector.extract_strided_slice %17 {offsets = [0, 0], sizes = [127, 128], strides = [1, 1]} : vector<128x128xf32> to vector<127x128xf32>
    %41 = tpu.concatenate %33, %40 in 0 : vector<1x128xf32>, vector<127x128xf32> -> vector<128x128xf32>
    %42 = vector.extract_strided_slice %17 {offsets = [1, 0], sizes = [127, 128], strides = [1, 1]} : vector<128x128xf32> to vector<127x128xf32>
    %43 = tpu.concatenate %42, %39 in 0 : vector<127x128xf32>, vector<1x128xf32> -> vector<128x128xf32>
    %44 = tpu.concatenate %41, %17, %43 in 1 : vector<128x128xf32>, vector<128x128xf32>, vector<128x128xf32> -> vector<128x384xf32>
    %c0_26 = arith.constant 0 : index
    %c0_27 = arith.constant 0 : index
    %45 = vector.load %arg4[%c0_26, %c0_27] : memref<384x128xf32, #tpu.memory_space<vmem>>, vector<384x128xf32>
    %cst = arith.constant dense<0.000000e+00> : vector<128x128xf32>
    %46 = tpu.matmul %44, %45, %cst {dimension_numbers = #tpu.dot_dimension_numbers<[1], [0], [0], [1], [0, 0, 1, 1], [], []>} : vector<128x384xf32>, vector<384x128xf32>, vector<128x128xf32> -> vector<128x128xf32>
    %c0_28 = arith.constant 0 : index
    %c0_29 = arith.constant 0 : index
    %47 = vector.load %arg5[%c0_28, %c0_29] : memref<1x128xf32, #tpu.memory_space<vmem>>, vector<1x128xf32>
    %48 = vector.shape_cast %47 : vector<1x128xf32> to vector<128xf32>
    %49 = vector.shape_cast %48 : vector<128xf32> to vector<1x128xf32>
    %50 = vector.broadcast %49 : vector<1x128xf32> to vector<128x128xf32>
    %51 = arith.addf %46, %50 : vector<128x128xf32>
    %52 = arith.addf %17, %51 : vector<128x128xf32>
    %cst_30 = arith.constant dense<0.000000e+00> : vector<128xf32>
    %53 = vector.multi_reduction <add>, %52, %cst_30 [1] : vector<128x128xf32> to vector<128xf32>
    %54 = vector.shape_cast %53 : vector<128xf32> to vector<128x1xf32>
    %cst_31 = arith.constant 1.280000e+02 : f32
    %55 = vector.broadcast %cst_31 : f32 to vector<128x1xf32>
    %56 = arith.divf %54, %55 : vector<128x1xf32>
    %57 = vector.broadcast %56 : vector<128x1xf32> to vector<128x128xf32>
    %58 = arith.subf %52, %57 : vector<128x128xf32>
    %59 = arith.mulf %58, %58 : vector<128x128xf32>
    %cst_32 = arith.constant dense<0.000000e+00> : vector<128xf32>
    %60 = vector.multi_reduction <add>, %59, %cst_32 [1] : vector<128x128xf32> to vector<128xf32>
    %61 = vector.shape_cast %60 : vector<128xf32> to vector<128x1xf32>
    %cst_33 = arith.constant 1.280000e+02 : f32
    %62 = vector.broadcast %cst_33 : f32 to vector<128x1xf32>
    %63 = arith.divf %61, %62 : vector<128x1xf32>
    %64 = vector.broadcast %56 : vector<128x1xf32> to vector<128x128xf32>
    %65 = arith.subf %52, %64 : vector<128x128xf32>
    %cst_34 = arith.constant 9.99999974E-6 : f32
    %66 = vector.broadcast %cst_34 : f32 to vector<128x1xf32>
    %67 = arith.addf %63, %66 : vector<128x1xf32>
    %68 = math.rsqrt %67 : vector<128x1xf32>
    %69 = vector.broadcast %68 : vector<128x1xf32> to vector<128x128xf32>
    %70 = arith.mulf %65, %69 : vector<128x128xf32>
    %c0_35 = arith.constant 0 : index
    %c0_36 = arith.constant 0 : index
    %71 = vector.load %arg6[%c0_35, %c0_36] : memref<1x128xf32, #tpu.memory_space<vmem>>, vector<1x128xf32>
    %72 = vector.shape_cast %71 : vector<1x128xf32> to vector<128xf32>
    %73 = vector.shape_cast %72 : vector<128xf32> to vector<1x128xf32>
    %74 = vector.broadcast %73 : vector<1x128xf32> to vector<128x128xf32>
    %75 = arith.mulf %70, %74 : vector<128x128xf32>
    %c0_37 = arith.constant 0 : index
    %c0_38 = arith.constant 0 : index
    %76 = vector.load %arg7[%c0_37, %c0_38] : memref<1x128xf32, #tpu.memory_space<vmem>>, vector<1x128xf32>
    %77 = vector.shape_cast %76 : vector<1x128xf32> to vector<128xf32>
    %78 = vector.shape_cast %77 : vector<128xf32> to vector<1x128xf32>
    %79 = vector.broadcast %78 : vector<1x128xf32> to vector<128x128xf32>
    %80 = arith.addf %75, %79 : vector<128x128xf32>
    %c0_39 = arith.constant 0 : index
    %c0_40 = arith.constant 0 : index
    %c0_41 = arith.constant 0 : index
    %81 = vector.load %arg8[%c0_39, %c0_40, %c0_41] : memref<1x128x128xf32, #tpu.memory_space<vmem>>, vector<1x128x128xf32>
    %82 = vector.shape_cast %81 : vector<1x128x128xf32> to vector<128x128xf32>
    %83 = vector.shape_cast %80 : vector<128x128xf32> to vector<1x128x128xf32>
    tpu.vector_store %arg8[%c0_39, %c0_40, %c0_41], %83 {strides = array<i32>} : memref<1x128x128xf32, #tpu.memory_space<vmem>>, vector<1x128x128xf32>,
    return
  }
  func.func @transform_0(%arg0: i32, %arg1: i32) -> (i32, i32, i32) {
    %c0_i32 = arith.constant 0 : i32
    %c0_i32_0 = arith.constant 0 : i32
    return %arg0, %arg1, %c0_i32 : i32, i32, i32
  }
  func.func @transform_2(%arg0: i32, %arg1: i32) -> (i32, i32) {
    %c0_i32 = arith.constant 0 : i32
    %c0_i32_0 = arith.constant 0 : i32
    %c0_i32_1 = arith.constant 0 : i32
    return %c0_i32, %c0_i32_0 : i32, i32
  }
  func.func @transform_3(%arg0: i32, %arg1: i32) -> (i32, i32) {
    %c0_i32 = arith.constant 0 : i32
    %c0_i32_0 = arith.constant 0 : i32
    %c0_i32_1 = arith.constant 0 : i32
    return %c0_i32, %c0_i32_0 : i32, i32
  }
  func.func @transform_4(%arg0: i32, %arg1: i32) -> (i32, i32) {
    %c0_i32 = arith.constant 0 : i32
    %c0_i32_0 = arith.constant 0 : i32
    %c0_i32_1 = arith.constant 0 : i32
    return %c0_i32, %c0_i32_0 : i32, i32
  }
  func.func @transform_5(%arg0: i32, %arg1: i32) -> (i32, i32) {
    %c0_i32 = arith.constant 0 : i32
    %c0_i32_0 = arith.constant 0 : i32
    %c0_i32_1 = arith.constant 0 : i32
    return %c0_i32, %c0_i32_0 : i32, i32
  }
  func.func @transform_6(%arg0: i32, %arg1: i32) -> (i32, i32, i32) {
    %c0_i32 = arith.constant 0 : i32
    %c0_i32_0 = arith.constant 0 : i32
    return %arg0, %arg1, %c0_i32 : i32, i32, i32
  }
}

module attributes {stable_mosaic.version = 11 : i64} {
  func.func @residual_conv_block_kernel(%arg0: i32, %arg1: i32, %arg2: memref<1x128x128xf32, #tpu.memory_space<vmem>>, %arg3: memref<2x256x128xf32, #tpu.memory_space<any>>, %arg4: memref<384x128xf32, #tpu.memory_space<vmem>>, %arg5: memref<1x128xf32, #tpu.memory_space<vmem>>, %arg6: memref<1x128xf32, #tpu.memory_space<vmem>>, %arg7: memref<1x128xf32, #tpu.memory_space<vmem>>, %arg8: memref<1x128x128xf32, #tpu.memory_space<vmem>>, %arg9: memref<2x128xf32, #tpu.memory_space<vmem>>, %arg10: memref<2x!tpu.dma_semaphore, #tpu.memory_space<semaphore_mem>>) attributes {dimension_semantics = [#tpu.dimension_semantics<parallel>, #tpu.dimension_semantics<parallel>], iteration_bounds = array<i64: 2, 2>, scalar_prefetch = 0 : i64, scratch_operands = 2 : i64, tpu.core_type = #tpu.core_type<tc>, window_params = [{transform_indices = @transform_0, window_bounds = array<i64: 1, 128, 128>}, {}, {pipeline_mode = #tpu.pipeline_mode<synchronous>, transform_indices = @transform_2, window_bounds = array<i64: 384, 128>}, {pipeline_mode = #tpu.pipeline_mode<synchronous>, transform_indices = @transform_3, window_bounds = array<i64: 1, 128>}, {pipeline_mode = #tpu.pipeline_mode<synchronous>, transform_indices = @transform_4, window_bounds = array<i64: 1, 128>}, {pipeline_mode = #tpu.pipeline_mode<synchronous>, transform_indices = @transform_5, window_bounds = array<i64: 1, 128>}, {transform_indices = @transform_6, window_bounds = array<i64: 1, 128, 128>}]} {
    %c128_i32 = arith.constant 128 : i32
    %0 = arith.muli %arg1, %c128_i32 : i32
    %c1_i32 = arith.constant 1 : i32
    %1 = arith.subi %0, %c1_i32 : i32
    %c0_i32 = arith.constant 0 : i32
    %2 = arith.maxsi %1, %c0_i32 : i32
    %c128_i32_0 = arith.constant 128 : i32
    %3 = arith.muli %arg1, %c128_i32_0 : i32
    %c128_i32_1 = arith.constant 128 : i32
    %4 = arith.addi %3, %c128_i32_1 : i32
    %c255_i32 = arith.constant 255 : i32
    %5 = arith.minsi %4, %c255_i32 : i32
    %c0_i32_2 = arith.constant 0 : i32
    %c0_i32_3 = arith.constant 0 : i32
    %6 = tpu.memref_slice %arg3[%arg0, %2, %c0_i32_3] : memref<2x256x128xf32, #tpu.memory_space<any>> -> memref<1x1x128xf32, #tpu.memory_space<any>>
    %7 = tpu.memref_squeeze %6 : memref<1x1x128xf32, #tpu.memory_space<any>> -> memref<1x128xf32, #tpu.memory_space<any>>
    %c0_i32_4 = arith.constant 0 : i32
    %c0_i32_5 = arith.constant 0 : i32
    %8 = tpu.memref_slice %arg9[%c0_i32_4, %c0_i32_5] : memref<2x128xf32, #tpu.memory_space<vmem>> -> memref<1x128xf32, #tpu.memory_space<vmem>>
    %9 = tpu.memref_slice %arg10[%c0_i32_2] : memref<2x!tpu.dma_semaphore, #tpu.memory_space<semaphore_mem>> -> memref<1x!tpu.dma_semaphore, #tpu.memory_space<semaphore_mem>>
    %10 = tpu.memref_squeeze %9 : memref<1x!tpu.dma_semaphore, #tpu.memory_space<semaphore_mem>> -> memref<!tpu.dma_semaphore, #tpu.memory_space<semaphore_mem>>
    tpu.enqueue_dma source(%7 : memref<1x128xf32, #tpu.memory_space<any>>) target(%8 : memref<1x128xf32, #tpu.memory_space<vmem>>) target_semaphore(%10 : memref<!tpu.dma_semaphore, #tpu.memory_space<semaphore_mem>>)
    %c1_i32_6 = arith.constant 1 : i32
    %c0_i32_7 = arith.constant 0 : i32
    %11 = tpu.memref_slice %arg3[%arg0, %5, %c0_i32_7] : memref<2x256x128xf32, #tpu.memory_space<any>> -> memref<1x1x128xf32, #tpu.memory_space<any>>
    %12 = tpu.memref_squeeze %11 : memref<1x1x128xf32, #tpu.memory_space<any>> -> memref<1x128xf32, #tpu.memory_space<any>>
    %c1_i32_8 = arith.constant 1 : i32
    %c0_i32_9 = arith.constant 0 : i32
    %13 = tpu.memref_slice %arg9[%c1_i32_8, %c0_i32_9] : memref<2x128xf32, #tpu.memory_space<vmem>> -> memref<1x128xf32, #tpu.memory_space<vmem>>
    %14 = tpu.memref_slice %arg10[%c1_i32_6] : memref<2x!tpu.dma_semaphore, #tpu.memory_space<semaphore_mem>> -> memref<1x!tpu.dma_semaphore, #tpu.memory_space<semaphore_mem>>
    %15 = tpu.memref_squeeze %14 : memref<1x!tpu.dma_semaphore, #tpu.memory_space<semaphore_mem>> -> memref<!tpu.dma_semaphore, #tpu.memory_space<semaphore_mem>>
    tpu.enqueue_dma source(%12 : memref<1x128xf32, #tpu.memory_space<any>>) target(%13 : memref<1x128xf32, #tpu.memory_space<vmem>>) target_semaphore(%15 : memref<!tpu.dma_semaphore, #tpu.memory_space<semaphore_mem>>)
    %c0 = arith.constant 0 : index
    %c0_10 = arith.constant 0 : index
    %c0_11 = arith.constant 0 : index
    %16 = vector.load %arg2[%c0, %c0_10, %c0_11] : memref<1x128x128xf32, #tpu.memory_space<vmem>>, vector<1x128x128xf32>
    %17 = vector.shape_cast %16 : vector<1x128x128xf32> to vector<128x128xf32>
    %c0_i32_12 = arith.constant 0 : i32
    %c0_i32_13 = arith.constant 0 : i32
    %18 = tpu.memref_slice %arg3[%arg0, %2, %c0_i32_13] : memref<2x256x128xf32, #tpu.memory_space<any>> -> memref<1x1x128xf32, #tpu.memory_space<any>>
    %19 = tpu.memref_squeeze %18 : memref<1x1x128xf32, #tpu.memory_space<any>> -> memref<1x128xf32, #tpu.memory_space<any>>
    %c0_i32_14 = arith.constant 0 : i32
    %c0_i32_15 = arith.constant 0 : i32
    %20 = tpu.memref_slice %arg9[%c0_i32_14, %c0_i32_15] : memref<2x128xf32, #tpu.memory_space<vmem>> -> memref<1x128xf32, #tpu.memory_space<vmem>>
    %21 = tpu.memref_slice %arg10[%c0_i32_12] : memref<2x!tpu.dma_semaphore, #tpu.memory_space<semaphore_mem>> -> memref<1x!tpu.dma_semaphore, #tpu.memory_space<semaphore_mem>>
    %22 = tpu.memref_squeeze %21 : memref<1x!tpu.dma_semaphore, #tpu.memory_space<semaphore_mem>> -> memref<!tpu.dma_semaphore, #tpu.memory_space<semaphore_mem>>
    tpu.wait_dma2 semaphore(%22 : memref<!tpu.dma_semaphore, #tpu.memory_space<semaphore_mem>>) src(%19 : memref<1x128xf32, #tpu.memory_space<any>>) dst(%20 : memref<1x128xf32, #tpu.memory_space<vmem>>)
    %c1_i32_16 = arith.constant 1 : i32
    %c0_i32_17 = arith.constant 0 : i32
    %23 = tpu.memref_slice %arg3[%arg0, %5, %c0_i32_17] : memref<2x256x128xf32, #tpu.memory_space<any>> -> memref<1x1x128xf32, #tpu.memory_space<any>>
    %24 = tpu.memref_squeeze %23 : memref<1x1x128xf32, #tpu.memory_space<any>> -> memref<1x128xf32, #tpu.memory_space<any>>
    %c1_i32_18 = arith.constant 1 : i32
    %c0_i32_19 = arith.constant 0 : i32
    %25 = tpu.memref_slice %arg9[%c1_i32_18, %c0_i32_19] : memref<2x128xf32, #tpu.memory_space<vmem>> -> memref<1x128xf32, #tpu.memory_space<vmem>>
    %26 = tpu.memref_slice %arg10[%c1_i32_16] : memref<2x!tpu.dma_semaphore, #tpu.memory_space<semaphore_mem>> -> memref<1x!tpu.dma_semaphore, #tpu.memory_space<semaphore_mem>>
    %27 = tpu.memref_squeeze %26 : memref<1x!tpu.dma_semaphore, #tpu.memory_space<semaphore_mem>> -> memref<!tpu.dma_semaphore, #tpu.memory_space<semaphore_mem>>
    tpu.wait_dma2 semaphore(%27 : memref<!tpu.dma_semaphore, #tpu.memory_space<semaphore_mem>>) src(%24 : memref<1x128xf32, #tpu.memory_space<any>>) dst(%25 : memref<1x128xf32, #tpu.memory_space<vmem>>)
    %c0_20 = arith.constant 0 : index
    %c0_21 = arith.constant 0 : index
    %28 = vector.load %arg9[%c0_20, %c0_21] : memref<2x128xf32, #tpu.memory_space<vmem>>, vector<2x128xf32>
    %c0_i32_22 = arith.constant 0 : i32
    %29 = arith.cmpi sgt, %arg1, %c0_i32_22 : i32
    %30 = vector.extract_strided_slice %28 {offsets = [0, 0], sizes = [1, 128], strides = [1, 1]} : vector<2x128xf32> to vector<1x128xf32>
    %c0_i32_23 = arith.constant 0 : i32
    %31 = arith.sitofp %c0_i32_23 : i32 to f32
    %32 = vector.broadcast %31 : f32 to vector<1x128xf32>
    %33 = arith.select %29, %30, %32 : vector<1x128xf32>
    %c1_i32_24 = arith.constant 1 : i32
    %34 = arith.addi %arg1, %c1_i32_24 : i32
    %c2_i32 = arith.constant 2 : i32
    %35 = arith.cmpi slt, %34, %c2_i32 : i32
    %36 = vector.extract_strided_slice %28 {offsets = [1, 0], sizes = [1, 128], strides = [1, 1]} : vector<2x128xf32> to vector<1x128xf32>
    %c0_i32_25 = arith.constant 0 : i32
    %37 = arith.sitofp %c0_i32_25 : i32 to f32
    %38 = vector.broadcast %37 : f32 to vector<1x128xf32>
    %39 = arith.select %35, %36, %38 : vector<1x128xf32>
    %40 = vector.extract_strided_slice %17 {offsets = [0, 0], sizes = [127, 128], strides = [1, 1]} : vector<128x128xf32> to vector<127x128xf32>
    %41 = tpu.concatenate %33, %40 in 0 : vector<1x128xf32>, vector<127x128xf32> -> vector<128x128xf32>
    %42 = vector.extract_strided_slice %17 {offsets = [1, 0], sizes = [127, 128], strides = [1, 1]} : vector<128x128xf32> to vector<127x128xf32>
    %43 = tpu.concatenate %42, %39 in 0 : vector<127x128xf32>, vector<1x128xf32> -> vector<128x128xf32>
    %44 = tpu.concatenate %41, %17, %43 in 1 : vector<128x128xf32>, vector<128x128xf32>, vector<128x128xf32> -> vector<128x384xf32>
    %c0_26 = arith.constant 0 : index
    %c0_27 = arith.constant 0 : index
    %45 = vector.load %arg4[%c0_26, %c0_27] : memref<384x128xf32, #tpu.memory_space<vmem>>, vector<384x128xf32>
    %cst = arith.constant dense<0.000000e+00> : vector<128x128xf32>
    %46 = tpu.matmul %44, %45, %cst {dimension_numbers = #tpu.dot_dimension_numbers<[1], [0], [0], [1], [0, 0, 1, 1], [], []>} : vector<128x384xf32>, vector<384x128xf32>, vector<128x128xf32> -> vector<128x128xf32>
    %c0_28 = arith.constant 0 : index
    %c0_29 = arith.constant 0 : index
    %47 = vector.load %arg5[%c0_28, %c0_29] : memref<1x128xf32, #tpu.memory_space<vmem>>, vector<1x128xf32>
    %48 = vector.shape_cast %47 : vector<1x128xf32> to vector<128xf32>
    %49 = vector.shape_cast %48 : vector<128xf32> to vector<1x128xf32>
    %50 = vector.broadcast %49 : vector<1x128xf32> to vector<128x128xf32>
    %51 = arith.addf %46, %50 : vector<128x128xf32>
    %52 = arith.addf %17, %51 : vector<128x128xf32>
    %cst_30 = arith.constant dense<0.000000e+00> : vector<128xf32>
    %53 = vector.multi_reduction <add>, %52, %cst_30 [1] : vector<128x128xf32> to vector<128xf32>
    %54 = vector.shape_cast %53 : vector<128xf32> to vector<128x1xf32>
    %cst_31 = arith.constant 1.280000e+02 : f32
    %55 = vector.broadcast %cst_31 : f32 to vector<128x1xf32>
    %56 = arith.divf %54, %55 : vector<128x1xf32>
    %57 = vector.broadcast %56 : vector<128x1xf32> to vector<128x128xf32>
    %58 = arith.subf %52, %57 : vector<128x128xf32>
    %59 = arith.mulf %58, %58 : vector<128x128xf32>
    %cst_32 = arith.constant dense<0.000000e+00> : vector<128xf32>
    %60 = vector.multi_reduction <add>, %59, %cst_32 [1] : vector<128x128xf32> to vector<128xf32>
    %61 = vector.shape_cast %60 : vector<128xf32> to vector<128x1xf32>
    %cst_33 = arith.constant 1.280000e+02 : f32
    %62 = vector.broadcast %cst_33 : f32 to vector<128x1xf32>
    %63 = arith.divf %61, %62 : vector<128x1xf32>
    %64 = vector.broadcast %56 : vector<128x1xf32> to vector<128x128xf32>
    %65 = arith.subf %52, %64 : vector<128x128xf32>
    %cst_34 = arith.constant 9.99999974E-6 : f32
    %66 = vector.broadcast %cst_34 : f32 to vector<128x1xf32>
    %67 = arith.addf %63, %66 : vector<128x1xf32>
    %68 = math.rsqrt %67 : vector<128x1xf32>
    %69 = vector.broadcast %68 : vector<128x1xf32> to vector<128x128xf32>
    %70 = arith.mulf %65, %69 : vector<128x128xf32>
    %c0_35 = arith.constant 0 : index
    %c0_36 = arith.constant 0 : index
    %71 = vector.load %arg6[%c0_35, %c0_36] : memref<1x128xf32, #tpu.memory_space<vmem>>, vector<1x128xf32>
    %72 = vector.shape_cast %71 : vector<1x128xf32> to vector<128xf32>
    %73 = vector.shape_cast %72 : vector<128xf32> to vector<1x128xf32>
    %74 = vector.broadcast %73 : vector<1x128xf32> to vector<128x128xf32>
    %75 = arith.mulf %70, %74 : vector<128x128xf32>
    %c0_37 = arith.constant 0 : index
    %c0_38 = arith.constant 0 : index
    %76 = vector.load %arg7[%c0_37, %c0_38] : memref<1x128xf32, #tpu.memory_space<vmem>>, vector<1x128xf32>
    %77 = vector.shape_cast %76 : vector<1x128xf32> to vector<128xf32>
    %78 = vector.shape_cast %77 : vector<128xf32> to vector<1x128xf32>
    %79 = vector.broadcast %78 : vector<1x128xf32> to vector<128x128xf32>
    %80 = arith.addf %75, %79 : vector<128x128xf32>
    %c0_39 = arith.constant 0 : index
    %c0_40 = arith.constant 0 : index
    %c0_41 = arith.constant 0 : index
    %81 = vector.load %arg8[%c0_39, %c0_40, %c0_41] : memref<1x128x128xf32, #tpu.memory_space<vmem>>, vector<1x128x128xf32>
    %82 = vector.shape_cast %81 : vector<1x128x128xf32> to vector<128x128xf32>
    %83 = vector.shape_cast %80 : vector<128x128xf32> to vector<1x128x128xf32>
    tpu.vector_store %arg8[%c0_39, %c0_40, %c0_41], %83 {strides = array<i32>} : memref<1x128x128xf32, #tpu.memory_space<vmem>>, vector<1x128x128xf32>,
    return
  }
  func.func @transform_0(%arg0: i32, %arg1: i32) -> (i32, i32, i32) {
    %c0_i32 = arith.constant 0 : i32
    %c0_i32_0 = arith.constant 0 : i32
    return %arg0, %arg1, %c0_i32 : i32, i32, i32
  }
  func.func @transform_2(%arg0: i32, %arg1: i32) -> (i32, i32) {
    %c0_i32 = arith.constant 0 : i32
    %c0_i32_0 = arith.constant 0 : i32
    %c0_i32_1 = arith.constant 0 : i32
    return %c0_i32, %c0_i32_0 : i32, i32
  }
  func.func @transform_3(%arg0: i32, %arg1: i32) -> (i32, i32) {
    %c0_i32 = arith.constant 0 : i32
    %c0_i32_0 = arith.constant 0 : i32
    %c0_i32_1 = arith.constant 0 : i32
    return %c0_i32, %c0_i32_0 : i32, i32
  }
  func.func @transform_4(%arg0: i32, %arg1: i32) -> (i32, i32) {
    %c0_i32 = arith.constant 0 : i32
    %c0_i32_0 = arith.constant 0 : i32
    %c0_i32_1 = arith.constant 0 : i32
    return %c0_i32, %c0_i32_0 : i32, i32
  }
  func.func @transform_5(%arg0: i32, %arg1: i32) -> (i32, i32) {
    %c0_i32 = arith.constant 0 : i32
    %c0_i32_0 = arith.constant 0 : i32
    %c0_i32_1 = arith.constant 0 : i32
    return %c0_i32, %c0_i32_0 : i32, i32
  }
  func.func @transform_6(%arg0: i32, %arg1: i32) -> (i32, i32, i32) {
    %c0_i32 = arith.constant 0 : i32
    %c0_i32_0 = arith.constant 0 : i32
    return %arg0, %arg1, %c0_i32 : i32, i32, i32
  }
}

</mosaic_0001>

<bundles_post_ra>
// kernel: tpu_custom_call.1
= control target key start
LH: loop header
LB: loop body
LE: loop exit
PB: predicated region body
PF: predicated region fallthrough
CT: control target
= control target key end

     0   :  { %s2544_s0 = inlined_call_operand.hbm [shape: f32[2,256,128], index: 0, kind: input, shape index: {}]   ;;  %s2545_s1 = inlined_call_operand.hbm [shape: f32[2,256,128], index: 1, kind: input, shape index: {}]   ;;  %s2546_s2 = inlined_call_operand.hbm [shape: f32[384,128], index: 2, kind: input, shape index: {}]   ;;  %s2547_s3 = inlined_call_operand.vmem [shape: f32[1,128], index: 3, kind: input, shape index: {}]   ;;  %s2548_s4 = inlined_call_operand.vmem [shape: f32[1,128], index: 4, kind: input, shape index: {}]   ;;  %s2549_s5 = inlined_call_operand.vmem [shape: f32[1,128], index: 5, kind: input, shape index: {}]   ;;  %s2550_s6 = inlined_call_operand.hbm [shape: f32[2,256,128], index: 6, kind: output, shape index: {}]  }
   0x1   :  { %2565 = sst [smem:[#allocation27_spill]] %s2546_s2 }
   0x2   :  { %2566 = sst [smem:[#allocation28_spill]] %s2550_s6 }
   0x3   :  { %11 = vsyncpa [#allocation5], 0 }
   0x4   :  { %13 = vsyncpa [#allocation5 + $0x1], 0 }
   0x5   :  { %14 = vsyncpa [#allocation8], 0 }
   0x6   :  { %15 = vsyncpa [#allocation6], 0 }
   0x7   :  { %17 = vsyncpa [#allocation6 + $0x1], 0  ;;  %s1850_s21 = smov 0   ;;  %s1852_s22 = smov 0  }
   0x8   :  { %s1854_s23 = smov 0   ;;  %s1856_s24 = smov 0  }
   0x9   :  { %s1858_s25 = smov 0   ;;  %s1860_s26 = smov 0  }
   0xa   :  { %s1862_s27 = smov 0   ;;  %s1864_s28 = smov 0  }
   0xb LB: > { %2567 = sst [smem:[#allocation21_spill]] %s1776_s21  ;;  %s1204_s29 = sadd.s32 4294967295, %s1804_s28   ;;  %s1804_s28 = sphi %s1864_s28, %s23_s28   ;;  %s1800_s27 = sphi %s1862_s27, %s2602_s27   ;;  %s1796_s26 = sphi %s1860_s26, %s2596_s26   ;;  %s1792_s25 = sphi %s1858_s25, %s2601_s25   ;;  %s1788_s24 = sphi %s1856_s24, %s2595_s24   ;;  %s1784_s23 = sphi %s1854_s23, %s2600_s23   ;;  %s1780_s22 = sphi %s1852_s22, %s2599_s22   ;;  %s1776_s21 = sphi %s1850_s21, %s2598_s21  }
   0xc   : > { %2568 = sst [smem:[#allocation22_spill]] %s1796_s26  ;;  %s1205_s30 = sadd.s32 4294967294, %s1804_s28  }
   0xd   : > { %p57_p0 = scmp.ne.s32.totalorder %s1780_s22, %s1776_s21  ;;  %p1894_p1 = scmp.eq.s32.totalorder %s1204_s29, 0 }
   0xe   : > { %p1898_p2 = scmp.eq.s32.totalorder %s1204_s29, 3  ;;  %p173_p3 = scmp.eq.s32.totalorder %s1205_s30, 3 }
   0xf   : > { %s2569_s7 = scalar_select %p1894_p1, 1, 0 }
  0x10   : > { %s2570_s8 = scalar_select %p1898_p2, 1, 0 }
  0x11   : > { %p1904_p4 = por %p1894_p1, %p57_p0  ;;  %p1206_p5 = scmp.ge.s32.totalorder %s1804_s28, 1 }
  0x12   : > { %p1909_p6 = por %p173_p3, %p57_p0  ;;  %p180_p7 = scmp.lt.s32.totalorder %s1804_s28, 5 }
  0x13   : > { %s2571_s9 = scalar_select %p1904_p4, 1, 0 }
  0x14   : > { %s2572_s10 = scalar_select %p1909_p6, 1, 0 }
  0x15   : > { %p1914_p8 = pnand %p1206_p5, %p180_p7  ;;  %s1806_s12 = smov [#allocation7]  }
  0x16   : > { %2573 = sst [smem:[#allocation23_spill]] %s2572_s10  ;;  %s192_s13 = sshll.u32 %s1806_s12, 4  ;;  %s193_s13 = int_to_ptr.vmem [resolvable:$true] %s192_s13 }
  0x17   : > { %s2574_s11 = scalar_select %p1914_p8, 1, 0 }
  0x18   : > { %p1473_p9 = pneg %p1914_p8  ;;  %s2576_s2 = sld [smem:[#allocation27_spill]] }
  0x1a   : > { %p1922_p10 = pnand %p1473_p9, %p1894_p1 }
  0x1c   : > { %p1594_p12 = pneg %p1922_p10 }
  0x1e   : > { %s1592_s17 = scalar_lea.hbm %s2576_s2, 6144 }
  0x1f   : > { %p1593_p11 = scmp.ne.s32.totalorder %s2576_s2, %s1592_s17  ;;  %p1599_p3 = scmp.lt.u32.totalorder %s1592_s17, %s2576_s2 }
  0x21   : > { %p1595_p13 = pnand %p1594_p12, %p1593_p11 }
  0x23   : > { %p1596_p0 = pneg %p1595_p13 }
  0x25   : > { %p1601_p5 = pnand %p1599_p3, %p1596_p0 }
  0x27   : > { %1604 = shalt.err (!%p1601_p5)
}
  0x28   : > { %s1605_s30 = scalar_lea.vmem %s193_s13, 6144  ;;  %p1613_p1 = scmp.lt.s32.totalorder %s193_s13, %s193_s13 }
  0x29   : > { %p1606_p7 = scmp.ne.s32.totalorder %s193_s13, %s1605_s30  ;;  %p1614_p4 = scmp.lt.s32.totalorder %s1605_s30, %s1605_s30 }
  0x2b   : > { %p1608_p9 = pnand %p1606_p7, %p1594_p12  ;;  %p1615_p8 = por %p1614_p4, %p1613_p1 }
  0x2d   : > { %p1609_p6 = pneg %p1608_p9 }
  0x2f   : > { %p1616_p2 = pnand %p1615_p8, %p1609_p6 }
  0x31   : > { %1619 = shalt.err (!%p1616_p2)
}
  0x32   : > { %s2555_s12 = smov 128   ;;  %s2556_s15 = smov 8  }
  0x33   : > { %1476 = dma.hbm_to_vmem [thread:$0]  (!%p1922_p10), %s2576_s2, 6144, %s193_s13, [#allocation8], %s2555_s12, %s2555_s12, %s2556_s15  }
  0x34   : > { %s32_s18 = sadd.s32 1, %s1796_s26  ;;  %s35_s19 = sadd.s32 1, %s1800_s27 }
  0x35   : > { %p33_p1 = scmp.ge.s32.totalorder %s32_s18, 2  ;;  %s44_s20 = sadd.s32 1, %s1784_s23 }
  0x36   : > { %p51_p2 = scmp.ne.s32.totalorder %s1784_s23, %s1780_s22  ;;  %p52_p4 = scmp.eq.s32.totalorder %s1804_s28, 0 }
  0x37   : > { %s2604_s18 = smov (%p33_p1, %s32_s18), 0  ;;  %s2606_s19 = smov (!%p33_p1, %s35_s19), %s1800_s27 }
  0x38   : > { %2577 = sst [smem:[#allocation24_spill]] %s2604_s18  ;;  %s40_s14 = ssub.s32 %s1796_s26, %s2604_s18 }
  0x39   : > { %p37_p6 = scmp.ge.s32.totalorder %s2606_s19, 2  ;;  %p2578_p8 = scmp.ne.s32.totalorder %s2570_s8, 0 }
  0x3a   : > { %p1962_p10 = por %p52_p4, %p51_p2  ;;  %p1486_p12 = scmp.lt.s32.totalorder %s1804_s28, 4 }
  0x3b   : > { %p1958_p11 = por %p2578_p8, %p51_p2  ;;  %s2608_s19 = smov (%p37_p6, %s2606_s19), 0 }
  0x3c   : > { %2582 = sst [smem:[#allocation26_spill]] %s2608_s19  ;;  %s215_s30 = sand.u32 1, %s1784_s23  }
  0x3d   : > { %s2579_s29 = scalar_select %p1958_p11, 1, 0 }
  0x3e   : > { %s1210_s16 = sshll.u32 %s1796_s26, 4  ;;  %s39_s17 = ssub.s32 %s1800_s27, %s2608_s19 }
  0x3f   : > { %2580 = sst [smem:[#allocation25_spill]] %s2579_s29  ;;  %s41_s12 = sor.u32 %s40_s14, %s39_s17 }
  0x40   : > { %s1209_s15 = sshll.u32 %s215_s30, 7  ;;  %p42_p13 = scmp.eq.s32.totalorder %s41_s12, 0 }
  0x41   : > { %s1211_s8 = sshll.u32 %s1800_s27, 5  ;;  %s219_s2 = scalar_lea.vmem [#allocation4], %s1209_s15 }
  0x42   : > { %s228_s18 = sshll.u32 %s219_s2, 4  ;;  %s225_s21 = sadd.s32 %s1211_s8, %s1210_s16  ;;  %s1977_s18 = int_to_ptr.vmem [resolvable:$true] %s228_s18 }
  0x43   : > { %s1975_s10 = scalar_select %p42_p13, %s1784_s23, %s44_s20  }
  0x44   : > { %s1212_s6 = sshll.u32 %s225_s21, 7  ;;  %p1983_p0 = pnand %p1486_p12, %p1962_p10 }
  0x45   : > { %s1990_s12 = scalar_lea.hbm %s2544_s0, %s1212_s6  ;;  %s1992_s2 = scalar_lea.sflag [#allocation5], %s215_s30 }
  0x46   : > { %s1620_s21 = scalar_lea.hbm %s1990_s12, 2048  ;;  %p1622_p5 = pneg %p1983_p0 }
  0x47   : > { %p1621_p3 = scmp.ne.s32.totalorder %s1990_s12, %s1620_s21  ;;  %s1625_s19 = scalar_lea.hbm %s2544_s0, 8192 }
  0x48   : > { %p1626_p1 = scmp.lt.u32.totalorder %s1990_s12, %s2544_s0  ;;  %p1627_p2 = scmp.lt.u32.totalorder %s1625_s19, %s1620_s21 }
  0x49   : > { %p1623_p7 = pnand %p1622_p5, %p1621_p3  ;;  %p1629_p6 = scmp.lt.u32.totalorder %s1620_s21, %s1990_s12 }
  0x4a   : > { %p1628_p4 = por %p1627_p2, %p1626_p1 }
  0x4b   : > { %p1624_p9 = pneg %p1623_p7 }
  0x4c   : > { %p1630_p8 = por %p1629_p6, %p1628_p4 }
  0x4e   : > { %p1631_p10 = pnand %p1630_p8, %p1624_p9 }
  0x50   : > { %1634 = shalt.err (!%p1631_p10)
}
  0x51   : > { %s1635_s14 = scalar_lea.vmem %s1977_s18, 2048  ;;  %s1809_s13 = smov [#allocation4]  }
  0x52   : > { %p1636_p12 = scmp.ne.s32.totalorder %s1977_s18, %s1635_s14  ;;  %s1640_s30 = sshll.u32 %s1809_s13, 4  ;;  %s1641_s30 = int_to_ptr.vmem [resolvable:$false] %s1640_s30 }
  0x53   : > { %s1642_s16 = scalar_lea.vmem %s1641_s30, 4096  ;;  %p1643_p7 = scmp.lt.s32.totalorder %s1977_s18, %s1641_s30 }
  0x54   : > { %p1638_p13 = pnand %p1636_p12, %p1622_p5  ;;  %p1644_p1 = scmp.lt.s32.totalorder %s1642_s16, %s1635_s14 }
  0x56   : > { %p1639_p3 = pneg %p1638_p13  ;;  %p1645_p2 = por %p1644_p1, %p1643_p7 }
  0x58   : > { %p1646_p4 = pnand %p1645_p2, %p1639_p3 }
  0x5a   : > { %1649 = shalt.err (!%p1646_p4)
}
  0x5b   : > { %s2584_s17 = smov 8   ;;  %s2585_s8 = smov 128  }
  0x5c   : > { %1480 = dma.hbm_to_vmem [thread:$0]  (!%p1983_p0), %s1990_s12, 2048, %s1977_s18, %s1992_s2, %s2585_s8, %s2585_s8, %s2584_s17  }
  0x5d   : > { %p2586_p5 = scmp.ne.s32.totalorder %s2574_s11, 0 }
  0x5e   : > { %s2026_s21 = sand.u32 (!%p2586_p5), 1, %s1780_s22   ;;  %p2587_p9 = scmp.ne.s32.totalorder (!%p2586_p5), %s2571_s9, 0 }
  0x5f   : > { %240 = sbr.rel (%p2586_p5) target bundleno = 804 (0x324), region = 40  ;;  %s1214_s15 = sshll.u32 (!%p2586_p5), %s2026_s21, 7 }
  0x60   : > { %s243_s26 = scalar_lea.sflag (!%p2586_p5), [#allocation5], %s2026_s21  ;;  %s2032_s29 = scalar_lea.vmem (!%p2586_p5), [#allocation4], %s1214_s15 }
  0x66   : > { %1759 = dma.done.wait (%p2587_p9), %s243_s26, 2048  }
  0x67   : > { %1761 = vsyncadd (%p2587_p9), %s243_s26, 4294965248  ;;  %p2588_p0 = scmp.ne.s32.totalorder %s2569_s7, 0 }
  0x69   : > { %1763 = dma.done.wait (%p2588_p0), [#allocation8], 6144  }
  0x6a   : > { %1765 = vsyncadd (%p2588_p0), [#allocation8], 4294961152  ;;  %s1217_s11 = sshll.u32 %s1788_s24, 7  ;;  %s1219_s12 = sshll.u32 %s1792_s25, 8  ;;  %v2052_v0 = vld [vmem:[%s2032_s29] sm:$0xff]  ;;  %v2055_v1 = vld [vmem:[%s2032_s29 + $0x8] sm:$0xff] }
  0x6b   : > { %s1218_s18 = sadd.s32 4294967295, %s1217_s11  ;;  %s1810_s9 = smov [#allocation2]   ;;  %v2058_v2 = vld [vmem:[%s2032_s29 + $0x10] sm:$0xff]  ;;  %v2061_v3 = vld [vmem:[%s2032_s29 + $0x18] sm:$0xff]  ;;  %v2064_v4 = vld [vmem:[%s2032_s29 + $0x20] sm:$0xff] }
  0x6c   : > { %p281_p6 = scmp.gt.s32.totalorder %s1218_s18, 0  ;;  %s297_s2 = sshll.u32 %s1810_s9, 4  ;;  %v2067_v5 = vld [vmem:[%s2032_s29 + $0x28] sm:$0xff]  ;;  %v2075_v6 = vld [vmem:[%s2032_s29 + $0x30] sm:$0xff]  ;;  %v2078_v7 = vld [vmem:[%s2032_s29 + $0x38] sm:$0xff]  ;;  %s2046_s2 = int_to_ptr.vmem [resolvable:$true] %s297_s2 }
  0x6d   : > { %s2044_s19 = sadd.s32 128, %s1217_s11  ;;  %s1811_s30 = smov [#allocation2 + $0x1]   ;;  %v2081_v8 = vld [vmem:[%s2032_s29 + $0x40] sm:$0xff] }
  0x6e   : > { %s2610_s18 = smov (!%p281_p6, %s1218_s18), 0  ;;  %p284_p8 = scmp.lt.s32.totalorder %s2044_s19, 255 }
  0x6f   : > { %s287_s7 = sadd.s32 %s1219_s12, %s2610_s18  ;;  %s2072_s16 = sshll.u32 %s1811_s30, 4  ;;  %s314_s16 = int_to_ptr.vmem [resolvable:$true] %s2072_s16 }
  0x70   : > { %s1220_s6 = sshll.u32 %s287_s7, 4  ;;  %s1652_s11 = scalar_lea.hbm %s2545_s1, 8192 }
  0x71   : > { %s289_s13 = scalar_lea.hbm %s2545_s1, %s1220_s6 }
  0x72   : > { %s1650_s17 = scalar_lea.hbm %s289_s13, 16  ;;  %p1653_p12 = scmp.lt.u32.totalorder %s289_s13, %s2545_s1 }
  0x73   : > { %p1651_p10 = scmp.ne.s32.totalorder %s289_s13, %s1650_s17  ;;  %p1654_p13 = scmp.lt.u32.totalorder %s1652_s11, %s1650_s17 }
  0x74   : > { %p1656_p7 = scmp.lt.u32.totalorder %s1650_s17, %s289_s13 }
  0x75   : > { %p1655_p3 = por %p1654_p13, %p1653_p12 }
  0x77   : > { %p1657_p1 = por %p1656_p7, %p1655_p3 }
  0x79   : > { %p1658_p2 = pnand %p1657_p1, %p1651_p10 }
  0x7b   : > { %1661 = shalt.err (!%p1658_p2)  }
  0x7c   : > { %s1662_s20 = scalar_lea.vmem %s2046_s2, 16  ;;  %s1666_s14 = scalar_lea.vmem %s2046_s2, 32 }
  0x7d   : > { %p1663_p4 = scmp.ne.s32.totalorder %s2046_s2, %s1662_s20  ;;  %p1667_p5 = scmp.lt.s32.totalorder %s2046_s2, %s2046_s2 }
  0x7e   : > { %p1668_p9 = scmp.lt.s32.totalorder %s1666_s14, %s1662_s20 }
  0x80   : > { %p1669_p0 = por %p1668_p9, %p1667_p5 }
  0x82   : > { %p1670_p6 = pnand %p1669_p0, %p1663_p4 }
  0x84   : > { %1673 = shalt.err (!%p1670_p6)  }
  0x85   : > { %300 = dma.hbm_to_vmem [thread:$0]  %s289_s13, 16, %s2046_s2, [#allocation3]  ;;  %v2102_v9 = vld [vmem:[%s2032_s29 + $0x48] sm:$0xff]  ;;  %v2105_v10 = vld [vmem:[%s2032_s29 + $0x50] sm:$0xff]  ;;  %v2108_v11 = vld [vmem:[%s2032_s29 + $0x58] sm:$0xff] }
  0x86   : > { %s2612_s19 = smov (!%p284_p8, %s2044_s19), 255  ;;  %v2114_v12 = vld [vmem:[%s2032_s29 + $0x60] sm:$0xff]  ;;  %v2117_v13 = vld [vmem:[%s2032_s29 + $0x68] sm:$0xff]  ;;  %v2120_v14 = vld [vmem:[%s2032_s29 + $0x70] sm:$0xff] }
  0x87   : > { %v2123_v15 = vld [vmem:[%s2032_s29 + $0x78] sm:$0xff]  ;;  %s301_s30 = sadd.s32 %s1219_s12, %s2612_s19 }
  0x88   : > { %s1221_s13 = sshll.u32 %s301_s30, 4 }
  0x89   : > { %s303_s26 = scalar_lea.hbm %s2545_s1, %s1221_s13 }
  0x8a   : > { %s1674_s18 = scalar_lea.hbm %s303_s26, 16  ;;  %p1677_p8 = scmp.lt.u32.totalorder %s303_s26, %s2545_s1 }
  0x8b   : > { %p1675_p10 = scmp.ne.s32.totalorder %s303_s26, %s1674_s18  ;;  %p1678_p12 = scmp.lt.u32.totalorder %s1652_s11, %s1674_s18 }
  0x8c   : > { %p1680_p3 = scmp.lt.u32.totalorder %s1674_s18, %s303_s26 }
  0x8d   : > { %p1679_p13 = por %p1678_p12, %p1677_p8 }
  0x8f   : > { %p1681_p7 = por %p1680_p3, %p1679_p13 }
  0x91   : > { %p1682_p1 = pnand %p1681_p7, %p1675_p10 }
  0x93   : > { %1685 = shalt.err (!%p1682_p1)  }
  0x94   : > { %s1686_s29 = scalar_lea.vmem %s314_s16, 16  ;;  %p1691_p4 = scmp.lt.s32.totalorder %s314_s16, %s2046_s2 }
  0x95   : > { %p1687_p2 = scmp.ne.s32.totalorder %s314_s16, %s1686_s29  ;;  %p1692_p5 = scmp.lt.s32.totalorder %s1666_s14, %s1686_s29 }
  0x97   : > { %p1693_p9 = por %p1692_p5, %p1691_p4 }
  0x99   : > { %p1694_p0 = pnand %p1693_p9, %p1687_p2 }
  0x9b   : > { %1697 = shalt.err (!%p1694_p0)  }
  0x9c   : > { %316 = dma.hbm_to_vmem [thread:$0]  %s303_s26, 16, %s314_s16, [#allocation3 + $0x1] }
  0x9d   : > { %s2143_s12 = scalar_lea.vmem [#allocation9], %s1214_s15 }
  0x9e   : > { %1766 = dma.done.wait [#allocation3], 16 }
  0x9f   : > { %1767 = vsyncadd [#allocation3], 4294967280 }
  0xa0   : > { %1768 = dma.done.wait [#allocation3 + $0x1], 16 }
  0xa1   : > { %1769 = vsyncadd [#allocation3 + $0x1], 4294967280  ;;  %586 = vmatprep.mubr.f32.mxu0 %v2052_v0  ;;  %vm415_vm0 = vcmask 1046528   ;;  %v416_v16 = vrot.slane %v2052_v0, 1  ;;  %v417_v17 = vrot.slane %v2055_v1, 1  ;;  %v483_v19 = vld [vmem:[#allocation7 + $0x80] sm:$0xff] }
  0xa2   : > { %v484_v20 = vld [vmem:[#allocation7 + $0x88] sm:$0xff]  ;;  %v467_v21 = vld [vmem:[#allocation7] sm:$0xff]  ;;  %v485_v24 = vld [vmem:[#allocation7 + $0x90] sm:$0xff]  ;;  %p339_p6 = scmp.gt.s32.totalorder %s1788_s24, 0  ;;  %vm366_vm2 = vcmask 1040384   ;;  %s344_s2 = sadd.s32 1, %s1788_s24 }
  0xa3   : > { %v418_v18 = vsel %vm415_vm0, %v416_v16, %v417_v17  ;;  %v1401_v22 = vpack.c.bf16 %v484_v20, %v483_v19  ;;  %v468_v23 = vld [vmem:[#allocation7 + $0x8] sm:$0xff]  ;;  %v486_v25 = vld [vmem:[#allocation7 + $0x98] sm:$0xff]  ;;  %v499_v28 = vld [vmem:[#allocation7 + $0x100] sm:$0xff]  ;;  %p2179_p10 = scmp.lt.s32.totalorder %s344_s2, 2  ;;  %s1226_s26 = sshll.u32 %s1788_s24, 4 }
  0xa4   : > { %1377 = vmatprep.mubr.f32.mxu1 %v418_v18  ;;  %v1403_v26 = vpack.c.bf16 %v468_v23, %v467_v21  ;;  %v1405_v27 = vpack.c.bf16 %v486_v25, %v485_v24  ;;  %v500_v29 = vld [vmem:[#allocation7 + $0x108] sm:$0xff]  ;;  %v469_v30 = vld [vmem:[#allocation7 + $0x10] sm:$0xff]  ;;  %v470_v32 = vld [vmem:[#allocation7 + $0x18] sm:$0xff]  ;;  %s340_s15 = scalar_select %p339_p6, 1, 0 }
  0xa5   : > { %1402 = vmatprep.subr.bf16.mxu0 %v1401_v22  ;;  %v1433_v31 = vpack.c.bf16 %v500_v29, %v499_v28  ;;  %v487_v33 = vld [vmem:[#allocation7 + $0xa0] sm:$0xff]  ;;  %v488_v34 = vld [vmem:[#allocation7 + $0xa8] sm:$0xff]  ;;  %v1407_v35 = vpack.c.bf16 %v470_v32, %v469_v30  ;;  %v501_v36 = vld [vmem:[#allocation7 + $0x110] sm:$0xff]  ;;  %s346_s16 = scalar_select %p2179_p10, 1, 0 }
  0xa6   : > { %1404 = vmatpush3.bf16.msra.mxu0 %v1403_v26  ;;  %v502_v37 = vld [vmem:[#allocation7 + $0x118] sm:$0xff]  ;;  %v1409_v38 = vpack.c.bf16 %v488_v34, %v487_v33  ;;  %v471_v40 = vld [vmem:[#allocation7 + $0x20] sm:$0xff]  ;;  %v472_v41 = vld [vmem:[#allocation7 + $0x28] sm:$0xff]  ;;  %s1227_s18 = sshll.u32 %s1792_s25, 5  ;;  %s1083_s24 = sshll.u32 %s2143_s12, 4  ;;  %s2488_s24 = int_to_ptr.vmem [resolvable:$true] %s1083_s24 }
  0xa7   : > { %1406 = vmatprep.subr.bf16.mxu0 %v1405_v27  ;;  %1434 = vmatprep.subr.bf16.mxu1 %v1433_v31  ;;  %v1437_v39 = vpack.c.bf16 %v502_v37, %v501_v36  ;;  %v489_v42 = vld [vmem:[#allocation7 + $0xb0] sm:$0xff]  ;;  %v490_v43 = vld [vmem:[#allocation7 + $0xb8] sm:$0xff]  ;;  %v503_v44 = vld [vmem:[#allocation7 + $0x120] sm:$0xff]  ;;  %v1411_v47 = vpack.c.bf16 %v472_v41, %v471_v40  ;;  %v341_v36 = vstv %s340_s15  ;;  %s1080_s9 = sadd.s32 %s1227_s18, %s1226_s26  ;;  %s2591_s29 = sld [smem:[#allocation28_spill]] }
  0xa8   : > { %1436 = vmatpush3.bf16.msra.mxu1 %v1433_v31  ;;  %v504_v45 = vld [vmem:[#allocation7 + $0x128] sm:$0xff]  ;;  %v505_v48 = vld [vmem:[#allocation7 + $0x130] sm:$0xff]  ;;  %v506_v49 = vld [vmem:[#allocation7 + $0x138] sm:$0xff]  ;;  %v1413_v50 = vpack.c.bf16 %v490_v43, %v489_v42  ;;  %vm342_vm1 = vcmp.eq.s32.totalorder %v341_v36, 1  ;;  %v443_v36 = vrot.slane %v2120_v14, 1  ;;  %s1228_s6 = sshll.u32 %s1080_s9, 7 }
  0xa9   : > { %1438 = vmatprep.subr.bf16.mxu1 %v1437_v39  ;;  %v1441_v46 = vpack.c.bf16 %v504_v45, %v503_v44  ;;  %v473_v51 = vld [vmem:[#allocation7 + $0x30] sm:$0xff]  ;;  %v474_v52 = vld [vmem:[#allocation7 + $0x38] sm:$0xff]  ;;  %v491_v53 = vld [vmem:[#allocation7 + $0xc0] sm:$0xff]  ;;  %v1445_v55 = vpack.c.bf16 %v506_v49, %v505_v48  ;;  %v419_v48 = vrot.slane %v2058_v2, 1  ;;  %v421_v49 = vrot.slane %v2061_v3, 1  ;;  %s1068_s2 = scalar_lea.sflag [#allocation6], %s2026_s21 }
  0xaa   : > { %1408 = vmatpush3.bf16.msra.mxu0 %v1407_v35  ;;  %v492_v54 = vld [vmem:[#allocation7 + $0xc8] sm:$0xff]  ;;  %v1415_v56 = vpack.c.bf16 %v474_v52, %v473_v51  ;;  %v507_v57 = vld [vmem:[#allocation7 + $0x140] sm:$0xff]  ;;  %v493_v62 = vld [vmem:[#allocation7 + $0xd0] sm:$0xff]  ;;  %v368_v51 = vrot.slane %v2055_v1, 7  ;;  %s1698_s19 = scalar_lea.vmem %s2488_s24, 2048 }
  0xab   : > { %1410 = vmatprep.subr.bf16.mxu0 %v1409_v38  ;;  %v508_v58 = vld [vmem:[#allocation7 + $0x148] sm:$0xff]  ;;  %v1417_v59 = vpack.c.bf16 %v492_v54, %v491_v53  ;;  %v475_v60 = vld [vmem:[#allocation7 + $0x40] sm:$0xff]  ;;  %v494_v63 = vld [vmem:[#allocation7 + $0xd8] sm:$0xff]  ;;  %v420_v52 = vsel %vm415_vm0, %v417_v17, %v419_v48  ;;  %v423_v53 = vrot.slane %v2064_v4, 1  ;;  %v422_v54 = vsel %vm415_vm0, %v419_v48, %v421_v49  ;;  %p1699_p8 = scmp.ne.s32.totalorder %s2488_s24, %s1698_s19 }
  0xac   : > { %1440 = vmatpush3.bf16.msra.mxu1 %v1437_v39  ;;  %v476_v61 = vld [vmem:[#allocation7 + $0x48] sm:$0xff]  ;;  %v1449_v16 = vpack.c.bf16 %v508_v58, %v507_v57  ;;  %v509_v19 = vld [vmem:[#allocation7 + $0x150] sm:$0xff]  ;;  %v510_v20 = vld [vmem:[#allocation7 + $0x158] sm:$0xff]  ;;  %v1421_v21 = vpack.c.bf16 %v494_v63, %v493_v62  ;;  %v370_v57 = vrot.slane %v2058_v2, 7  ;;  %v427_v17 = vrot.slane %v2075_v6, 1 }
  0xad   : > { %1442 = vmatprep.subr.bf16.mxu1 %v1441_v46  ;;  %v1419_v18 = vpack.c.bf16 %v476_v61, %v475_v60  ;;  %v477_v22 = vld [vmem:[#allocation7 + $0x50] sm:$0xff]  ;;  %v478_v23 = vld [vmem:[#allocation7 + $0x58] sm:$0xff]  ;;  %v495_v24 = vld [vmem:[#allocation7 + $0xe0] sm:$0xff]  ;;  %v1453_v26 = vpack.c.bf16 %v510_v20, %v509_v19  ;;  %v424_v58 = vsel %vm415_vm0, %v421_v49, %v423_v53  ;;  %v429_v60 = vrot.slane %v2078_v7, 1  ;;  %s2486_s15 = scalar_lea.hbm %s2591_s29, %s1228_s6  ;;  %p1700_p12 = pnand %p1699_p8, %p1958_p11 }
  0xae   : > { %1412 = vmatpush3.bf16.msra.mxu0 %v1411_v47  ;;  %v496_v25 = vld [vmem:[#allocation7 + $0xe8] sm:$0xff]  ;;  %v1423_v27 = vpack.c.bf16 %v478_v23, %v477_v22  ;;  %v511_v28 = vld [vmem:[#allocation7 + $0x160] sm:$0xff]  ;;  %v497_v33 = vld [vmem:[#allocation7 + $0xf0] sm:$0xff]  ;;  %v371_v61 = vsel %vm366_vm2, %v368_v51, %v370_v57  ;;  %v372_v62 = vrot.slane %v2061_v3, 7  ;;  %v433_v19 = vrot.slane %v2102_v9, 1 }
  0xaf   : > { %1414 = vmatprep.subr.bf16.mxu0 %v1413_v50  ;;  %v512_v29 = vld [vmem:[#allocation7 + $0x168] sm:$0xff]  ;;  %v1425_v30 = vpack.c.bf16 %v496_v25, %v495_v24  ;;  %v479_v31 = vld [vmem:[#allocation7 + $0x60] sm:$0xff]  ;;  %v498_v34 = vld [vmem:[#allocation7 + $0xf8] sm:$0xff]  ;;  %v435_v23 = vrot.slane %v2105_v10, 1  ;;  %v437_v25 = vrot.slane %v2108_v11, 1  ;;  %v384_v49 = vrot.slane %v2102_v9, 7  ;;  %p1701_p13 = pneg %p1700_p12 }
  0xb0   : > { %1444 = vmatpush3.bf16.msra.mxu1 %v1441_v46  ;;  %v480_v32 = vld [vmem:[#allocation7 + $0x68] sm:$0xff]  ;;  %v1457_v35 = vpack.c.bf16 %v512_v29, %v511_v28  ;;  %v513_v38 = vld [vmem:[#allocation7 + $0x170] sm:$0xff]  ;;  %v514_v39 = vld [vmem:[#allocation7 + $0x178] sm:$0xff]  ;;  %v1429_v40 = vpack.c.bf16 %v498_v34, %v497_v33  ;;  %v367_v46 = vrot.slane %v2052_v0, 7  ;;  %v373_v20 = vsel %vm366_vm2, %v370_v57, %v372_v62 }
  0xb1   : > { %1446 = vmatprep.subr.bf16.mxu1 %v1445_v55  ;;  %v1427_v37 = vpack.c.bf16 %v480_v32, %v479_v31  ;;  %v481_v41 = vld [vmem:[#allocation7 + $0x70] sm:$0xff]  ;;  %v482_v42 = vld [vmem:[#allocation7 + $0x78] sm:$0xff]  ;;  %v1461_v44 = vpack.c.bf16 %v514_v39, %v513_v38  ;;  %v347_v28 = vstv %s346_s16  ;;  %v436_v29 = vsel %vm415_vm0, %v433_v19, %v435_v23  ;;  %s1812_s16 = smov [#allocation9]  }
  0xb2   : > { %1416 = vmatpush3.bf16.msra.mxu0 %v1415_v56  ;;  %v2154_v43 = vld [vmem:[#allocation2] sm:$0x3]  ;;  %v1431_v45 = vpack.c.bf16 %v482_v42, %v481_v41  ;;  %v369_v56 = vsel %vm366_vm2, %v367_v46, %v368_v51  ;;  %v438_v31 = vsel %vm415_vm0, %v435_v23, %v437_v25  ;;  %v441_v32 = vrot.slane %v2117_v13, 1  ;;  %s1702_s11 = sshll.u32 %s1812_s16, 4  ;;  %s1703_s11 = int_to_ptr.vmem [resolvable:$false] %s1702_s11 }
  0xb3   : > { %1418 = vmatprep.subr.bf16.mxu0 %v1417_v59  ;;  %v343_v47 = vsel %vm342_vm1, %v2154_v43, 0.0  ;;  %vm348_vm3 = vcmp.eq.s32.totalorder %v347_v28, 1  ;;  %v378_v34 = vrot.slane %v2075_v6, 7  ;;  %v445_v39 = vrot.slane %v2123_v15, 1  ;;  %s1704_s14 = scalar_lea.vmem %s1703_s11, 4096  ;;  %p1705_p3 = scmp.lt.s32.totalorder %s2488_s24, %s1703_s11 }
  0xb4   : > { %1448 = vmatpush3.bf16.msra.mxu1 %v1445_v55  ;;  %v414_v50 = vsel %vm366_vm2, %v343_v47, %v367_v46  ;;  %v425_v55 = vrot.slane %v2067_v5, 1  ;;  %v380_v41 = vrot.slane %v2078_v7, 7  ;;  %v444_v42 = vsel %vm415_vm0, %v441_v32, %v443_v36  ;;  %p1706_p7 = scmp.lt.s32.totalorder %s1704_s14, %s1698_s19 }
  0xb5   : > { %1450 = vmatprep.subr.bf16.mxu1 %v1449_v16  ;;  %v382_v46 = vrot.slane %v2081_v8, 7  ;;  %v386_v51 = vrot.slane %v2105_v10, 7  ;;  %v392_v57 = vrot.slane %v2117_v13, 7 }
  0xb6   : > { %1420 = vmatpush3.bf16.msra.mxu0 %v1419_v18  ;;  %v426_v59 = vsel %vm415_vm0, %v423_v53, %v425_v55  ;;  %v428_v63 = vsel %vm415_vm0, %v425_v55, %v427_v17  ;;  %v430_v18 = vsel %vm415_vm0, %v427_v17, %v429_v60  ;;  %v388_v53 = vrot.slane %v2108_v11, 7  ;;  %p1707_p1 = por %p1706_p7, %p1705_p3 }
  0xb7   : > { %1422 = vmatprep.subr.bf16.mxu0 %v1421_v21  ;;  %v374_v21 = vrot.slane %v2064_v4, 7  ;;  %v383_v48 = vsel %vm366_vm2, %v380_v41, %v382_v46  ;;  %v390_v55 = vrot.slane %v2114_v12, 7  ;;  %v394_v17 = vrot.slane %v2120_v14, 7 }
  0xb8   : > { %1452 = vmatpush3.bf16.msra.mxu1 %v1449_v16  ;;  %v431_v16 = vrot.slane %v2081_v8, 1  ;;  %p1708_p2 = pnand %p1707_p1, %p1701_p13 }
  0xb9   : > { %1454 = vmatprep.subr.bf16.mxu1 %v1453_v26 }
  0xba   : > { %1424 = vmatpush3.bf16.msra.mxu0 %v1423_v27  ;;  %v432_v22 = vsel %vm415_vm0, %v429_v60, %v431_v16  ;;  %v434_v24 = vsel %vm415_vm0, %v431_v16, %v433_v19  ;;  %v376_v27 = vrot.slane %v2067_v5, 7  ;;  %v396_v60 = vrot.slane %v2123_v15, 7  ;;  %v2246_v16 = vld [vmem:[%s2547_s3] ss:$0 sm:$0xff] }
  0xbb   : > { %1426 = vmatprep.subr.bf16.mxu0 %v1425_v30  ;;  %v439_v30 = vrot.slane %v2114_v12, 1 }
  0xbc   : > { %1456 = vmatpush3.bf16.msra.mxu1 %v1453_v26  ;;  %v375_v26 = vsel %vm366_vm2, %v372_v62, %v374_v21  ;;  %v377_v33 = vsel %vm366_vm2, %v374_v21, %v376_v27 }
  0xbd   : > { %1458 = vmatprep.subr.bf16.mxu1 %v1457_v35  ;;  %v442_v38 = vsel %vm415_vm0, %v439_v30, %v441_v32 }
  0xbe   : > { %1428 = vmatpush3.bf16.msra.mxu0 %v1427_v37  ;;  %v349_v37 = vsel %vm348_vm3, %v2154_v43, 0.0  ;;  %v381_v43 = vsel %vm366_vm2, %v378_v34, %v380_v41 }
  0xbf   : > { %1430 = vmatprep.subr.bf16.mxu0 %v1429_v40  ;;  %v379_v40 = vsel %vm366_vm2, %v376_v27, %v378_v34 }
  0xc0   : > { %1460 = vmatpush3.bf16.msra.mxu1 %v1457_v35  ;;  %v440_v35 = vsel %vm415_vm0, %v437_v25, %v439_v30 }
  0xc1   : > { %1462 = vmatprep.subr.bf16.mxu1 %v1461_v44 }
  0xc2   : > { %1432 = vmatpush3.bf16.msra.mxu0 %v1431_v45  ;;  %v446_v45 = vsel %vm415_vm0, %v443_v36, %v445_v39 }
  0xc4   : > { %1464 = vmatpush3.bf16.msra.mxu1 %v1461_v44  ;;  %v464_v44 = vrot.slane %v349_v37, 2 }
  0xc5   : > { %587 = vmatmul.mubr.f32.vlgmr.msra.gmra.mrb[0].mxu0 %v414_v50  ;;  %v385_v50 = vsel %vm366_vm2, %v382_v46, %v384_v49 }
  0xc6   : > { %591 = vmatprep.mubr.f32.mxu0 %v2055_v1  ;;  %v466_v47 = vsel %vm415_vm0, %v445_v39, %v464_v44 }
  0xc7   : > { %1378 = vmatmul.mubr.f32.vlgmr.msra.gmra.mrb[0].mxu1 %v420_v52  ;;  %v387_v52 = vsel %vm366_vm2, %v384_v49, %v386_v51 }
  0xc8   : > { %1380 = vmatprep.mubr.f32.mxu1 %v422_v54  ;;  %v389_v54 = vsel %vm366_vm2, %v386_v51, %v388_v53 }
  0xc9   : > { %592 = vmatmul.mubr.f32.gmra.mrb[2].mxu0 %v369_v56  ;;  %v391_v56 = vsel %vm366_vm2, %v388_v53, %v390_v55 }
  0xca   : > { %596 = vmatprep.mubr.f32.mxu0 %v2058_v2 }
  0xcb   : > { %1381 = vmatmul.mubr.f32.gmra.mrb[2].mxu1 %v424_v58  ;;  %v393_v58 = vsel %vm366_vm2, %v390_v55, %v392_v57 }
  0xcc   : > { %1383 = vmatprep.mubr.f32.mxu1 %v426_v59  ;;  %v395_v59 = vsel %vm366_vm2, %v392_v57, %v394_v17 }
  0xcd   : > { %597 = vmatmul.mubr.f32.gmra.mrb[4].mxu0 %v371_v61  ;;  %v397_v61 = vsel %vm366_vm2, %v394_v17, %v396_v60 }
  0xce   : > { %601 = vmatprep.mubr.f32.mxu0 %v2061_v3 }
  0xcf   : > { %1384 = vmatmul.mubr.f32.gmra.mrb[4].mxu1 %v428_v63 }
  0xd0   : > { %1386 = vmatprep.mubr.f32.mxu1 %v430_v18 }
  0xd1   : > { %602 = vmatmul.mubr.f32.gmra.mrb[6].mxu0 %v373_v20 }
  0xd2   : > { %606 = vmatprep.mubr.f32.mxu0 %v2064_v4 }
  0xd3   : > { %1387 = vmatmul.mubr.f32.gmra.mrb[6].mxu1 %v432_v22 }
  0xd4   : > { %1389 = vmatprep.mubr.f32.mxu1 %v434_v24 }
  0xd5   : > { %607 = vmatmul.mubr.f32.gmra.mrb[8].mxu0 %v375_v26 }
  0xd6   : > { %611 = vmatprep.mubr.f32.mxu0 %v2067_v5 }
  0xd7   : > { %1390 = vmatmul.mubr.f32.gmra.mrb[8].mxu1 %v436_v29 }
  0xd8   : > { %1392 = vmatprep.mubr.f32.mxu1 %v438_v31 }
  0xd9   : > { %612 = vmatmul.mubr.f32.gmra.mrb[10].mxu0 %v377_v33 }
  0xda   : > { %616 = vmatprep.mubr.f32.mxu0 %v2075_v6 }
  0xdb   : > { %1393 = vmatmul.mubr.f32.gmra.mrb[10].mxu1 %v440_v35 }
  0xdc   : > { %1395 = vmatprep.mubr.f32.mxu1 %v442_v38 }
  0xdd   : > { %617 = vmatmul.mubr.f32.gmra.mrb[12].mxu0 %v379_v40 }
  0xde   : > { %621 = vmatprep.mubr.f32.mxu0 %v2078_v7 }
  0xdf   : > { %1396 = vmatmul.mubr.f32.gmra.mrb[12].mxu1 %v444_v42 }
  0xe0   : > { %1398 = vmatprep.mubr.f32.mxu1 %v446_v45 }
  0xe1   : > { %622 = vmatmul.mubr.f32.gmra.mrb[14].mxu0 %v381_v43 }
  0xe2   : > { %626 = vmatprep.mubr.f32.mxu0 %v2081_v8 }
  0xe3   : > { %1399 = vmatmul.mubr.f32.gmra.mrb[14].mxu1 %v466_v47 }
  0xe5   : > { %627 = vmatmul.mubr.f32.gmra.mrb[16].mxu0 %v383_v48 }
  0xe6   : > { %631 = vmatprep.mubr.f32.mxu0 %v2102_v9 }
  0xe9   : > { %632 = vmatmul.mubr.f32.gmra.mrb[18].mxu0 %v385_v50 }
  0xea   : > { %636 = vmatprep.mubr.f32.mxu0 %v2105_v10 }
  0xed   : > { %637 = vmatmul.mubr.f32.gmra.mrb[20].mxu0 %v387_v52 }
  0xee   : > { %641 = vmatprep.mubr.f32.mxu0 %v2108_v11 }
  0xf1   : > { %642 = vmatmul.mubr.f32.gmra.mrb[22].mxu0 %v389_v54 }
  0xf2   : > { %646 = vmatprep.mubr.f32.mxu0 %v2114_v12 }
  0xf5   : > { %647 = vmatmul.mubr.f32.gmra.mrb[24].mxu0 %v391_v56 }
  0xf6   : > { %651 = vmatprep.mubr.f32.mxu0 %v2117_v13 }
  0xf9   : > { %652 = vmatmul.mubr.f32.gmra.mrb[26].mxu0 %v393_v58 }
  0xfa   : > { %656 = vmatprep.mubr.f32.mxu0 %v2120_v14 }
  0xfd   : > { %657 = vmatmul.mubr.f32.gmra.mrb[28].mxu0 %v395_v59 }
  0xfe   : > { %661 = vmatprep.mubr.f32.mxu0 %v2123_v15 }
 0x101   : > { %662 = vmatmul.mubr.f32.gmra.mrb[30].mxu0 %v397_v61 }
 0x198   : > { %v1265_v62 = vpop.f32.mrb[0].mxu0 }
 0x199   : > { %v1266_v63 = vpop.f32.mrb[1].mxu0 }
 0x19a   : > { %v1267_v18 = vadd.f32 %v1266_v63, %v1265_v62  ;;  %v1379_v19 = vpop.f32.mrb[0].mxu1 }
 0x19b   : > { %v733_v20 = vpop.f32.mrb[1].mxu1 }
 0x19c   : > { %v1268_v21 = vpop.f32.mrb[2].mxu0  ;;  %v589_v22 = vadd.f32 %v1267_v18, %v2246_v16 }
 0x19d   : > { %v1269_v23 = vpop.f32.mrb[3].mxu0 }
 0x19e   : > { %v1270_v24 = vadd.f32 %v1269_v23, %v1268_v21  ;;  %v734_v25 = vadd.f32 %v733_v20, %v589_v22  ;;  %v1382_v26 = vpop.f32.mrb[2].mxu1 }
 0x19f   : > { %v743_v27 = vpop.f32.mrb[3].mxu1 }
 0x1a0   : > { %v594_v28 = vadd.f32 %v1270_v24, %v2246_v16  ;;  %v2251_v29 = vadd.f32 %v734_v25, %v2052_v0  ;;  %v1271_v30 = vpop.f32.mrb[4].mxu0 }
 0x1a1   : > { %v1272_v31 = vpop.f32.mrb[5].mxu0 }
 0x1a2   : > { %v1273_v32 = vadd.f32 %v1272_v31, %v1271_v30  ;;  %828 = vadd.xlane.f32.xlu0 %v2251_v29  ;;  %v739_v33 = vadd.f32 %v1379_v19, %v594_v28  ;;  %v1385_v34 = vpop.f32.mrb[4].mxu1 }
 0x1a3   : > { %v753_v35 = vpop.f32.mrb[5].mxu1 }
 0x1a4   : > { %v1274_v36 = vpop.f32.mrb[6].mxu0  ;;  %v599_v37 = vadd.f32 %v1273_v32, %v2246_v16  ;;  %v2256_v38 = vadd.f32 %v739_v33, %v2055_v1 }
 0x1a5   : > { %v1275_v39 = vpop.f32.mrb[7].mxu0 }
 0x1a6   : > { %v1276_v40 = vadd.f32 %v1275_v39, %v1274_v36  ;;  %v744_v41 = vadd.f32 %v743_v27, %v599_v37  ;;  %830 = vadd.xlane.f32.xlu0 %v2256_v38  ;;  %v1388_v0 = vpop.f32.mrb[6].mxu1 }
 0x1a7   : > { %v763_v42 = vpop.f32.mrb[7].mxu1 }
 0x1a8   : > { %v604_v44 = vadd.f32 %v1276_v40, %v2246_v16  ;;  %v2261_v45 = vadd.f32 %v744_v41, %v2058_v2  ;;  %v1277_v43 = vpop.f32.mrb[8].mxu0 }
 0x1a9   : > { %v1278_v46 = vpop.f32.mrb[9].mxu0 }
 0x1aa   : > { %v1279_v47 = vadd.f32 %v1278_v46, %v1277_v43  ;;  %832 = vadd.xlane.f32.xlu1 %v2261_v45  ;;  %v749_v48 = vadd.f32 %v1382_v26, %v604_v44  ;;  %v1391_v1 = vpop.f32.mrb[8].mxu1 }
 0x1ab   : > { %v773_v49 = vpop.f32.mrb[9].mxu1 }
 0x1ac   : > { %v1280_v50 = vpop.f32.mrb[10].mxu0  ;;  %v609_v51 = vadd.f32 %v1279_v47, %v2246_v16  ;;  %v2266_v52 = vadd.f32 %v749_v48, %v2061_v3 }
 0x1ad   : > { %v1281_v53 = vpop.f32.mrb[11].mxu0 }
 0x1ae   : > { %v1282_v54 = vadd.f32 %v1281_v53, %v1280_v50  ;;  %v754_v55 = vadd.f32 %v753_v35, %v609_v51  ;;  %834 = vadd.xlane.f32.xlu1 %v2266_v52  ;;  %v1394_v2 = vpop.f32.mrb[10].mxu1 }
 0x1af   : > { %v783_v56 = vpop.f32.mrb[11].mxu1 }
 0x1b0   : > { %v614_v57 = vadd.f32 %v1282_v54, %v2246_v16  ;;  %v2271_v58 = vadd.f32 %v754_v55, %v2064_v4  ;;  %v1283_v17 = vpop.f32.mrb[12].mxu0 }
 0x1b1   : > { %v1284_v59 = vpop.f32.mrb[13].mxu0 }
 0x1b2   : > { %v1285_v60 = vadd.f32 %v1284_v59, %v1283_v17  ;;  %836 = vadd.xlane.f32.xlu0 %v2271_v58  ;;  %v759_v61 = vadd.f32 %v1385_v34, %v614_v57  ;;  %v1397_v3 = vpop.f32.mrb[12].mxu1 }
 0x1b3   : > { %v793_v62 = vpop.f32.mrb[13].mxu1 }
 0x1b4   : > { %v1286_v63 = vpop.f32.mrb[14].mxu0  ;;  %v619_v18 = vadd.f32 %v1285_v60, %v2246_v16  ;;  %v2276_v19 = vadd.f32 %v759_v61, %v2067_v5 }
 0x1b5   : > { %v1287_v20 = vpop.f32.mrb[15].mxu0 }
 0x1b6   : > { %v1288_v21 = vadd.f32 %v1287_v20, %v1286_v63  ;;  %v764_v22 = vadd.f32 %v763_v42, %v619_v18  ;;  %838 = vadd.xlane.f32.xlu1 %v2276_v19  ;;  %v1400_v4 = vpop.f32.mrb[14].mxu1 }
 0x1b7   : > { %v803_v23 = vpop.f32.mrb[15].mxu1 }
 0x1b8   : > { %v624_v24 = vadd.f32 %v1288_v21, %v2246_v16  ;;  %v2281_v25 = vadd.f32 %v764_v22, %v2075_v6  ;;  %v1289_v26 = vpop.f32.mrb[16].mxu0 }
 0x1b9   : > { %v1290_v27 = vpop.f32.mrb[17].mxu0 }
 0x1ba   : > { %v1291_v28 = vadd.f32 %v1290_v27, %v1289_v26  ;;  %840 = vadd.xlane.f32.xlu0 %v2281_v25  ;;  %v769_v30 = vadd.f32 %v1388_v0, %v624_v24 }
 0x1bc   : > { %v1292_v5 = vpop.f32.mrb[18].mxu0  ;;  %v629_v31 = vadd.f32 %v1291_v28, %v2246_v16  ;;  %v2286_v32 = vadd.f32 %v769_v30, %v2078_v7 }
 0x1bd   : > { %v1293_v33 = vpop.f32.mrb[19].mxu0 }
 0x1be   : > { %v1294_v34 = vadd.f32 %v1293_v33, %v1292_v5  ;;  %v774_v35 = vadd.f32 %v773_v49, %v629_v31  ;;  %842 = vadd.xlane.f32.xlu1 %v2286_v32 }
 0x1c0   : > { %v634_v6 = vadd.f32 %v1294_v34, %v2246_v16  ;;  %v2291_v36 = vadd.f32 %v774_v35, %v2081_v8  ;;  %v1295_v37 = vpop.f32.mrb[20].mxu0 }
 0x1c1   : > { %v1296_v39 = vpop.f32.mrb[21].mxu0 }
 0x1c2   : > { %v1297_v40 = vadd.f32 %v1296_v39, %v1295_v37  ;;  %844 = vadd.xlane.f32.xlu0 %v2291_v36  ;;  %v779_v41 = vadd.f32 %v1391_v1, %v634_v6 }
 0x1c4   : > { %v1298_v0 = vpop.f32.mrb[22].mxu0  ;;  %v639_v7 = vadd.f32 %v1297_v40, %v2246_v16  ;;  %v2296_v42 = vadd.f32 %v779_v41, %v2102_v9 }
 0x1c5   : > { %v1299_v44 = vpop.f32.mrb[23].mxu0 }
 0x1c6   : > { %v1300_v43 = vadd.f32 %v1299_v44, %v1298_v0  ;;  %v784_v46 = vadd.f32 %v783_v56, %v639_v7  ;;  %846 = vadd.xlane.f32.xlu1 %v2296_v42 }
 0x1c8   : > { %v644_v8 = vadd.f32 %v1300_v43, %v2246_v16  ;;  %v2301_v47 = vadd.f32 %v784_v46, %v2105_v10  ;;  %v1301_v48 = vpop.f32.mrb[24].mxu0 }
 0x1c9   : > { %v1302_v49 = vpop.f32.mrb[25].mxu0 }
 0x1ca   : > { %v1303_v50 = vadd.f32 %v1302_v49, %v1301_v48  ;;  %848 = vadd.xlane.f32.xlu0 %v2301_v47  ;;  %v789_v1 = vadd.f32 %v1394_v2, %v644_v8 }
 0x1cc   : > { %v1304_v51 = vpop.f32.mrb[26].mxu0  ;;  %v649_v9 = vadd.f32 %v1303_v50, %v2246_v16  ;;  %v2306_v53 = vadd.f32 %v789_v1, %v2108_v11 }
 0x1cd   : > { %v1305_v54 = vpop.f32.mrb[27].mxu0 }
 0x1ce   : > { %v1306_v55 = vadd.f32 %v1305_v54, %v1304_v51  ;;  %v794_v56 = vadd.f32 %v793_v62, %v649_v9  ;;  %850 = vadd.xlane.f32.xlu1 %v2306_v53 }
 0x1d0   : > { %v654_v10 = vadd.f32 %v1306_v55, %v2246_v16  ;;  %v2311_v57 = vadd.f32 %v794_v56, %v2114_v12  ;;  %v1307_v17 = vpop.f32.mrb[28].mxu0 }
 0x1d1   : > { %v1308_v59 = vpop.f32.mrb[29].mxu0 }
 0x1d2   : > { %v1309_v60 = vadd.f32 %v1308_v59, %v1307_v17  ;;  %852 = vadd.xlane.f32.xlu0 %v2311_v57  ;;  %v799_v2 = vadd.f32 %v1397_v3, %v654_v10 }
 0x1d4   : > { %v1310_v61 = vpop.f32.mrb[30].mxu0  ;;  %v659_v11 = vadd.f32 %v1309_v60, %v2246_v16  ;;  %v2316_v63 = vadd.f32 %v799_v2, %v2117_v13 }
 0x1d5   : > { %v1311_v62 = vpop.f32.mrb[31].mxu0 }
 0x1d6   : > { %v1312_v18 = vadd.f32 %v1311_v62, %v1310_v61  ;;  %v804_v20 = vadd.f32 %v803_v23, %v659_v11  ;;  %854 = vadd.xlane.f32.xlu1 %v2316_v63 }
 0x1d8   : > { %v664_v12 = vadd.f32 %v1312_v18, %v2246_v16  ;;  %v2321_v21 = vadd.f32 %v804_v20, %v2120_v14 }
 0x1da   : > { %856 = vadd.xlane.f32.xlu0 %v2321_v21  ;;  %v809_v22 = vadd.f32 %v1400_v4, %v664_v12 }
 0x1dc   : > { %v2325_v3 = vadd.f32 %v809_v22, %v2123_v15 }
 0x1de   : > { %858 = vadd.xlane.f32.xlu1 %v2325_v3 }
 0x22f   : > { %v829_v13 = vpop.xlane.xlu0 %828 }
 0x230   : > { %v861_v24 = vmul.f32 0.0078125, %v829_v13 }
 0x232   : > { %v2329_v26 = vsub.f32 %v2251_v29, %v861_v24 }
 0x233   : > { %v831_v23 = vpop.xlane.xlu0 %830 }
 0x234   : > { %v862_v27 = vmul.f32 0.0078125, %v831_v23  ;;  %v893_v16 = vmul.f32 %v2329_v26, %v2329_v26 }
 0x236   : > { %v2334_v14 = vsub.f32 %v2256_v38, %v862_v27  ;;  %909 = vadd.xlane.f32.xlu0 %v893_v16 }
 0x237   : > { %v833_v4 = vpop.xlane.xlu1 %832 }
 0x238   : > { %v863_v28 = vmul.f32 0.0078125, %v833_v4  ;;  %v894_v15 = vmul.f32 %v2334_v14, %v2334_v14 }
 0x23a   : > { %v2339_v30 = vsub.f32 %v2261_v45, %v863_v28  ;;  %911 = vadd.xlane.f32.xlu1 %v894_v15 }
 0x23b   : > { %v835_v29 = vpop.xlane.xlu1 %834 }
 0x23c   : > { %v864_v5 = vmul.f32 0.0078125, %v835_v29  ;;  %v895_v31 = vmul.f32 %v2339_v30, %v2339_v30 }
 0x23e   : > { %v2344_v33 = vsub.f32 %v2266_v52, %v864_v5  ;;  %913 = vadd.xlane.f32.xlu0 %v895_v31 }
 0x23f   : > { %v837_v38 = vpop.xlane.xlu0 %836 }
 0x240   : > { %v865_v34 = vmul.f32 0.0078125, %v837_v38  ;;  %v896_v35 = vmul.f32 %v2344_v33, %v2344_v33 }
 0x242   : > { %v2349_v6 = vsub.f32 %v2271_v58, %v865_v34  ;;  %915 = vadd.xlane.f32.xlu1 %v896_v35  ;;  %v2411_v34 = vld [vmem:[%s2548_s4] ss:$0 sm:$0xff] }
 0x243   : > { %v839_v45 = vpop.xlane.xlu1 %838 }
 0x244   : > { %v866_v37 = vmul.f32 0.0078125, %v839_v45  ;;  %v897_v39 = vmul.f32 %v2349_v6, %v2349_v6 }
 0x246   : > { %v2354_v40 = vsub.f32 %v2276_v19, %v866_v37  ;;  %917 = vadd.xlane.f32.xlu0 %v897_v39  ;;  %v2417_v39 = vld [vmem:[%s2549_s5] ss:$0 sm:$0xff] }
 0x247   : > { %v841_v52 = vpop.xlane.xlu0 %840 }
 0x248   : > { %v867_v41 = vmul.f32 0.0078125, %v841_v52  ;;  %v898_v0 = vmul.f32 %v2354_v40, %v2354_v40 }
 0x24a   : > { %v2359_v7 = vsub.f32 %v2281_v25, %v867_v41  ;;  %919 = vadd.xlane.f32.xlu1 %v898_v0 }
 0x24b   : > { %v843_v58 = vpop.xlane.xlu1 %842 }
 0x24c   : > { %v868_v44 = vmul.f32 0.0078125, %v843_v58  ;;  %v899_v43 = vmul.f32 %v2359_v7, %v2359_v7 }
 0x24e   : > { %v2364_v46 = vsub.f32 %v2286_v32, %v868_v44  ;;  %921 = vadd.xlane.f32.xlu0 %v899_v43 }
 0x24f   : > { %v845_v19 = vpop.xlane.xlu0 %844 }
 0x250   : > { %v869_v8 = vmul.f32 0.0078125, %v845_v19  ;;  %v900_v48 = vmul.f32 %v2364_v46, %v2364_v46 }
 0x252   : > { %v2369_v49 = vsub.f32 %v2291_v36, %v869_v8  ;;  %923 = vadd.xlane.f32.xlu1 %v900_v48 }
 0x253   : > { %v847_v25 = vpop.xlane.xlu1 %846 }
 0x254   : > { %v870_v50 = vmul.f32 0.0078125, %v847_v25  ;;  %v901_v1 = vmul.f32 %v2369_v49, %v2369_v49 }
 0x256   : > { %v2374_v51 = vsub.f32 %v2296_v42, %v870_v50  ;;  %925 = vadd.xlane.f32.xlu0 %v901_v1 }
 0x257   : > { %v849_v32 = vpop.xlane.xlu0 %848 }
 0x258   : > { %v871_v9 = vmul.f32 0.0078125, %v849_v32  ;;  %v902_v54 = vmul.f32 %v2374_v51, %v2374_v51 }
 0x25a   : > { %v2379_v55 = vsub.f32 %v2301_v47, %v871_v9  ;;  %927 = vadd.xlane.f32.xlu1 %v902_v54 }
 0x25b   : > { %v851_v36 = vpop.xlane.xlu1 %850 }
 0x25c   : > { %v872_v56 = vmul.f32 0.0078125, %v851_v36  ;;  %v903_v10 = vmul.f32 %v2379_v55, %v2379_v55 }
 0x25e   : > { %v2384_v17 = vsub.f32 %v2306_v53, %v872_v56  ;;  %929 = vadd.xlane.f32.xlu0 %v903_v10 }
 0x25f   : > { %v853_v42 = vpop.xlane.xlu0 %852 }
 0x260   : > { %v873_v59 = vmul.f32 0.0078125, %v853_v42  ;;  %v904_v60 = vmul.f32 %v2384_v17, %v2384_v17 }
 0x262   : > { %v2389_v2 = vsub.f32 %v2311_v57, %v873_v59  ;;  %931 = vadd.xlane.f32.xlu1 %v904_v60 }
 0x263   : > { %v855_v47 = vpop.xlane.xlu1 %854 }
 0x264   : > { %v874_v61 = vmul.f32 0.0078125, %v855_v47  ;;  %v905_v11 = vmul.f32 %v2389_v2, %v2389_v2 }
 0x266   : > { %v2394_v62 = vsub.f32 %v2316_v63, %v874_v61  ;;  %933 = vadd.xlane.f32.xlu0 %v905_v11 }
 0x267   : > { %v857_v53 = vpop.xlane.xlu0 %856 }
 0x268   : > { %v875_v18 = vmul.f32 0.0078125, %v857_v53  ;;  %v906_v20 = vmul.f32 %v2394_v62, %v2394_v62 }
 0x26a   : > { %v2399_v12 = vsub.f32 %v2321_v21, %v875_v18  ;;  %935 = vadd.xlane.f32.xlu1 %v906_v20 }
 0x26b   : > { %v859_v57 = vpop.xlane.xlu1 %858 }
 0x26c   : > { %v876_v22 = vmul.f32 0.0078125, %v859_v57  ;;  %v907_v13 = vmul.f32 %v2399_v12, %v2399_v12 }
 0x26e   : > { %v2404_v24 = vsub.f32 %v2325_v3, %v876_v22  ;;  %937 = vadd.xlane.f32.xlu0 %v907_v13 }
 0x270   : > { %v908_v63 = vmul.f32 %v2404_v24, %v2404_v24 }
 0x272   : > { %939 = vadd.xlane.f32.xlu1 %v908_v63 }
 0x2c3   : > { %v910_v23 = vpop.xlane.xlu0 %909 }
 0x2c4   : > { %v941_v27 = vmul.f32 0.0078125, %v910_v23 }
 0x2c6   : > { %v957_v16 = vadd.f32 1e-05, %v941_v27 }
 0x2c7   : > { %v912_v4 = vpop.xlane.xlu1 %911 }
 0x2c8   : > { %1560 = vrsqrt.f32 %v957_v16  ;;  %v942_v21 = vmul.f32 0.0078125, %v912_v4 }
 0x2ca   : > { %v958_v28 = vadd.f32 1e-05, %v942_v21 }
 0x2cb   : > { %v914_v15 = vpop.xlane.xlu0 %913 }
 0x2cc   : > { %1562 = vrsqrt.f32 %v958_v28  ;;  %v943_v29 = vmul.f32 0.0078125, %v914_v15 }
 0x2ce   : > { %v959_v5 = vadd.f32 1e-05, %v943_v29 }
 0x2cf   : > { %v916_v31 = vpop.xlane.xlu1 %915 }
 0x2d0   : > { %1564 = vrsqrt.f32 %v959_v5  ;;  %v944_v3 = vmul.f32 0.0078125, %v916_v31 }
 0x2d2   : > { %v1561_v38 = vpop.eup %1560  ;;  %v960_v35 = vadd.f32 1e-05, %v944_v3 }
 0x2d3   : > { %v989_v45 = vmul.f32 %v1561_v38, %v2329_v26  ;;  %v918_v37 = vpop.xlane.xlu0 %917 }
 0x2d4   : > { %1566 = vrsqrt.f32 %v960_v35  ;;  %v945_v52 = vmul.f32 0.0078125, %v918_v37 }
 0x2d5   : > { %v1012_v41 = vmul.f32 %v2411_v34, %v989_v45 }
 0x2d6   : > { %v1563_v0 = vpop.eup %1562  ;;  %v961_v58 = vadd.f32 1e-05, %v945_v52 }
 0x2d7   : > { %v1035_v44 = vadd.f32 %v2417_v39, %v1012_v41  ;;  %v990_v43 = vmul.f32 %v1563_v0, %v2334_v14  ;;  %v920_v19 = vpop.xlane.xlu1 %919 }
 0x2d8   : > { %1568 = vrsqrt.f32 %v961_v58  ;;  %v946_v26 = vmul.f32 0.0078125, %v920_v19 }
 0x2d9   : > { %1051 = vst [vmem:[%s2143_s12] sm:$0xff] %v1035_v44  ;;  %v1013_v8 = vmul.f32 %v2411_v34, %v990_v43 }
 0x2da   : > { %v1565_v48 = vpop.eup %1564  ;;  %v962_v25 = vadd.f32 1e-05, %v946_v26 }
 0x2db   : > { %v1036_v50 = vadd.f32 %v2417_v39, %v1013_v8  ;;  %v991_v1 = vmul.f32 %v1565_v48, %v2339_v30  ;;  %v922_v32 = vpop.xlane.xlu0 %921 }
 0x2dc   : > { %1570 = vrsqrt.f32 %v962_v25  ;;  %v947_v9 = vmul.f32 0.0078125, %v922_v32 }
 0x2dd   : > { %1052 = vst [vmem:[%s2143_s12 + $0x8] sm:$0xff] %v1036_v50  ;;  %v1014_v54 = vmul.f32 %v2411_v34, %v991_v1 }
 0x2de   : > { %v1567_v14 = vpop.eup %1566  ;;  %v963_v36 = vadd.f32 1e-05, %v947_v9 }
 0x2df   : > { %v1037_v56 = vadd.f32 %v2417_v39, %v1014_v54  ;;  %v992_v10 = vmul.f32 %v1567_v14, %v2344_v33  ;;  %v924_v42 = vpop.xlane.xlu1 %923 }
 0x2e0   : > { %1572 = vrsqrt.f32 %v963_v36  ;;  %v948_v59 = vmul.f32 0.0078125, %v924_v42 }
 0x2e1   : > { %1053 = vst [vmem:[%s2143_s12 + $0x10] sm:$0xff] %v1037_v56  ;;  %v1015_v60 = vmul.f32 %v2411_v34, %v992_v10 }
 0x2e2   : > { %v1569_v30 = vpop.eup %1568  ;;  %v964_v47 = vadd.f32 1e-05, %v948_v59 }
 0x2e3   : > { %v1038_v61 = vadd.f32 %v2417_v39, %v1015_v60  ;;  %v993_v11 = vmul.f32 %v1569_v30, %v2349_v6  ;;  %v926_v53 = vpop.xlane.xlu0 %925 }
 0x2e4   : > { %1574 = vrsqrt.f32 %v964_v47  ;;  %v949_v18 = vmul.f32 0.0078125, %v926_v53 }
 0x2e5   : > { %1054 = vst [vmem:[%s2143_s12 + $0x18] sm:$0xff] %v1038_v61  ;;  %v1016_v20 = vmul.f32 %v2411_v34, %v993_v11 }
 0x2e6   : > { %v1571_v33 = vpop.eup %1570  ;;  %v965_v57 = vadd.f32 1e-05, %v949_v18 }
 0x2e7   : > { %v1039_v22 = vadd.f32 %v2417_v39, %v1016_v20  ;;  %v994_v13 = vmul.f32 %v1571_v33, %v2354_v40  ;;  %v928_v63 = vpop.xlane.xlu1 %927 }
 0x2e8   : > { %1576 = vrsqrt.f32 %v965_v57  ;;  %v950_v23 = vmul.f32 0.0078125, %v928_v63 }
 0x2e9   : > { %1055 = vst [vmem:[%s2143_s12 + $0x20] sm:$0xff] %v1039_v22  ;;  %v1017_v27 = vmul.f32 %v2411_v34, %v994_v13 }
 0x2ea   : > { %v1573_v6 = vpop.eup %1572  ;;  %v966_v16 = vadd.f32 1e-05, %v950_v23 }
 0x2eb   : > { %v1040_v4 = vadd.f32 %v2417_v39, %v1017_v27  ;;  %v995_v21 = vmul.f32 %v1573_v6, %v2359_v7  ;;  %v930_v28 = vpop.xlane.xlu0 %929 }
 0x2ec   : > { %1578 = vrsqrt.f32 %v966_v16  ;;  %v951_v15 = vmul.f32 0.0078125, %v930_v28 }
 0x2ed   : > { %1056 = vst [vmem:[%s2143_s12 + $0x28] sm:$0xff] %v1040_v4  ;;  %v1018_v29 = vmul.f32 %v2411_v34, %v995_v21 }
 0x2ee   : > { %v1575_v40 = vpop.eup %1574  ;;  %v967_v5 = vadd.f32 1e-05, %v951_v15 }
 0x2ef   : > { %v1041_v31 = vadd.f32 %v2417_v39, %v1018_v29  ;;  %v996_v3 = vmul.f32 %v1575_v40, %v2364_v46  ;;  %v932_v38 = vpop.xlane.xlu1 %931 }
 0x2f0   : > { %1580 = vrsqrt.f32 %v967_v5  ;;  %v952_v35 = vmul.f32 0.0078125, %v932_v38 }
 0x2f1   : > { %1057 = vst [vmem:[%s2143_s12 + $0x30] sm:$0xff] %v1041_v31  ;;  %v1019_v45 = vmul.f32 %v2411_v34, %v996_v3 }
 0x2f2   : > { %v1577_v7 = vpop.eup %1576  ;;  %v968_v37 = vadd.f32 1e-05, %v952_v35 }
 0x2f3   : > { %v1042_v52 = vadd.f32 %v2417_v39, %v1019_v45  ;;  %v997_v41 = vmul.f32 %v1577_v7, %v2369_v49  ;;  %v934_v0 = vpop.xlane.xlu0 %933 }
 0x2f4   : > { %1582 = vrsqrt.f32 %v968_v37  ;;  %v953_v58 = vmul.f32 0.0078125, %v934_v0 }
 0x2f5   : > { %1058 = vst [vmem:[%s2143_s12 + $0x38] sm:$0xff] %v1042_v52  ;;  %v1020_v44 = vmul.f32 %v2411_v34, %v997_v41 }
 0x2f6   : > { %v1579_v46 = vpop.eup %1578  ;;  %v969_v43 = vadd.f32 1e-05, %v953_v58 }
 0x2f7   : > { %v1043_v19 = vadd.f32 %v2417_v39, %v1020_v44  ;;  %v998_v26 = vmul.f32 %v1579_v46, %v2374_v51  ;;  %v936_v8 = vpop.xlane.xlu1 %935 }
 0x2f8   : > { %1584 = vrsqrt.f32 %v969_v43  ;;  %v954_v48 = vmul.f32 0.0078125, %v936_v8 }
 0x2f9   : > { %1059 = vst [vmem:[%s2143_s12 + $0x40] sm:$0xff] %v1043_v19  ;;  %v1021_v25 = vmul.f32 %v2411_v34, %v998_v26 }
 0x2fa   : > { %v1581_v49 = vpop.eup %1580  ;;  %v970_v50 = vadd.f32 1e-05, %v954_v48 }
 0x2fb   : > { %v1044_v1 = vadd.f32 %v2417_v39, %v1021_v25  ;;  %v999_v32 = vmul.f32 %v1581_v49, %v2379_v55  ;;  %v938_v9 = vpop.xlane.xlu0 %937 }
 0x2fc   : > { %1586 = vrsqrt.f32 %v970_v50  ;;  %v955_v54 = vmul.f32 0.0078125, %v938_v9 }
 0x2fd   : > { %1060 = vst [vmem:[%s2143_s12 + $0x48] sm:$0xff] %v1044_v1  ;;  %v1022_v51 = vmul.f32 %v2411_v34, %v999_v32 }
 0x2fe   : > { %v1583_v14 = vpop.eup %1582  ;;  %v971_v36 = vadd.f32 1e-05, %v955_v54 }
 0x2ff   : > { %v1045_v56 = vadd.f32 %v2417_v39, %v1022_v51  ;;  %v1000_v10 = vmul.f32 %v1583_v14, %v2384_v17  ;;  %v940_v42 = vpop.xlane.xlu1 %939 }
 0x300   : > { %1588 = vrsqrt.f32 %v971_v36  ;;  %v956_v59 = vmul.f32 0.0078125, %v940_v42 }
 0x301   : > { %1061 = vst [vmem:[%s2143_s12 + $0x50] sm:$0xff] %v1045_v56  ;;  %v1023_v55 = vmul.f32 %v2411_v34, %v1000_v10 }
 0x302   : > { %v1585_v60 = vpop.eup %1584  ;;  %v972_v30 = vadd.f32 1e-05, %v956_v59 }
 0x303   : > { %v1046_v47 = vadd.f32 %v2417_v39, %v1023_v55  ;;  %v1001_v61 = vmul.f32 %v1585_v60, %v2389_v2 }
 0x304   : > { %1590 = vrsqrt.f32 %v972_v30 }
 0x305   : > { %1062 = vst [vmem:[%s2143_s12 + $0x58] sm:$0xff] %v1046_v47  ;;  %v1024_v17 = vmul.f32 %v2411_v34, %v1001_v61 }
 0x306   : > { %v1587_v11 = vpop.eup %1586 }
 0x307   : > { %v1047_v53 = vadd.f32 %v2417_v39, %v1024_v17  ;;  %v1002_v18 = vmul.f32 %v1587_v11, %v2394_v62 }
 0x309   : > { %1063 = vst [vmem:[%s2143_s12 + $0x60] sm:$0xff] %v1047_v53  ;;  %v1025_v20 = vmul.f32 %v2411_v34, %v1002_v18 }
 0x30a   : > { %v1589_v33 = vpop.eup %1588 }
 0x30b   : > { %v1048_v2 = vadd.f32 %v2417_v39, %v1025_v20  ;;  %v1003_v57 = vmul.f32 %v1589_v33, %v2399_v12 }
 0x30d   : > { %1064 = vst [vmem:[%s2143_s12 + $0x68] sm:$0xff] %v1048_v2  ;;  %v1026_v22 = vmul.f32 %v2411_v34, %v1003_v57 }
 0x30e   : > { %v1591_v13 = vpop.eup %1590 }
 0x30f   : > { %v1049_v62 = vadd.f32 %v2417_v39, %v1026_v22  ;;  %v1004_v63 = vmul.f32 %v1591_v13, %v2404_v24 }
 0x311   : > { %1065 = vst [vmem:[%s2143_s12 + $0x70] sm:$0xff] %v1049_v62  ;;  %v1027_v23 = vmul.f32 %v2411_v34, %v1004_v63 }
 0x313   : > { %v1050_v12 = vadd.f32 %v2417_v39, %v1027_v23 }
 0x315   : > { %1066 = vst [vmem:[%s2143_s12 + $0x78] sm:$0xff] %v1050_v12 }
 0x316   : > { %1711 = shalt.err (!%p1708_p2)
}
 0x317   : > { %s1712_s12 = scalar_lea.hbm %s2486_s15, 2048  ;;  %s1716_s17 = scalar_lea.hbm %s2591_s29, 8192 }
 0x318   : > { %p1713_p4 = scmp.ne.s32.totalorder %s2486_s15, %s1712_s12  ;;  %p1717_p0 = scmp.lt.u32.totalorder %s2486_s15, %s2591_s29 }
 0x319   : > { %p1718_p6 = scmp.lt.u32.totalorder %s1716_s17, %s1712_s12  ;;  %p1720_p8 = scmp.lt.u32.totalorder %s1712_s12, %s2486_s15 }
 0x31a   : > { %p1714_p5 = pnand %p1713_p4, %p1958_p11 }
 0x31b   : > { %p1719_p10 = por %p1718_p6, %p1717_p0 }
 0x31c   : > { %p1715_p9 = pneg %p1714_p5 }
 0x31d   : > { %p1721_p12 = por %p1720_p8, %p1719_p10 }
 0x31f   : > { %p1722_p13 = pnand %p1721_p12, %p1715_p9 }
 0x321   : > { %1725 = shalt.err (!%p1722_p13)
}
 0x322   : > { %s1813_s18 = smov 128   ;;  %s1814_s9 = smov 8  }
 0x323   : > { %1471 = dma.vmem_to_hbm [thread:$0]  (%p1958_p11), %s2488_s24, 2048, %s2486_s15, %s1068_s2, %s1813_s18, %s1813_s18, %s1814_s9  }
 0x324 PF: > { %s2592_s6 = sld [smem:[#allocation21_spill]]  ;;  %s2593_s25 = sld [smem:[#allocation23_spill]] }
 0x325   : > { %p1488_p3 = scmp.ge.s32.totalorder %s1804_s28, 2 }
 0x32a   : > { %s1098_s20 = sand.u32 1, %s2592_s6   ;;  %p2594_p7 = scmp.ne.s32.totalorder %s2593_s25, 0 }
 0x32b   : > { %s1099_s19 = scalar_lea.sflag [#allocation6], %s1098_s20 }
 0x32c   : > { %p1482_p1 = pnand %p1488_p3, %p2594_p7 }
 0x32e   : > { %1771 = dma.done.wait (!%p1482_p1), %s1099_s19, 2048  }
 0x32f   : > { %1773 = vsyncadd (!%p1482_p1), %s1099_s19, 4294965248  ;;  %s23_s28 = sadd.s32 1, %s1804_s28   ;;  %s2595_s24 = sld [smem:[#allocation22_spill]] }
 0x330   : > { %p20_p2 = scmp.ge.s32.totalorder %s23_s28, 6   ;;  %s2596_s26 = sld [smem:[#allocation24_spill]] }
 0x331   : > { %s2597_s7 = sld [smem:[#allocation26_spill]]  ;;  %s2598_s21 = smov %s1780_s22 }
 0x332   : > { %s2599_s22 = smov %s1784_s23  ;;  %s2600_s23 = smov %s1975_s10 }
 0x333   : > { %s2601_s25 = smov %s1800_s27  ;;  %22 = sbr.rel (!%p20_p2) target bundleno = 11 (0xb), region = 102 }
 0x337   : > { %s2602_s27 = smov %s2597_s7 }
 0x33a   :  { %1104 = vsyncpa [#allocation5], 1 }
 0x33b   :  { %1106 = vsyncpa [#allocation5 + $0x1], 1 }
 0x33c   :  { %1107 = vsyncpa [#allocation8], 1 }
 0x33d   :  { %1108 = vsyncpa [#allocation6], 1 }
 0x33e   :  { %1110 = vsyncpa [#allocation6 + $0x1], 1 }
 0x33f   :  { %1111 = vsyncmov [#allocation3] }
 0x342   :  { %s1112_s15 = vpop.sfrf %1111 }
 0x343   :  { %p1231_p11 = scmp.ne.s32.totalorder %s1112_s15, 0 }
 0x345   :  { %1116 = shalt.err (%p1231_p11)  }
 0x346   :  { %1118 = vsyncmov [#allocation3 + $0x1] }
 0x349   :  { %s1119_s10 = vpop.sfrf %1118 }
 0x34a   :  { %p1232_p4 = scmp.ne.s32.totalorder %s1119_s10, 0 }
 0x34c   :  { %1123 = shalt.err (%p1232_p4)  }

// kernel: tpu_custom_call.1
= control target key start
LH: loop header
LB: loop body
LE: loop exit
PB: predicated region body
PF: predicated region fallthrough
CT: control target
= control target key end

     0   :  { %s2544_s0 = inlined_call_operand.hbm [shape: f32[2,256,128], index: 0, kind: input, shape index: {}]   ;;  %s2545_s1 = inlined_call_operand.hbm [shape: f32[2,256,128], index: 1, kind: input, shape index: {}]   ;;  %s2546_s2 = inlined_call_operand.hbm [shape: f32[384,128], index: 2, kind: input, shape index: {}]   ;;  %s2547_s3 = inlined_call_operand.vmem [shape: f32[1,128], index: 3, kind: input, shape index: {}]   ;;  %s2548_s4 = inlined_call_operand.vmem [shape: f32[1,128], index: 4, kind: input, shape index: {}]   ;;  %s2549_s5 = inlined_call_operand.vmem [shape: f32[1,128], index: 5, kind: input, shape index: {}]   ;;  %s2550_s6 = inlined_call_operand.hbm [shape: f32[2,256,128], index: 6, kind: output, shape index: {}]  }
   0x1   :  { %2565 = sst [smem:[#allocation27_spill]] %s2546_s2 }
   0x2   :  { %2566 = sst [smem:[#allocation28_spill]] %s2550_s6 }
   0x3   :  { %11 = vsyncpa [#allocation5], 0 }
   0x4   :  { %13 = vsyncpa [#allocation5 + $0x1], 0 }
   0x5   :  { %14 = vsyncpa [#allocation8], 0 }
   0x6   :  { %15 = vsyncpa [#allocation6], 0 }
   0x7   :  { %17 = vsyncpa [#allocation6 + $0x1], 0  ;;  %s1850_s21 = smov 0   ;;  %s1852_s22 = smov 0  }
   0x8   :  { %s1854_s23 = smov 0   ;;  %s1856_s24 = smov 0  }
   0x9   :  { %s1858_s25 = smov 0   ;;  %s1860_s26 = smov 0  }
   0xa   :  { %s1862_s27 = smov 0   ;;  %s1864_s28 = smov 0  }
   0xb LB: > { %2567 = sst [smem:[#allocation21_spill]] %s1776_s21  ;;  %s1204_s29 = sadd.s32 4294967295, %s1804_s28   ;;  %s1804_s28 = sphi %s1864_s28, %s23_s28   ;;  %s1800_s27 = sphi %s1862_s27, %s2602_s27   ;;  %s1796_s26 = sphi %s1860_s26, %s2596_s26   ;;  %s1792_s25 = sphi %s1858_s25, %s2601_s25   ;;  %s1788_s24 = sphi %s1856_s24, %s2595_s24   ;;  %s1784_s23 = sphi %s1854_s23, %s2600_s23   ;;  %s1780_s22 = sphi %s1852_s22, %s2599_s22   ;;  %s1776_s21 = sphi %s1850_s21, %s2598_s21  }
   0xc   : > { %2568 = sst [smem:[#allocation22_spill]] %s1796_s26  ;;  %s1205_s30 = sadd.s32 4294967294, %s1804_s28  }
   0xd   : > { %p57_p0 = scmp.ne.s32.totalorder %s1780_s22, %s1776_s21  ;;  %p1894_p1 = scmp.eq.s32.totalorder %s1204_s29, 0 }
   0xe   : > { %p1898_p2 = scmp.eq.s32.totalorder %s1204_s29, 3  ;;  %p173_p3 = scmp.eq.s32.totalorder %s1205_s30, 3 }
   0xf   : > { %s2569_s7 = scalar_select %p1894_p1, 1, 0 }
  0x10   : > { %s2570_s8 = scalar_select %p1898_p2, 1, 0 }
  0x11   : > { %p1904_p4 = por %p1894_p1, %p57_p0  ;;  %p1206_p5 = scmp.ge.s32.totalorder %s1804_s28, 1 }
  0x12   : > { %p1909_p6 = por %p173_p3, %p57_p0  ;;  %p180_p7 = scmp.lt.s32.totalorder %s1804_s28, 5 }
  0x13   : > { %s2571_s9 = scalar_select %p1904_p4, 1, 0 }
  0x14   : > { %s2572_s10 = scalar_select %p1909_p6, 1, 0 }
  0x15   : > { %p1914_p8 = pnand %p1206_p5, %p180_p7  ;;  %s1806_s12 = smov [#allocation7]  }
  0x16   : > { %2573 = sst [smem:[#allocation23_spill]] %s2572_s10  ;;  %s192_s13 = sshll.u32 %s1806_s12, 4  ;;  %s193_s13 = int_to_ptr.vmem [resolvable:$true] %s192_s13 }
  0x17   : > { %s2574_s11 = scalar_select %p1914_p8, 1, 0 }
  0x18   : > { %p1473_p9 = pneg %p1914_p8  ;;  %s2576_s2 = sld [smem:[#allocation27_spill]] }
  0x1a   : > { %p1922_p10 = pnand %p1473_p9, %p1894_p1 }
  0x1c   : > { %p1594_p12 = pneg %p1922_p10 }
  0x1e   : > { %s1592_s17 = scalar_lea.hbm %s2576_s2, 6144 }
  0x1f   : > { %p1593_p11 = scmp.ne.s32.totalorder %s2576_s2, %s1592_s17  ;;  %p1599_p3 = scmp.lt.u32.totalorder %s1592_s17, %s2576_s2 }
  0x21   : > { %p1595_p13 = pnand %p1594_p12, %p1593_p11 }
  0x23   : > { %p1596_p0 = pneg %p1595_p13 }
  0x25   : > { %p1601_p5 = pnand %p1599_p3, %p1596_p0 }
  0x27   : > { %1604 = shalt.err (!%p1601_p5)
}
  0x28   : > { %s1605_s30 = scalar_lea.vmem %s193_s13, 6144  ;;  %p1613_p1 = scmp.lt.s32.totalorder %s193_s13, %s193_s13 }
  0x29   : > { %p1606_p7 = scmp.ne.s32.totalorder %s193_s13, %s1605_s30  ;;  %p1614_p4 = scmp.lt.s32.totalorder %s1605_s30, %s1605_s30 }
  0x2b   : > { %p1608_p9 = pnand %p1606_p7, %p1594_p12  ;;  %p1615_p8 = por %p1614_p4, %p1613_p1 }
  0x2d   : > { %p1609_p6 = pneg %p1608_p9 }
  0x2f   : > { %p1616_p2 = pnand %p1615_p8, %p1609_p6 }
  0x31   : > { %1619 = shalt.err (!%p1616_p2)
}
  0x32   : > { %s2555_s12 = smov 128   ;;  %s2556_s15 = smov 8  }
  0x33   : > { %1476 = dma.hbm_to_vmem [thread:$0]  (!%p1922_p10), %s2576_s2, 6144, %s193_s13, [#allocation8], %s2555_s12, %s2555_s12, %s2556_s15  }
  0x34   : > { %s32_s18 = sadd.s32 1, %s1796_s26  ;;  %s35_s19 = sadd.s32 1, %s1800_s27 }
  0x35   : > { %p33_p1 = scmp.ge.s32.totalorder %s32_s18, 2  ;;  %s44_s20 = sadd.s32 1, %s1784_s23 }
  0x36   : > { %p51_p2 = scmp.ne.s32.totalorder %s1784_s23, %s1780_s22  ;;  %p52_p4 = scmp.eq.s32.totalorder %s1804_s28, 0 }
  0x37   : > { %s2604_s18 = smov (%p33_p1, %s32_s18), 0  ;;  %s2606_s19 = smov (!%p33_p1, %s35_s19), %s1800_s27 }
  0x38   : > { %2577 = sst [smem:[#allocation24_spill]] %s2604_s18  ;;  %s40_s14 = ssub.s32 %s1796_s26, %s2604_s18 }
  0x39   : > { %p37_p6 = scmp.ge.s32.totalorder %s2606_s19, 2  ;;  %p2578_p8 = scmp.ne.s32.totalorder %s2570_s8, 0 }
  0x3a   : > { %p1962_p10 = por %p52_p4, %p51_p2  ;;  %p1486_p12 = scmp.lt.s32.totalorder %s1804_s28, 4 }
  0x3b   : > { %p1958_p11 = por %p2578_p8, %p51_p2  ;;  %s2608_s19 = smov (%p37_p6, %s2606_s19), 0 }
  0x3c   : > { %2582 = sst [smem:[#allocation26_spill]] %s2608_s19  ;;  %s215_s30 = sand.u32 1, %s1784_s23  }
  0x3d   : > { %s2579_s29 = scalar_select %p1958_p11, 1, 0 }
  0x3e   : > { %s1210_s16 = sshll.u32 %s1796_s26, 4  ;;  %s39_s17 = ssub.s32 %s1800_s27, %s2608_s19 }
  0x3f   : > { %2580 = sst [smem:[#allocation25_spill]] %s2579_s29  ;;  %s41_s12 = sor.u32 %s40_s14, %s39_s17 }
  0x40   : > { %s1209_s15 = sshll.u32 %s215_s30, 7  ;;  %p42_p13 = scmp.eq.s32.totalorder %s41_s12, 0 }
  0x41   : > { %s1211_s8 = sshll.u32 %s1800_s27, 5  ;;  %s219_s2 = scalar_lea.vmem [#allocation4], %s1209_s15 }
  0x42   : > { %s228_s18 = sshll.u32 %s219_s2, 4  ;;  %s225_s21 = sadd.s32 %s1211_s8, %s1210_s16  ;;  %s1977_s18 = int_to_ptr.vmem [resolvable:$true] %s228_s18 }
  0x43   : > { %s1975_s10 = scalar_select %p42_p13, %s1784_s23, %s44_s20  }
  0x44   : > { %s1212_s6 = sshll.u32 %s225_s21, 7  ;;  %p1983_p0 = pnand %p1486_p12, %p1962_p10 }
  0x45   : > { %s1990_s12 = scalar_lea.hbm %s2544_s0, %s1212_s6  ;;  %s1992_s2 = scalar_lea.sflag [#allocation5], %s215_s30 }
  0x46   : > { %s1620_s21 = scalar_lea.hbm %s1990_s12, 2048  ;;  %p1622_p5 = pneg %p1983_p0 }
  0x47   : > { %p1621_p3 = scmp.ne.s32.totalorder %s1990_s12, %s1620_s21  ;;  %s1625_s19 = scalar_lea.hbm %s2544_s0, 8192 }
  0x48   : > { %p1626_p1 = scmp.lt.u32.totalorder %s1990_s12, %s2544_s0  ;;  %p1627_p2 = scmp.lt.u32.totalorder %s1625_s19, %s1620_s21 }
  0x49   : > { %p1623_p7 = pnand %p1622_p5, %p1621_p3  ;;  %p1629_p6 = scmp.lt.u32.totalorder %s1620_s21, %s1990_s12 }
  0x4a   : > { %p1628_p4 = por %p1627_p2, %p1626_p1 }
  0x4b   : > { %p1624_p9 = pneg %p1623_p7 }
  0x4c   : > { %p1630_p8 = por %p1629_p6, %p1628_p4 }
  0x4e   : > { %p1631_p10 = pnand %p1630_p8, %p1624_p9 }
  0x50   : > { %1634 = shalt.err (!%p1631_p10)
}
  0x51   : > { %s1635_s14 = scalar_lea.vmem %s1977_s18, 2048  ;;  %s1809_s13 = smov [#allocation4]  }
  0x52   : > { %p1636_p12 = scmp.ne.s32.totalorder %s1977_s18, %s1635_s14  ;;  %s1640_s30 = sshll.u32 %s1809_s13, 4  ;;  %s1641_s30 = int_to_ptr.vmem [resolvable:$false] %s1640_s30 }
  0x53   : > { %s1642_s16 = scalar_lea.vmem %s1641_s30, 4096  ;;  %p1643_p7 = scmp.lt.s32.totalorder %s1977_s18, %s1641_s30 }
  0x54   : > { %p1638_p13 = pnand %p1636_p12, %p1622_p5  ;;  %p1644_p1 = scmp.lt.s32.totalorder %s1642_s16, %s1635_s14 }
  0x56   : > { %p1639_p3 = pneg %p1638_p13  ;;  %p1645_p2 = por %p1644_p1, %p1643_p7 }
  0x58   : > { %p1646_p4 = pnand %p1645_p2, %p1639_p3 }
  0x5a   : > { %1649 = shalt.err (!%p1646_p4)
}
  0x5b   : > { %s2584_s17 = smov 8   ;;  %s2585_s8 = smov 128  }
  0x5c   : > { %1480 = dma.hbm_to_vmem [thread:$0]  (!%p1983_p0), %s1990_s12, 2048, %s1977_s18, %s1992_s2, %s2585_s8, %s2585_s8, %s2584_s17  }
  0x5d   : > { %p2586_p5 = scmp.ne.s32.totalorder %s2574_s11, 0 }
  0x5e   : > { %s2026_s21 = sand.u32 (!%p2586_p5), 1, %s1780_s22   ;;  %p2587_p9 = scmp.ne.s32.totalorder (!%p2586_p5), %s2571_s9, 0 }
  0x5f   : > { %240 = sbr.rel (%p2586_p5) target bundleno = 804 (0x324), region = 40  ;;  %s1214_s15 = sshll.u32 (!%p2586_p5), %s2026_s21, 7 }
  0x60   : > { %s243_s26 = scalar_lea.sflag (!%p2586_p5), [#allocation5], %s2026_s21  ;;  %s2032_s29 = scalar_lea.vmem (!%p2586_p5), [#allocation4], %s1214_s15 }
  0x66   : > { %1759 = dma.done.wait (%p2587_p9), %s243_s26, 2048  }
  0x67   : > { %1761 = vsyncadd (%p2587_p9), %s243_s26, 4294965248  ;;  %p2588_p0 = scmp.ne.s32.totalorder %s2569_s7, 0 }
  0x69   : > { %1763 = dma.done.wait (%p2588_p0), [#allocation8], 6144  }
  0x6a   : > { %1765 = vsyncadd (%p2588_p0), [#allocation8], 4294961152  ;;  %s1217_s11 = sshll.u32 %s1788_s24, 7  ;;  %s1219_s12 = sshll.u32 %s1792_s25, 8  ;;  %v2052_v0 = vld [vmem:[%s2032_s29] sm:$0xff]  ;;  %v2055_v1 = vld [vmem:[%s2032_s29 + $0x8] sm:$0xff] }
  0x6b   : > { %s1218_s18 = sadd.s32 4294967295, %s1217_s11  ;;  %s1810_s9 = smov [#allocation2]   ;;  %v2058_v2 = vld [vmem:[%s2032_s29 + $0x10] sm:$0xff]  ;;  %v2061_v3 = vld [vmem:[%s2032_s29 + $0x18] sm:$0xff]  ;;  %v2064_v4 = vld [vmem:[%s2032_s29 + $0x20] sm:$0xff] }
  0x6c   : > { %p281_p6 = scmp.gt.s32.totalorder %s1218_s18, 0  ;;  %s297_s2 = sshll.u32 %s1810_s9, 4  ;;  %v2067_v5 = vld [vmem:[%s2032_s29 + $0x28] sm:$0xff]  ;;  %v2075_v6 = vld [vmem:[%s2032_s29 + $0x30] sm:$0xff]  ;;  %v2078_v7 = vld [vmem:[%s2032_s29 + $0x38] sm:$0xff]  ;;  %s2046_s2 = int_to_ptr.vmem [resolvable:$true] %s297_s2 }
  0x6d   : > { %s2044_s19 = sadd.s32 128, %s1217_s11  ;;  %s1811_s30 = smov [#allocation2 + $0x1]   ;;  %v2081_v8 = vld [vmem:[%s2032_s29 + $0x40] sm:$0xff] }
  0x6e   : > { %s2610_s18 = smov (!%p281_p6, %s1218_s18), 0  ;;  %p284_p8 = scmp.lt.s32.totalorder %s2044_s19, 255 }
  0x6f   : > { %s287_s7 = sadd.s32 %s1219_s12, %s2610_s18  ;;  %s2072_s16 = sshll.u32 %s1811_s30, 4  ;;  %s314_s16 = int_to_ptr.vmem [resolvable:$true] %s2072_s16 }
  0x70   : > { %s1220_s6 = sshll.u32 %s287_s7, 4  ;;  %s1652_s11 = scalar_lea.hbm %s2545_s1, 8192 }
  0x71   : > { %s289_s13 = scalar_lea.hbm %s2545_s1, %s1220_s6 }
  0x72   : > { %s1650_s17 = scalar_lea.hbm %s289_s13, 16  ;;  %p1653_p12 = scmp.lt.u32.totalorder %s289_s13, %s2545_s1 }
  0x73   : > { %p1651_p10 = scmp.ne.s32.totalorder %s289_s13, %s1650_s17  ;;  %p1654_p13 = scmp.lt.u32.totalorder %s1652_s11, %s1650_s17 }
  0x74   : > { %p1656_p7 = scmp.lt.u32.totalorder %s1650_s17, %s289_s13 }
  0x75   : > { %p1655_p3 = por %p1654_p13, %p1653_p12 }
  0x77   : > { %p1657_p1 = por %p1656_p7, %p1655_p3 }
  0x79   : > { %p1658_p2 = pnand %p1657_p1, %p1651_p10 }
  0x7b   : > { %1661 = shalt.err (!%p1658_p2)  }
  0x7c   : > { %s1662_s20 = scalar_lea.vmem %s2046_s2, 16  ;;  %s1666_s14 = scalar_lea.vmem %s2046_s2, 32 }
  0x7d   : > { %p1663_p4 = scmp.ne.s32.totalorder %s2046_s2, %s1662_s20  ;;  %p1667_p5 = scmp.lt.s32.totalorder %s2046_s2, %s2046_s2 }
  0x7e   : > { %p1668_p9 = scmp.lt.s32.totalorder %s1666_s14, %s1662_s20 }
  0x80   : > { %p1669_p0 = por %p1668_p9, %p1667_p5 }
  0x82   : > { %p1670_p6 = pnand %p1669_p0, %p1663_p4 }
  0x84   : > { %1673 = shalt.err (!%p1670_p6)  }
  0x85   : > { %300 = dma.hbm_to_vmem [thread:$0]  %s289_s13, 16, %s2046_s2, [#allocation3]  ;;  %v2102_v9 = vld [vmem:[%s2032_s29 + $0x48] sm:$0xff]  ;;  %v2105_v10 = vld [vmem:[%s2032_s29 + $0x50] sm:$0xff]  ;;  %v2108_v11 = vld [vmem:[%s2032_s29 + $0x58] sm:$0xff] }
  0x86   : > { %s2612_s19 = smov (!%p284_p8, %s2044_s19), 255  ;;  %v2114_v12 = vld [vmem:[%s2032_s29 + $0x60] sm:$0xff]  ;;  %v2117_v13 = vld [vmem:[%s2032_s29 + $0x68] sm:$0xff]  ;;  %v2120_v14 = vld [vmem:[%s2032_s29 + $0x70] sm:$0xff] }
  0x87   : > { %v2123_v15 = vld [vmem:[%s2032_s29 + $0x78] sm:$0xff]  ;;  %s301_s30 = sadd.s32 %s1219_s12, %s2612_s19 }
  0x88   : > { %s1221_s13 = sshll.u32 %s301_s30, 4 }
  0x89   : > { %s303_s26 = scalar_lea.hbm %s2545_s1, %s1221_s13 }
  0x8a   : > { %s1674_s18 = scalar_lea.hbm %s303_s26, 16  ;;  %p1677_p8 = scmp.lt.u32.totalorder %s303_s26, %s2545_s1 }
  0x8b   : > { %p1675_p10 = scmp.ne.s32.totalorder %s303_s26, %s1674_s18  ;;  %p1678_p12 = scmp.lt.u32.totalorder %s1652_s11, %s1674_s18 }
  0x8c   : > { %p1680_p3 = scmp.lt.u32.totalorder %s1674_s18, %s303_s26 }
  0x8d   : > { %p1679_p13 = por %p1678_p12, %p1677_p8 }
  0x8f   : > { %p1681_p7 = por %p1680_p3, %p1679_p13 }
  0x91   : > { %p1682_p1 = pnand %p1681_p7, %p1675_p10 }
  0x93   : > { %1685 = shalt.err (!%p1682_p1)  }
  0x94   : > { %s1686_s29 = scalar_lea.vmem %s314_s16, 16  ;;  %p1691_p4 = scmp.lt.s32.totalorder %s314_s16, %s2046_s2 }
  0x95   : > { %p1687_p2 = scmp.ne.s32.totalorder %s314_s16, %s1686_s29  ;;  %p1692_p5 = scmp.lt.s32.totalorder %s1666_s14, %s1686_s29 }
  0x97   : > { %p1693_p9 = por %p1692_p5, %p1691_p4 }
  0x99   : > { %p1694_p0 = pnand %p1693_p9, %p1687_p2 }
  0x9b   : > { %1697 = shalt.err (!%p1694_p0)  }
  0x9c   : > { %316 = dma.hbm_to_vmem [thread:$0]  %s303_s26, 16, %s314_s16, [#allocation3 + $0x1] }
  0x9d   : > { %s2143_s12 = scalar_lea.vmem [#allocation9], %s1214_s15 }
  0x9e   : > { %1766 = dma.done.wait [#allocation3], 16 }
  0x9f   : > { %1767 = vsyncadd [#allocation3], 4294967280 }
  0xa0   : > { %1768 = dma.done.wait [#allocation3 + $0x1], 16 }
  0xa1   : > { %1769 = vsyncadd [#allocation3 + $0x1], 4294967280  ;;  %586 = vmatprep.mubr.f32.mxu0 %v2052_v0  ;;  %vm415_vm0 = vcmask 1046528   ;;  %v416_v16 = vrot.slane %v2052_v0, 1  ;;  %v417_v17 = vrot.slane %v2055_v1, 1  ;;  %v483_v19 = vld [vmem:[#allocation7 + $0x80] sm:$0xff] }
  0xa2   : > { %v484_v20 = vld [vmem:[#allocation7 + $0x88] sm:$0xff]  ;;  %v467_v21 = vld [vmem:[#allocation7] sm:$0xff]  ;;  %v485_v24 = vld [vmem:[#allocation7 + $0x90] sm:$0xff]  ;;  %p339_p6 = scmp.gt.s32.totalorder %s1788_s24, 0  ;;  %vm366_vm2 = vcmask 1040384   ;;  %s344_s2 = sadd.s32 1, %s1788_s24 }
  0xa3   : > { %v418_v18 = vsel %vm415_vm0, %v416_v16, %v417_v17  ;;  %v1401_v22 = vpack.c.bf16 %v484_v20, %v483_v19  ;;  %v468_v23 = vld [vmem:[#allocation7 + $0x8] sm:$0xff]  ;;  %v486_v25 = vld [vmem:[#allocation7 + $0x98] sm:$0xff]  ;;  %v499_v28 = vld [vmem:[#allocation7 + $0x100] sm:$0xff]  ;;  %p2179_p10 = scmp.lt.s32.totalorder %s344_s2, 2  ;;  %s1226_s26 = sshll.u32 %s1788_s24, 4 }
  0xa4   : > { %1377 = vmatprep.mubr.f32.mxu1 %v418_v18  ;;  %v1403_v26 = vpack.c.bf16 %v468_v23, %v467_v21  ;;  %v1405_v27 = vpack.c.bf16 %v486_v25, %v485_v24  ;;  %v500_v29 = vld [vmem:[#allocation7 + $0x108] sm:$0xff]  ;;  %v469_v30 = vld [vmem:[#allocation7 + $0x10] sm:$0xff]  ;;  %v470_v32 = vld [vmem:[#allocation7 + $0x18] sm:$0xff]  ;;  %s340_s15 = scalar_select %p339_p6, 1, 0 }
  0xa5   : > { %1402 = vmatprep.subr.bf16.mxu0 %v1401_v22  ;;  %v1433_v31 = vpack.c.bf16 %v500_v29, %v499_v28  ;;  %v487_v33 = vld [vmem:[#allocation7 + $0xa0] sm:$0xff]  ;;  %v488_v34 = vld [vmem:[#allocation7 + $0xa8] sm:$0xff]  ;;  %v1407_v35 = vpack.c.bf16 %v470_v32, %v469_v30  ;;  %v501_v36 = vld [vmem:[#allocation7 + $0x110] sm:$0xff]  ;;  %s346_s16 = scalar_select %p2179_p10, 1, 0 }
  0xa6   : > { %1404 = vmatpush3.bf16.msra.mxu0 %v1403_v26  ;;  %v502_v37 = vld [vmem:[#allocation7 + $0x118] sm:$0xff]  ;;  %v1409_v38 = vpack.c.bf16 %v488_v34, %v487_v33  ;;  %v471_v40 = vld [vmem:[#allocation7 + $0x20] sm:$0xff]  ;;  %v472_v41 = vld [vmem:[#allocation7 + $0x28] sm:$0xff]  ;;  %s1227_s18 = sshll.u32 %s1792_s25, 5  ;;  %s1083_s24 = sshll.u32 %s2143_s12, 4  ;;  %s2488_s24 = int_to_ptr.vmem [resolvable:$true] %s1083_s24 }
  0xa7   : > { %1406 = vmatprep.subr.bf16.mxu0 %v1405_v27  ;;  %1434 = vmatprep.subr.bf16.mxu1 %v1433_v31  ;;  %v1437_v39 = vpack.c.bf16 %v502_v37, %v501_v36  ;;  %v489_v42 = vld [vmem:[#allocation7 + $0xb0] sm:$0xff]  ;;  %v490_v43 = vld [vmem:[#allocation7 + $0xb8] sm:$0xff]  ;;  %v503_v44 = vld [vmem:[#allocation7 + $0x120] sm:$0xff]  ;;  %v1411_v47 = vpack.c.bf16 %v472_v41, %v471_v40  ;;  %v341_v36 = vstv %s340_s15  ;;  %s1080_s9 = sadd.s32 %s1227_s18, %s1226_s26  ;;  %s2591_s29 = sld [smem:[#allocation28_spill]] }
  0xa8   : > { %1436 = vmatpush3.bf16.msra.mxu1 %v1433_v31  ;;  %v504_v45 = vld [vmem:[#allocation7 + $0x128] sm:$0xff]  ;;  %v505_v48 = vld [vmem:[#allocation7 + $0x130] sm:$0xff]  ;;  %v506_v49 = vld [vmem:[#allocation7 + $0x138] sm:$0xff]  ;;  %v1413_v50 = vpack.c.bf16 %v490_v43, %v489_v42  ;;  %vm342_vm1 = vcmp.eq.s32.totalorder %v341_v36, 1  ;;  %v443_v36 = vrot.slane %v2120_v14, 1  ;;  %s1228_s6 = sshll.u32 %s1080_s9, 7 }
  0xa9   : > { %1438 = vmatprep.subr.bf16.mxu1 %v1437_v39  ;;  %v1441_v46 = vpack.c.bf16 %v504_v45, %v503_v44  ;;  %v473_v51 = vld [vmem:[#allocation7 + $0x30] sm:$0xff]  ;;  %v474_v52 = vld [vmem:[#allocation7 + $0x38] sm:$0xff]  ;;  %v491_v53 = vld [vmem:[#allocation7 + $0xc0] sm:$0xff]  ;;  %v1445_v55 = vpack.c.bf16 %v506_v49, %v505_v48  ;;  %v419_v48 = vrot.slane %v2058_v2, 1  ;;  %v421_v49 = vrot.slane %v2061_v3, 1  ;;  %s1068_s2 = scalar_lea.sflag [#allocation6], %s2026_s21 }
  0xaa   : > { %1408 = vmatpush3.bf16.msra.mxu0 %v1407_v35  ;;  %v492_v54 = vld [vmem:[#allocation7 + $0xc8] sm:$0xff]  ;;  %v1415_v56 = vpack.c.bf16 %v474_v52, %v473_v51  ;;  %v507_v57 = vld [vmem:[#allocation7 + $0x140] sm:$0xff]  ;;  %v493_v62 = vld [vmem:[#allocation7 + $0xd0] sm:$0xff]  ;;  %v368_v51 = vrot.slane %v2055_v1, 7  ;;  %s1698_s19 = scalar_lea.vmem %s2488_s24, 2048 }
  0xab   : > { %1410 = vmatprep.subr.bf16.mxu0 %v1409_v38  ;;  %v508_v58 = vld [vmem:[#allocation7 + $0x148] sm:$0xff]  ;;  %v1417_v59 = vpack.c.bf16 %v492_v54, %v491_v53  ;;  %v475_v60 = vld [vmem:[#allocation7 + $0x40] sm:$0xff]  ;;  %v494_v63 = vld [vmem:[#allocation7 + $0xd8] sm:$0xff]  ;;  %v420_v52 = vsel %vm415_vm0, %v417_v17, %v419_v48  ;;  %v423_v53 = vrot.slane %v2064_v4, 1  ;;  %v422_v54 = vsel %vm415_vm0, %v419_v48, %v421_v49  ;;  %p1699_p8 = scmp.ne.s32.totalorder %s2488_s24, %s1698_s19 }
  0xac   : > { %1440 = vmatpush3.bf16.msra.mxu1 %v1437_v39  ;;  %v476_v61 = vld [vmem:[#allocation7 + $0x48] sm:$0xff]  ;;  %v1449_v16 = vpack.c.bf16 %v508_v58, %v507_v57  ;;  %v509_v19 = vld [vmem:[#allocation7 + $0x150] sm:$0xff]  ;;  %v510_v20 = vld [vmem:[#allocation7 + $0x158] sm:$0xff]  ;;  %v1421_v21 = vpack.c.bf16 %v494_v63, %v493_v62  ;;  %v370_v57 = vrot.slane %v2058_v2, 7  ;;  %v427_v17 = vrot.slane %v2075_v6, 1 }
  0xad   : > { %1442 = vmatprep.subr.bf16.mxu1 %v1441_v46  ;;  %v1419_v18 = vpack.c.bf16 %v476_v61, %v475_v60  ;;  %v477_v22 = vld [vmem:[#allocation7 + $0x50] sm:$0xff]  ;;  %v478_v23 = vld [vmem:[#allocation7 + $0x58] sm:$0xff]  ;;  %v495_v24 = vld [vmem:[#allocation7 + $0xe0] sm:$0xff]  ;;  %v1453_v26 = vpack.c.bf16 %v510_v20, %v509_v19  ;;  %v424_v58 = vsel %vm415_vm0, %v421_v49, %v423_v53  ;;  %v429_v60 = vrot.slane %v2078_v7, 1  ;;  %s2486_s15 = scalar_lea.hbm %s2591_s29, %s1228_s6  ;;  %p1700_p12 = pnand %p1699_p8, %p1958_p11 }
  0xae   : > { %1412 = vmatpush3.bf16.msra.mxu0 %v1411_v47  ;;  %v496_v25 = vld [vmem:[#allocation7 + $0xe8] sm:$0xff]  ;;  %v1423_v27 = vpack.c.bf16 %v478_v23, %v477_v22  ;;  %v511_v28 = vld [vmem:[#allocation7 + $0x160] sm:$0xff]  ;;  %v497_v33 = vld [vmem:[#allocation7 + $0xf0] sm:$0xff]  ;;  %v371_v61 = vsel %vm366_vm2, %v368_v51, %v370_v57  ;;  %v372_v62 = vrot.slane %v2061_v3, 7  ;;  %v433_v19 = vrot.slane %v2102_v9, 1 }
  0xaf   : > { %1414 = vmatprep.subr.bf16.mxu0 %v1413_v50  ;;  %v512_v29 = vld [vmem:[#allocation7 + $0x168] sm:$0xff]  ;;  %v1425_v30 = vpack.c.bf16 %v496_v25, %v495_v24  ;;  %v479_v31 = vld [vmem:[#allocation7 + $0x60] sm:$0xff]  ;;  %v498_v34 = vld [vmem:[#allocation7 + $0xf8] sm:$0xff]  ;;  %v435_v23 = vrot.slane %v2105_v10, 1  ;;  %v437_v25 = vrot.slane %v2108_v11, 1  ;;  %v384_v49 = vrot.slane %v2102_v9, 7  ;;  %p1701_p13 = pneg %p1700_p12 }
  0xb0   : > { %1444 = vmatpush3.bf16.msra.mxu1 %v1441_v46  ;;  %v480_v32 = vld [vmem:[#allocation7 + $0x68] sm:$0xff]  ;;  %v1457_v35 = vpack.c.bf16 %v512_v29, %v511_v28  ;;  %v513_v38 = vld [vmem:[#allocation7 + $0x170] sm:$0xff]  ;;  %v514_v39 = vld [vmem:[#allocation7 + $0x178] sm:$0xff]  ;;  %v1429_v40 = vpack.c.bf16 %v498_v34, %v497_v33  ;;  %v367_v46 = vrot.slane %v2052_v0, 7  ;;  %v373_v20 = vsel %vm366_vm2, %v370_v57, %v372_v62 }
  0xb1   : > { %1446 = vmatprep.subr.bf16.mxu1 %v1445_v55  ;;  %v1427_v37 = vpack.c.bf16 %v480_v32, %v479_v31  ;;  %v481_v41 = vld [vmem:[#allocation7 + $0x70] sm:$0xff]  ;;  %v482_v42 = vld [vmem:[#allocation7 + $0x78] sm:$0xff]  ;;  %v1461_v44 = vpack.c.bf16 %v514_v39, %v513_v38  ;;  %v347_v28 = vstv %s346_s16  ;;  %v436_v29 = vsel %vm415_vm0, %v433_v19, %v435_v23  ;;  %s1812_s16 = smov [#allocation9]  }
  0xb2   : > { %1416 = vmatpush3.bf16.msra.mxu0 %v1415_v56  ;;  %v2154_v43 = vld [vmem:[#allocation2] sm:$0x3]  ;;  %v1431_v45 = vpack.c.bf16 %v482_v42, %v481_v41  ;;  %v369_v56 = vsel %vm366_vm2, %v367_v46, %v368_v51  ;;  %v438_v31 = vsel %vm415_vm0, %v435_v23, %v437_v25  ;;  %v441_v32 = vrot.slane %v2117_v13, 1  ;;  %s1702_s11 = sshll.u32 %s1812_s16, 4  ;;  %s1703_s11 = int_to_ptr.vmem [resolvable:$false] %s1702_s11 }
  0xb3   : > { %1418 = vmatprep.subr.bf16.mxu0 %v1417_v59  ;;  %v343_v47 = vsel %vm342_vm1, %v2154_v43, 0.0  ;;  %vm348_vm3 = vcmp.eq.s32.totalorder %v347_v28, 1  ;;  %v378_v34 = vrot.slane %v2075_v6, 7  ;;  %v445_v39 = vrot.slane %v2123_v15, 1  ;;  %s1704_s14 = scalar_lea.vmem %s1703_s11, 4096  ;;  %p1705_p3 = scmp.lt.s32.totalorder %s2488_s24, %s1703_s11 }
  0xb4   : > { %1448 = vmatpush3.bf16.msra.mxu1 %v1445_v55  ;;  %v414_v50 = vsel %vm366_vm2, %v343_v47, %v367_v46  ;;  %v425_v55 = vrot.slane %v2067_v5, 1  ;;  %v380_v41 = vrot.slane %v2078_v7, 7  ;;  %v444_v42 = vsel %vm415_vm0, %v441_v32, %v443_v36  ;;  %p1706_p7 = scmp.lt.s32.totalorder %s1704_s14, %s1698_s19 }
  0xb5   : > { %1450 = vmatprep.subr.bf16.mxu1 %v1449_v16  ;;  %v382_v46 = vrot.slane %v2081_v8, 7  ;;  %v386_v51 = vrot.slane %v2105_v10, 7  ;;  %v392_v57 = vrot.slane %v2117_v13, 7 }
  0xb6   : > { %1420 = vmatpush3.bf16.msra.mxu0 %v1419_v18  ;;  %v426_v59 = vsel %vm415_vm0, %v423_v53, %v425_v55  ;;  %v428_v63 = vsel %vm415_vm0, %v425_v55, %v427_v17  ;;  %v430_v18 = vsel %vm415_vm0, %v427_v17, %v429_v60  ;;  %v388_v53 = vrot.slane %v2108_v11, 7  ;;  %p1707_p1 = por %p1706_p7, %p1705_p3 }
  0xb7   : > { %1422 = vmatprep.subr.bf16.mxu0 %v1421_v21  ;;  %v374_v21 = vrot.slane %v2064_v4, 7  ;;  %v383_v48 = vsel %vm366_vm2, %v380_v41, %v382_v46  ;;  %v390_v55 = vrot.slane %v2114_v12, 7  ;;  %v394_v17 = vrot.slane %v2120_v14, 7 }
  0xb8   : > { %1452 = vmatpush3.bf16.msra.mxu1 %v1449_v16  ;;  %v431_v16 = vrot.slane %v2081_v8, 1  ;;  %p1708_p2 = pnand %p1707_p1, %p1701_p13 }
  0xb9   : > { %1454 = vmatprep.subr.bf16.mxu1 %v1453_v26 }
  0xba   : > { %1424 = vmatpush3.bf16.msra.mxu0 %v1423_v27  ;;  %v432_v22 = vsel %vm415_vm0, %v429_v60, %v431_v16  ;;  %v434_v24 = vsel %vm415_vm0, %v431_v16, %v433_v19  ;;  %v376_v27 = vrot.slane %v2067_v5, 7  ;;  %v396_v60 = vrot.slane %v2123_v15, 7  ;;  %v2246_v16 = vld [vmem:[%s2547_s3] ss:$0 sm:$0xff] }
  0xbb   : > { %1426 = vmatprep.subr.bf16.mxu0 %v1425_v30  ;;  %v439_v30 = vrot.slane %v2114_v12, 1 }
  0xbc   : > { %1456 = vmatpush3.bf16.msra.mxu1 %v1453_v26  ;;  %v375_v26 = vsel %vm366_vm2, %v372_v62, %v374_v21  ;;  %v377_v33 = vsel %vm366_vm2, %v374_v21, %v376_v27 }
  0xbd   : > { %1458 = vmatprep.subr.bf16.mxu1 %v1457_v35  ;;  %v442_v38 = vsel %vm415_vm0, %v439_v30, %v441_v32 }
  0xbe   : > { %1428 = vmatpush3.bf16.msra.mxu0 %v1427_v37  ;;  %v349_v37 = vsel %vm348_vm3, %v2154_v43, 0.0  ;;  %v381_v43 = vsel %vm366_vm2, %v378_v34, %v380_v41 }
  0xbf   : > { %1430 = vmatprep.subr.bf16.mxu0 %v1429_v40  ;;  %v379_v40 = vsel %vm366_vm2, %v376_v27, %v378_v34 }
  0xc0   : > { %1460 = vmatpush3.bf16.msra.mxu1 %v1457_v35  ;;  %v440_v35 = vsel %vm415_vm0, %v437_v25, %v439_v30 }
  0xc1   : > { %1462 = vmatprep.subr.bf16.mxu1 %v1461_v44 }
  0xc2   : > { %1432 = vmatpush3.bf16.msra.mxu0 %v1431_v45  ;;  %v446_v45 = vsel %vm415_vm0, %v443_v36, %v445_v39 }
  0xc4   : > { %1464 = vmatpush3.bf16.msra.mxu1 %v1461_v44  ;;  %v464_v44 = vrot.slane %v349_v37, 2 }
  0xc5   : > { %587 = vmatmul.mubr.f32.vlgmr.msra.gmra.mrb[0].mxu0 %v414_v50  ;;  %v385_v50 = vsel %vm366_vm2, %v382_v46, %v384_v49 }
  0xc6   : > { %591 = vmatprep.mubr.f32.mxu0 %v2055_v1  ;;  %v466_v47 = vsel %vm415_vm0, %v445_v39, %v464_v44 }
  0xc7   : > { %1378 = vmatmul.mubr.f32.vlgmr.msra.gmra.mrb[0].mxu1 %v420_v52  ;;  %v387_v52 = vsel %vm366_vm2, %v384_v49, %v386_v51 }
  0xc8   : > { %1380 = vmatprep.mubr.f32.mxu1 %v422_v54  ;;  %v389_v54 = vsel %vm366_vm2, %v386_v51, %v388_v53 }
  0xc9   : > { %592 = vmatmul.mubr.f32.gmra.mrb[2].mxu0 %v369_v56  ;;  %v391_v56 = vsel %vm366_vm2, %v388_v53, %v390_v55 }
  0xca   : > { %596 = vmatprep.mubr.f32.mxu0 %v2058_v2 }
  0xcb   : > { %1381 = vmatmul.mubr.f32.gmra.mrb[2].mxu1 %v424_v58  ;;  %v393_v58 = vsel %vm366_vm2, %v390_v55, %v392_v57 }
  0xcc   : > { %1383 = vmatprep.mubr.f32.mxu1 %v426_v59  ;;  %v395_v59 = vsel %vm366_vm2, %v392_v57, %v394_v17 }
  0xcd   : > { %597 = vmatmul.mubr.f32.gmra.mrb[4].mxu0 %v371_v61  ;;  %v397_v61 = vsel %vm366_vm2, %v394_v17, %v396_v60 }
  0xce   : > { %601 = vmatprep.mubr.f32.mxu0 %v2061_v3 }
  0xcf   : > { %1384 = vmatmul.mubr.f32.gmra.mrb[4].mxu1 %v428_v63 }
  0xd0   : > { %1386 = vmatprep.mubr.f32.mxu1 %v430_v18 }
  0xd1   : > { %602 = vmatmul.mubr.f32.gmra.mrb[6].mxu0 %v373_v20 }
  0xd2   : > { %606 = vmatprep.mubr.f32.mxu0 %v2064_v4 }
  0xd3   : > { %1387 = vmatmul.mubr.f32.gmra.mrb[6].mxu1 %v432_v22 }
  0xd4   : > { %1389 = vmatprep.mubr.f32.mxu1 %v434_v24 }
  0xd5   : > { %607 = vmatmul.mubr.f32.gmra.mrb[8].mxu0 %v375_v26 }
  0xd6   : > { %611 = vmatprep.mubr.f32.mxu0 %v2067_v5 }
  0xd7   : > { %1390 = vmatmul.mubr.f32.gmra.mrb[8].mxu1 %v436_v29 }
  0xd8   : > { %1392 = vmatprep.mubr.f32.mxu1 %v438_v31 }
  0xd9   : > { %612 = vmatmul.mubr.f32.gmra.mrb[10].mxu0 %v377_v33 }
  0xda   : > { %616 = vmatprep.mubr.f32.mxu0 %v2075_v6 }
  0xdb   : > { %1393 = vmatmul.mubr.f32.gmra.mrb[10].mxu1 %v440_v35 }
  0xdc   : > { %1395 = vmatprep.mubr.f32.mxu1 %v442_v38 }
  0xdd   : > { %617 = vmatmul.mubr.f32.gmra.mrb[12].mxu0 %v379_v40 }
  0xde   : > { %621 = vmatprep.mubr.f32.mxu0 %v2078_v7 }
  0xdf   : > { %1396 = vmatmul.mubr.f32.gmra.mrb[12].mxu1 %v444_v42 }
  0xe0   : > { %1398 = vmatprep.mubr.f32.mxu1 %v446_v45 }
  0xe1   : > { %622 = vmatmul.mubr.f32.gmra.mrb[14].mxu0 %v381_v43 }
  0xe2   : > { %626 = vmatprep.mubr.f32.mxu0 %v2081_v8 }
  0xe3   : > { %1399 = vmatmul.mubr.f32.gmra.mrb[14].mxu1 %v466_v47 }
  0xe5   : > { %627 = vmatmul.mubr.f32.gmra.mrb[16].mxu0 %v383_v48 }
  0xe6   : > { %631 = vmatprep.mubr.f32.mxu0 %v2102_v9 }
  0xe9   : > { %632 = vmatmul.mubr.f32.gmra.mrb[18].mxu0 %v385_v50 }
  0xea   : > { %636 = vmatprep.mubr.f32.mxu0 %v2105_v10 }
  0xed   : > { %637 = vmatmul.mubr.f32.gmra.mrb[20].mxu0 %v387_v52 }
  0xee   : > { %641 = vmatprep.mubr.f32.mxu0 %v2108_v11 }
  0xf1   : > { %642 = vmatmul.mubr.f32.gmra.mrb[22].mxu0 %v389_v54 }
  0xf2   : > { %646 = vmatprep.mubr.f32.mxu0 %v2114_v12 }
  0xf5   : > { %647 = vmatmul.mubr.f32.gmra.mrb[24].mxu0 %v391_v56 }
  0xf6   : > { %651 = vmatprep.mubr.f32.mxu0 %v2117_v13 }
  0xf9   : > { %652 = vmatmul.mubr.f32.gmra.mrb[26].mxu0 %v393_v58 }
  0xfa   : > { %656 = vmatprep.mubr.f32.mxu0 %v2120_v14 }
  0xfd   : > { %657 = vmatmul.mubr.f32.gmra.mrb[28].mxu0 %v395_v59 }
  0xfe   : > { %661 = vmatprep.mubr.f32.mxu0 %v2123_v15 }
 0x101   : > { %662 = vmatmul.mubr.f32.gmra.mrb[30].mxu0 %v397_v61 }
 0x198   : > { %v1265_v62 = vpop.f32.mrb[0].mxu0 }
 0x199   : > { %v1266_v63 = vpop.f32.mrb[1].mxu0 }
 0x19a   : > { %v1267_v18 = vadd.f32 %v1266_v63, %v1265_v62  ;;  %v1379_v19 = vpop.f32.mrb[0].mxu1 }
 0x19b   : > { %v733_v20 = vpop.f32.mrb[1].mxu1 }
 0x19c   : > { %v1268_v21 = vpop.f32.mrb[2].mxu0  ;;  %v589_v22 = vadd.f32 %v1267_v18, %v2246_v16 }
 0x19d   : > { %v1269_v23 = vpop.f32.mrb[3].mxu0 }
 0x19e   : > { %v1270_v24 = vadd.f32 %v1269_v23, %v1268_v21  ;;  %v734_v25 = vadd.f32 %v733_v20, %v589_v22  ;;  %v1382_v26 = vpop.f32.mrb[2].mxu1 }
 0x19f   : > { %v743_v27 = vpop.f32.mrb[3].mxu1 }
 0x1a0   : > { %v594_v28 = vadd.f32 %v1270_v24, %v2246_v16  ;;  %v2251_v29 = vadd.f32 %v734_v25, %v2052_v0  ;;  %v1271_v30 = vpop.f32.mrb[4].mxu0 }
 0x1a1   : > { %v1272_v31 = vpop.f32.mrb[5].mxu0 }
 0x1a2   : > { %v1273_v32 = vadd.f32 %v1272_v31, %v1271_v30  ;;  %828 = vadd.xlane.f32.xlu0 %v2251_v29  ;;  %v739_v33 = vadd.f32 %v1379_v19, %v594_v28  ;;  %v1385_v34 = vpop.f32.mrb[4].mxu1 }
 0x1a3   : > { %v753_v35 = vpop.f32.mrb[5].mxu1 }
 0x1a4   : > { %v1274_v36 = vpop.f32.mrb[6].mxu0  ;;  %v599_v37 = vadd.f32 %v1273_v32, %v2246_v16  ;;  %v2256_v38 = vadd.f32 %v739_v33, %v2055_v1 }
 0x1a5   : > { %v1275_v39 = vpop.f32.mrb[7].mxu0 }
 0x1a6   : > { %v1276_v40 = vadd.f32 %v1275_v39, %v1274_v36  ;;  %v744_v41 = vadd.f32 %v743_v27, %v599_v37  ;;  %830 = vadd.xlane.f32.xlu0 %v2256_v38  ;;  %v1388_v0 = vpop.f32.mrb[6].mxu1 }
 0x1a7   : > { %v763_v42 = vpop.f32.mrb[7].mxu1 }
 0x1a8   : > { %v604_v44 = vadd.f32 %v1276_v40, %v2246_v16  ;;  %v2261_v45 = vadd.f32 %v744_v41, %v2058_v2  ;;  %v1277_v43 = vpop.f32.mrb[8].mxu0 }
 0x1a9   : > { %v1278_v46 = vpop.f32.mrb[9].mxu0 }
 0x1aa   : > { %v1279_v47 = vadd.f32 %v1278_v46, %v1277_v43  ;;  %832 = vadd.xlane.f32.xlu1 %v2261_v45  ;;  %v749_v48 = vadd.f32 %v1382_v26, %v604_v44  ;;  %v1391_v1 = vpop.f32.mrb[8].mxu1 }
 0x1ab   : > { %v773_v49 = vpop.f32.mrb[9].mxu1 }
 0x1ac   : > { %v1280_v50 = vpop.f32.mrb[10].mxu0  ;;  %v609_v51 = vadd.f32 %v1279_v47, %v2246_v16  ;;  %v2266_v52 = vadd.f32 %v749_v48, %v2061_v3 }
 0x1ad   : > { %v1281_v53 = vpop.f32.mrb[11].mxu0 }
 0x1ae   : > { %v1282_v54 = vadd.f32 %v1281_v53, %v1280_v50  ;;  %v754_v55 = vadd.f32 %v753_v35, %v609_v51  ;;  %834 = vadd.xlane.f32.xlu1 %v2266_v52  ;;  %v1394_v2 = vpop.f32.mrb[10].mxu1 }
 0x1af   : > { %v783_v56 = vpop.f32.mrb[11].mxu1 }
 0x1b0   : > { %v614_v57 = vadd.f32 %v1282_v54, %v2246_v16  ;;  %v2271_v58 = vadd.f32 %v754_v55, %v2064_v4  ;;  %v1283_v17 = vpop.f32.mrb[12].mxu0 }
 0x1b1   : > { %v1284_v59 = vpop.f32.mrb[13].mxu0 }
 0x1b2   : > { %v1285_v60 = vadd.f32 %v1284_v59, %v1283_v17  ;;  %836 = vadd.xlane.f32.xlu0 %v2271_v58  ;;  %v759_v61 = vadd.f32 %v1385_v34, %v614_v57  ;;  %v1397_v3 = vpop.f32.mrb[12].mxu1 }
 0x1b3   : > { %v793_v62 = vpop.f32.mrb[13].mxu1 }
 0x1b4   : > { %v1286_v63 = vpop.f32.mrb[14].mxu0  ;;  %v619_v18 = vadd.f32 %v1285_v60, %v2246_v16  ;;  %v2276_v19 = vadd.f32 %v759_v61, %v2067_v5 }
 0x1b5   : > { %v1287_v20 = vpop.f32.mrb[15].mxu0 }
 0x1b6   : > { %v1288_v21 = vadd.f32 %v1287_v20, %v1286_v63  ;;  %v764_v22 = vadd.f32 %v763_v42, %v619_v18  ;;  %838 = vadd.xlane.f32.xlu1 %v2276_v19  ;;  %v1400_v4 = vpop.f32.mrb[14].mxu1 }
 0x1b7   : > { %v803_v23 = vpop.f32.mrb[15].mxu1 }
 0x1b8   : > { %v624_v24 = vadd.f32 %v1288_v21, %v2246_v16  ;;  %v2281_v25 = vadd.f32 %v764_v22, %v2075_v6  ;;  %v1289_v26 = vpop.f32.mrb[16].mxu0 }
 0x1b9   : > { %v1290_v27 = vpop.f32.mrb[17].mxu0 }
 0x1ba   : > { %v1291_v28 = vadd.f32 %v1290_v27, %v1289_v26  ;;  %840 = vadd.xlane.f32.xlu0 %v2281_v25  ;;  %v769_v30 = vadd.f32 %v1388_v0, %v624_v24 }
 0x1bc   : > { %v1292_v5 = vpop.f32.mrb[18].mxu0  ;;  %v629_v31 = vadd.f32 %v1291_v28, %v2246_v16  ;;  %v2286_v32 = vadd.f32 %v769_v30, %v2078_v7 }
 0x1bd   : > { %v1293_v33 = vpop.f32.mrb[19].mxu0 }
 0x1be   : > { %v1294_v34 = vadd.f32 %v1293_v33, %v1292_v5  ;;  %v774_v35 = vadd.f32 %v773_v49, %v629_v31  ;;  %842 = vadd.xlane.f32.xlu1 %v2286_v32 }
 0x1c0   : > { %v634_v6 = vadd.f32 %v1294_v34, %v2246_v16  ;;  %v2291_v36 = vadd.f32 %v774_v35, %v2081_v8  ;;  %v1295_v37 = vpop.f32.mrb[20].mxu0 }
 0x1c1   : > { %v1296_v39 = vpop.f32.mrb[21].mxu0 }
 0x1c2   : > { %v1297_v40 = vadd.f32 %v1296_v39, %v1295_v37  ;;  %844 = vadd.xlane.f32.xlu0 %v2291_v36  ;;  %v779_v41 = vadd.f32 %v1391_v1, %v634_v6 }
 0x1c4   : > { %v1298_v0 = vpop.f32.mrb[22].mxu0  ;;  %v639_v7 = vadd.f32 %v1297_v40, %v2246_v16  ;;  %v2296_v42 = vadd.f32 %v779_v41, %v2102_v9 }
 0x1c5   : > { %v1299_v44 = vpop.f32.mrb[23].mxu0 }
 0x1c6   : > { %v1300_v43 = vadd.f32 %v1299_v44, %v1298_v0  ;;  %v784_v46 = vadd.f32 %v783_v56, %v639_v7  ;;  %846 = vadd.xlane.f32.xlu1 %v2296_v42 }
 0x1c8   : > { %v644_v8 = vadd.f32 %v1300_v43, %v2246_v16  ;;  %v2301_v47 = vadd.f32 %v784_v46, %v2105_v10  ;;  %v1301_v48 = vpop.f32.mrb[24].mxu0 }
 0x1c9   : > { %v1302_v49 = vpop.f32.mrb[25].mxu0 }
 0x1ca   : > { %v1303_v50 = vadd.f32 %v1302_v49, %v1301_v48  ;;  %848 = vadd.xlane.f32.xlu0 %v2301_v47  ;;  %v789_v1 = vadd.f32 %v1394_v2, %v644_v8 }
 0x1cc   : > { %v1304_v51 = vpop.f32.mrb[26].mxu0  ;;  %v649_v9 = vadd.f32 %v1303_v50, %v2246_v16  ;;  %v2306_v53 = vadd.f32 %v789_v1, %v2108_v11 }
 0x1cd   : > { %v1305_v54 = vpop.f32.mrb[27].mxu0 }
 0x1ce   : > { %v1306_v55 = vadd.f32 %v1305_v54, %v1304_v51  ;;  %v794_v56 = vadd.f32 %v793_v62, %v649_v9  ;;  %850 = vadd.xlane.f32.xlu1 %v2306_v53 }
 0x1d0   : > { %v654_v10 = vadd.f32 %v1306_v55, %v2246_v16  ;;  %v2311_v57 = vadd.f32 %v794_v56, %v2114_v12  ;;  %v1307_v17 = vpop.f32.mrb[28].mxu0 }
 0x1d1   : > { %v1308_v59 = vpop.f32.mrb[29].mxu0 }
 0x1d2   : > { %v1309_v60 = vadd.f32 %v1308_v59, %v1307_v17  ;;  %852 = vadd.xlane.f32.xlu0 %v2311_v57  ;;  %v799_v2 = vadd.f32 %v1397_v3, %v654_v10 }
 0x1d4   : > { %v1310_v61 = vpop.f32.mrb[30].mxu0  ;;  %v659_v11 = vadd.f32 %v1309_v60, %v2246_v16  ;;  %v2316_v63 = vadd.f32 %v799_v2, %v2117_v13 }
 0x1d5   : > { %v1311_v62 = vpop.f32.mrb[31].mxu0 }
 0x1d6   : > { %v1312_v18 = vadd.f32 %v1311_v62, %v1310_v61  ;;  %v804_v20 = vadd.f32 %v803_v23, %v659_v11  ;;  %854 = vadd.xlane.f32.xlu1 %v2316_v63 }
 0x1d8   : > { %v664_v12 = vadd.f32 %v1312_v18, %v2246_v16  ;;  %v2321_v21 = vadd.f32 %v804_v20, %v2120_v14 }
 0x1da   : > { %856 = vadd.xlane.f32.xlu0 %v2321_v21  ;;  %v809_v22 = vadd.f32 %v1400_v4, %v664_v12 }
 0x1dc   : > { %v2325_v3 = vadd.f32 %v809_v22, %v2123_v15 }
 0x1de   : > { %858 = vadd.xlane.f32.xlu1 %v2325_v3 }
 0x22f   : > { %v829_v13 = vpop.xlane.xlu0 %828 }
 0x230   : > { %v861_v24 = vmul.f32 0.0078125, %v829_v13 }
 0x232   : > { %v2329_v26 = vsub.f32 %v2251_v29, %v861_v24 }
 0x233   : > { %v831_v23 = vpop.xlane.xlu0 %830 }
 0x234   : > { %v862_v27 = vmul.f32 0.0078125, %v831_v23  ;;  %v893_v16 = vmul.f32 %v2329_v26, %v2329_v26 }
 0x236   : > { %v2334_v14 = vsub.f32 %v2256_v38, %v862_v27  ;;  %909 = vadd.xlane.f32.xlu0 %v893_v16 }
 0x237   : > { %v833_v4 = vpop.xlane.xlu1 %832 }
 0x238   : > { %v863_v28 = vmul.f32 0.0078125, %v833_v4  ;;  %v894_v15 = vmul.f32 %v2334_v14, %v2334_v14 }
 0x23a   : > { %v2339_v30 = vsub.f32 %v2261_v45, %v863_v28  ;;  %911 = vadd.xlane.f32.xlu1 %v894_v15 }
 0x23b   : > { %v835_v29 = vpop.xlane.xlu1 %834 }
 0x23c   : > { %v864_v5 = vmul.f32 0.0078125, %v835_v29  ;;  %v895_v31 = vmul.f32 %v2339_v30, %v2339_v30 }
 0x23e   : > { %v2344_v33 = vsub.f32 %v2266_v52, %v864_v5  ;;  %913 = vadd.xlane.f32.xlu0 %v895_v31 }
 0x23f   : > { %v837_v38 = vpop.xlane.xlu0 %836 }
 0x240   : > { %v865_v34 = vmul.f32 0.0078125, %v837_v38  ;;  %v896_v35 = vmul.f32 %v2344_v33, %v2344_v33 }
 0x242   : > { %v2349_v6 = vsub.f32 %v2271_v58, %v865_v34  ;;  %915 = vadd.xlane.f32.xlu1 %v896_v35  ;;  %v2411_v34 = vld [vmem:[%s2548_s4] ss:$0 sm:$0xff] }
 0x243   : > { %v839_v45 = vpop.xlane.xlu1 %838 }
 0x244   : > { %v866_v37 = vmul.f32 0.0078125, %v839_v45  ;;  %v897_v39 = vmul.f32 %v2349_v6, %v2349_v6 }
 0x246   : > { %v2354_v40 = vsub.f32 %v2276_v19, %v866_v37  ;;  %917 = vadd.xlane.f32.xlu0 %v897_v39  ;;  %v2417_v39 = vld [vmem:[%s2549_s5] ss:$0 sm:$0xff] }
 0x247   : > { %v841_v52 = vpop.xlane.xlu0 %840 }
 0x248   : > { %v867_v41 = vmul.f32 0.0078125, %v841_v52  ;;  %v898_v0 = vmul.f32 %v2354_v40, %v2354_v40 }
 0x24a   : > { %v2359_v7 = vsub.f32 %v2281_v25, %v867_v41  ;;  %919 = vadd.xlane.f32.xlu1 %v898_v0 }
 0x24b   : > { %v843_v58 = vpop.xlane.xlu1 %842 }
 0x24c   : > { %v868_v44 = vmul.f32 0.0078125, %v843_v58  ;;  %v899_v43 = vmul.f32 %v2359_v7, %v2359_v7 }
 0x24e   : > { %v2364_v46 = vsub.f32 %v2286_v32, %v868_v44  ;;  %921 = vadd.xlane.f32.xlu0 %v899_v43 }
 0x24f   : > { %v845_v19 = vpop.xlane.xlu0 %844 }
 0x250   : > { %v869_v8 = vmul.f32 0.0078125, %v845_v19  ;;  %v900_v48 = vmul.f32 %v2364_v46, %v2364_v46 }
 0x252   : > { %v2369_v49 = vsub.f32 %v2291_v36, %v869_v8  ;;  %923 = vadd.xlane.f32.xlu1 %v900_v48 }
 0x253   : > { %v847_v25 = vpop.xlane.xlu1 %846 }
 0x254   : > { %v870_v50 = vmul.f32 0.0078125, %v847_v25  ;;  %v901_v1 = vmul.f32 %v2369_v49, %v2369_v49 }
 0x256   : > { %v2374_v51 = vsub.f32 %v2296_v42, %v870_v50  ;;  %925 = vadd.xlane.f32.xlu0 %v901_v1 }
 0x257   : > { %v849_v32 = vpop.xlane.xlu0 %848 }
 0x258   : > { %v871_v9 = vmul.f32 0.0078125, %v849_v32  ;;  %v902_v54 = vmul.f32 %v2374_v51, %v2374_v51 }
 0x25a   : > { %v2379_v55 = vsub.f32 %v2301_v47, %v871_v9  ;;  %927 = vadd.xlane.f32.xlu1 %v902_v54 }
 0x25b   : > { %v851_v36 = vpop.xlane.xlu1 %850 }
 0x25c   : > { %v872_v56 = vmul.f32 0.0078125, %v851_v36  ;;  %v903_v10 = vmul.f32 %v2379_v55, %v2379_v55 }
 0x25e   : > { %v2384_v17 = vsub.f32 %v2306_v53, %v872_v56  ;;  %929 = vadd.xlane.f32.xlu0 %v903_v10 }
 0x25f   : > { %v853_v42 = vpop.xlane.xlu0 %852 }
 0x260   : > { %v873_v59 = vmul.f32 0.0078125, %v853_v42  ;;  %v904_v60 = vmul.f32 %v2384_v17, %v2384_v17 }
 0x262   : > { %v2389_v2 = vsub.f32 %v2311_v57, %v873_v59  ;;  %931 = vadd.xlane.f32.xlu1 %v904_v60 }
 0x263   : > { %v855_v47 = vpop.xlane.xlu1 %854 }
 0x264   : > { %v874_v61 = vmul.f32 0.0078125, %v855_v47  ;;  %v905_v11 = vmul.f32 %v2389_v2, %v2389_v2 }
 0x266   : > { %v2394_v62 = vsub.f32 %v2316_v63, %v874_v61  ;;  %933 = vadd.xlane.f32.xlu0 %v905_v11 }
 0x267   : > { %v857_v53 = vpop.xlane.xlu0 %856 }
 0x268   : > { %v875_v18 = vmul.f32 0.0078125, %v857_v53  ;;  %v906_v20 = vmul.f32 %v2394_v62, %v2394_v62 }
 0x26a   : > { %v2399_v12 = vsub.f32 %v2321_v21, %v875_v18  ;;  %935 = vadd.xlane.f32.xlu1 %v906_v20 }
 0x26b   : > { %v859_v57 = vpop.xlane.xlu1 %858 }
 0x26c   : > { %v876_v22 = vmul.f32 0.0078125, %v859_v57  ;;  %v907_v13 = vmul.f32 %v2399_v12, %v2399_v12 }
 0x26e   : > { %v2404_v24 = vsub.f32 %v2325_v3, %v876_v22  ;;  %937 = vadd.xlane.f32.xlu0 %v907_v13 }
 0x270   : > { %v908_v63 = vmul.f32 %v2404_v24, %v2404_v24 }
 0x272   : > { %939 = vadd.xlane.f32.xlu1 %v908_v63 }
 0x2c3   : > { %v910_v23 = vpop.xlane.xlu0 %909 }
 0x2c4   : > { %v941_v27 = vmul.f32 0.0078125, %v910_v23 }
 0x2c6   : > { %v957_v16 = vadd.f32 1e-05, %v941_v27 }
 0x2c7   : > { %v912_v4 = vpop.xlane.xlu1 %911 }
 0x2c8   : > { %1560 = vrsqrt.f32 %v957_v16  ;;  %v942_v21 = vmul.f32 0.0078125, %v912_v4 }
 0x2ca   : > { %v958_v28 = vadd.f32 1e-05, %v942_v21 }
 0x2cb   : > { %v914_v15 = vpop.xlane.xlu0 %913 }
 0x2cc   : > { %1562 = vrsqrt.f32 %v958_v28  ;;  %v943_v29 = vmul.f32 0.0078125, %v914_v15 }
 0x2ce   : > { %v959_v5 = vadd.f32 1e-05, %v943_v29 }
 0x2cf   : > { %v916_v31 = vpop.xlane.xlu1 %915 }
 0x2d0   : > { %1564 = vrsqrt.f32 %v959_v5  ;;  %v944_v3 = vmul.f32 0.0078125, %v916_v31 }
 0x2d2   : > { %v1561_v38 = vpop.eup %1560  ;;  %v960_v35 = vadd.f32 1e-05, %v944_v3 }
 0x2d3   : > { %v989_v45 = vmul.f32 %v1561_v38, %v2329_v26  ;;  %v918_v37 = vpop.xlane.xlu0 %917 }
 0x2d4   : > { %1566 = vrsqrt.f32 %v960_v35  ;;  %v945_v52 = vmul.f32 0.0078125, %v918_v37 }
 0x2d5   : > { %v1012_v41 = vmul.f32 %v2411_v34, %v989_v45 }
 0x2d6   : > { %v1563_v0 = vpop.eup %1562  ;;  %v961_v58 = vadd.f32 1e-05, %v945_v52 }
 0x2d7   : > { %v1035_v44 = vadd.f32 %v2417_v39, %v1012_v41  ;;  %v990_v43 = vmul.f32 %v1563_v0, %v2334_v14  ;;  %v920_v19 = vpop.xlane.xlu1 %919 }
 0x2d8   : > { %1568 = vrsqrt.f32 %v961_v58  ;;  %v946_v26 = vmul.f32 0.0078125, %v920_v19 }
 0x2d9   : > { %1051 = vst [vmem:[%s2143_s12] sm:$0xff] %v1035_v44  ;;  %v1013_v8 = vmul.f32 %v2411_v34, %v990_v43 }
 0x2da   : > { %v1565_v48 = vpop.eup %1564  ;;  %v962_v25 = vadd.f32 1e-05, %v946_v26 }
 0x2db   : > { %v1036_v50 = vadd.f32 %v2417_v39, %v1013_v8  ;;  %v991_v1 = vmul.f32 %v1565_v48, %v2339_v30  ;;  %v922_v32 = vpop.xlane.xlu0 %921 }
 0x2dc   : > { %1570 = vrsqrt.f32 %v962_v25  ;;  %v947_v9 = vmul.f32 0.0078125, %v922_v32 }
 0x2dd   : > { %1052 = vst [vmem:[%s2143_s12 + $0x8] sm:$0xff] %v1036_v50  ;;  %v1014_v54 = vmul.f32 %v2411_v34, %v991_v1 }
 0x2de   : > { %v1567_v14 = vpop.eup %1566  ;;  %v963_v36 = vadd.f32 1e-05, %v947_v9 }
 0x2df   : > { %v1037_v56 = vadd.f32 %v2417_v39, %v1014_v54  ;;  %v992_v10 = vmul.f32 %v1567_v14, %v2344_v33  ;;  %v924_v42 = vpop.xlane.xlu1 %923 }
 0x2e0   : > { %1572 = vrsqrt.f32 %v963_v36  ;;  %v948_v59 = vmul.f32 0.0078125, %v924_v42 }
 0x2e1   : > { %1053 = vst [vmem:[%s2143_s12 + $0x10] sm:$0xff] %v1037_v56  ;;  %v1015_v60 = vmul.f32 %v2411_v34, %v992_v10 }
 0x2e2   : > { %v1569_v30 = vpop.eup %1568  ;;  %v964_v47 = vadd.f32 1e-05, %v948_v59 }
 0x2e3   : > { %v1038_v61 = vadd.f32 %v2417_v39, %v1015_v60  ;;  %v993_v11 = vmul.f32 %v1569_v30, %v2349_v6  ;;  %v926_v53 = vpop.xlane.xlu0 %925 }
 0x2e4   : > { %1574 = vrsqrt.f32 %v964_v47  ;;  %v949_v18 = vmul.f32 0.0078125, %v926_v53 }
 0x2e5   : > { %1054 = vst [vmem:[%s2143_s12 + $0x18] sm:$0xff] %v1038_v61  ;;  %v1016_v20 = vmul.f32 %v2411_v34, %v993_v11 }
 0x2e6   : > { %v1571_v33 = vpop.eup %1570  ;;  %v965_v57 = vadd.f32 1e-05, %v949_v18 }
 0x2e7   : > { %v1039_v22 = vadd.f32 %v2417_v39, %v1016_v20  ;;  %v994_v13 = vmul.f32 %v1571_v33, %v2354_v40  ;;  %v928_v63 = vpop.xlane.xlu1 %927 }
 0x2e8   : > { %1576 = vrsqrt.f32 %v965_v57  ;;  %v950_v23 = vmul.f32 0.0078125, %v928_v63 }
 0x2e9   : > { %1055 = vst [vmem:[%s2143_s12 + $0x20] sm:$0xff] %v1039_v22  ;;  %v1017_v27 = vmul.f32 %v2411_v34, %v994_v13 }
 0x2ea   : > { %v1573_v6 = vpop.eup %1572  ;;  %v966_v16 = vadd.f32 1e-05, %v950_v23 }
 0x2eb   : > { %v1040_v4 = vadd.f32 %v2417_v39, %v1017_v27  ;;  %v995_v21 = vmul.f32 %v1573_v6, %v2359_v7  ;;  %v930_v28 = vpop.xlane.xlu0 %929 }
 0x2ec   : > { %1578 = vrsqrt.f32 %v966_v16  ;;  %v951_v15 = vmul.f32 0.0078125, %v930_v28 }
 0x2ed   : > { %1056 = vst [vmem:[%s2143_s12 + $0x28] sm:$0xff] %v1040_v4  ;;  %v1018_v29 = vmul.f32 %v2411_v34, %v995_v21 }
 0x2ee   : > { %v1575_v40 = vpop.eup %1574  ;;  %v967_v5 = vadd.f32 1e-05, %v951_v15 }
 0x2ef   : > { %v1041_v31 = vadd.f32 %v2417_v39, %v1018_v29  ;;  %v996_v3 = vmul.f32 %v1575_v40, %v2364_v46  ;;  %v932_v38 = vpop.xlane.xlu1 %931 }
 0x2f0   : > { %1580 = vrsqrt.f32 %v967_v5  ;;  %v952_v35 = vmul.f32 0.0078125, %v932_v38 }
 0x2f1   : > { %1057 = vst [vmem:[%s2143_s12 + $0x30] sm:$0xff] %v1041_v31  ;;  %v1019_v45 = vmul.f32 %v2411_v34, %v996_v3 }
 0x2f2   : > { %v1577_v7 = vpop.eup %1576  ;;  %v968_v37 = vadd.f32 1e-05, %v952_v35 }
 0x2f3   : > { %v1042_v52 = vadd.f32 %v2417_v39, %v1019_v45  ;;  %v997_v41 = vmul.f32 %v1577_v7, %v2369_v49  ;;  %v934_v0 = vpop.xlane.xlu0 %933 }
 0x2f4   : > { %1582 = vrsqrt.f32 %v968_v37  ;;  %v953_v58 = vmul.f32 0.0078125, %v934_v0 }
 0x2f5   : > { %1058 = vst [vmem:[%s2143_s12 + $0x38] sm:$0xff] %v1042_v52  ;;  %v1020_v44 = vmul.f32 %v2411_v34, %v997_v41 }
 0x2f6   : > { %v1579_v46 = vpop.eup %1578  ;;  %v969_v43 = vadd.f32 1e-05, %v953_v58 }
 0x2f7   : > { %v1043_v19 = vadd.f32 %v2417_v39, %v1020_v44  ;;  %v998_v26 = vmul.f32 %v1579_v46, %v2374_v51  ;;  %v936_v8 = vpop.xlane.xlu1 %935 }
 0x2f8   : > { %1584 = vrsqrt.f32 %v969_v43  ;;  %v954_v48 = vmul.f32 0.0078125, %v936_v8 }
 0x2f9   : > { %1059 = vst [vmem:[%s2143_s12 + $0x40] sm:$0xff] %v1043_v19  ;;  %v1021_v25 = vmul.f32 %v2411_v34, %v998_v26 }
 0x2fa   : > { %v1581_v49 = vpop.eup %1580  ;;  %v970_v50 = vadd.f32 1e-05, %v954_v48 }
 0x2fb   : > { %v1044_v1 = vadd.f32 %v2417_v39, %v1021_v25  ;;  %v999_v32 = vmul.f32 %v1581_v49, %v2379_v55  ;;  %v938_v9 = vpop.xlane.xlu0 %937 }
 0x2fc   : > { %1586 = vrsqrt.f32 %v970_v50  ;;  %v955_v54 = vmul.f32 0.0078125, %v938_v9 }
 0x2fd   : > { %1060 = vst [vmem:[%s2143_s12 + $0x48] sm:$0xff] %v1044_v1  ;;  %v1022_v51 = vmul.f32 %v2411_v34, %v999_v32 }
 0x2fe   : > { %v1583_v14 = vpop.eup %1582  ;;  %v971_v36 = vadd.f32 1e-05, %v955_v54 }
 0x2ff   : > { %v1045_v56 = vadd.f32 %v2417_v39, %v1022_v51  ;;  %v1000_v10 = vmul.f32 %v1583_v14, %v2384_v17  ;;  %v940_v42 = vpop.xlane.xlu1 %939 }
 0x300   : > { %1588 = vrsqrt.f32 %v971_v36  ;;  %v956_v59 = vmul.f32 0.0078125, %v940_v42 }
 0x301   : > { %1061 = vst [vmem:[%s2143_s12 + $0x50] sm:$0xff] %v1045_v56  ;;  %v1023_v55 = vmul.f32 %v2411_v34, %v1000_v10 }
 0x302   : > { %v1585_v60 = vpop.eup %1584  ;;  %v972_v30 = vadd.f32 1e-05, %v956_v59 }
 0x303   : > { %v1046_v47 = vadd.f32 %v2417_v39, %v1023_v55  ;;  %v1001_v61 = vmul.f32 %v1585_v60, %v2389_v2 }
 0x304   : > { %1590 = vrsqrt.f32 %v972_v30 }
 0x305   : > { %1062 = vst [vmem:[%s2143_s12 + $0x58] sm:$0xff] %v1046_v47  ;;  %v1024_v17 = vmul.f32 %v2411_v34, %v1001_v61 }
 0x306   : > { %v1587_v11 = vpop.eup %1586 }
 0x307   : > { %v1047_v53 = vadd.f32 %v2417_v39, %v1024_v17  ;;  %v1002_v18 = vmul.f32 %v1587_v11, %v2394_v62 }
 0x309   : > { %1063 = vst [vmem:[%s2143_s12 + $0x60] sm:$0xff] %v1047_v53  ;;  %v1025_v20 = vmul.f32 %v2411_v34, %v1002_v18 }
 0x30a   : > { %v1589_v33 = vpop.eup %1588 }
 0x30b   : > { %v1048_v2 = vadd.f32 %v2417_v39, %v1025_v20  ;;  %v1003_v57 = vmul.f32 %v1589_v33, %v2399_v12 }
 0x30d   : > { %1064 = vst [vmem:[%s2143_s12 + $0x68] sm:$0xff] %v1048_v2  ;;  %v1026_v22 = vmul.f32 %v2411_v34, %v1003_v57 }
 0x30e   : > { %v1591_v13 = vpop.eup %1590 }
 0x30f   : > { %v1049_v62 = vadd.f32 %v2417_v39, %v1026_v22  ;;  %v1004_v63 = vmul.f32 %v1591_v13, %v2404_v24 }
 0x311   : > { %1065 = vst [vmem:[%s2143_s12 + $0x70] sm:$0xff] %v1049_v62  ;;  %v1027_v23 = vmul.f32 %v2411_v34, %v1004_v63 }
 0x313   : > { %v1050_v12 = vadd.f32 %v2417_v39, %v1027_v23 }
 0x315   : > { %1066 = vst [vmem:[%s2143_s12 + $0x78] sm:$0xff] %v1050_v12 }
 0x316   : > { %1711 = shalt.err (!%p1708_p2)
}
 0x317   : > { %s1712_s12 = scalar_lea.hbm %s2486_s15, 2048  ;;  %s1716_s17 = scalar_lea.hbm %s2591_s29, 8192 }
 0x318   : > { %p1713_p4 = scmp.ne.s32.totalorder %s2486_s15, %s1712_s12  ;;  %p1717_p0 = scmp.lt.u32.totalorder %s2486_s15, %s2591_s29 }
 0x319   : > { %p1718_p6 = scmp.lt.u32.totalorder %s1716_s17, %s1712_s12  ;;  %p1720_p8 = scmp.lt.u32.totalorder %s1712_s12, %s2486_s15 }
 0x31a   : > { %p1714_p5 = pnand %p1713_p4, %p1958_p11 }
 0x31b   : > { %p1719_p10 = por %p1718_p6, %p1717_p0 }
 0x31c   : > { %p1715_p9 = pneg %p1714_p5 }
 0x31d   : > { %p1721_p12 = por %p1720_p8, %p1719_p10 }
 0x31f   : > { %p1722_p13 = pnand %p1721_p12, %p1715_p9 }
 0x321   : > { %1725 = shalt.err (!%p1722_p13)
}
 0x322   : > { %s1813_s18 = smov 128   ;;  %s1814_s9 = smov 8  }
 0x323   : > { %1471 = dma.vmem_to_hbm [thread:$0]  (%p1958_p11), %s2488_s24, 2048, %s2486_s15, %s1068_s2, %s1813_s18, %s1813_s18, %s1814_s9  }
 0x324 PF: > { %s2592_s6 = sld [smem:[#allocation21_spill]]  ;;  %s2593_s25 = sld [smem:[#allocation23_spill]] }
 0x325   : > { %p1488_p3 = scmp.ge.s32.totalorder %s1804_s28, 2 }
 0x32a   : > { %s1098_s20 = sand.u32 1, %s2592_s6   ;;  %p2594_p7 = scmp.ne.s32.totalorder %s2593_s25, 0 }
 0x32b   : > { %s1099_s19 = scalar_lea.sflag [#allocation6], %s1098_s20 }
 0x32c   : > { %p1482_p1 = pnand %p1488_p3, %p2594_p7 }
 0x32e   : > { %1771 = dma.done.wait (!%p1482_p1), %s1099_s19, 2048  }
 0x32f   : > { %1773 = vsyncadd (!%p1482_p1), %s1099_s19, 4294965248  ;;  %s23_s28 = sadd.s32 1, %s1804_s28   ;;  %s2595_s24 = sld [smem:[#allocation22_spill]] }
 0x330   : > { %p20_p2 = scmp.ge.s32.totalorder %s23_s28, 6   ;;  %s2596_s26 = sld [smem:[#allocation24_spill]] }
 0x331   : > { %s2597_s7 = sld [smem:[#allocation26_spill]]  ;;  %s2598_s21 = smov %s1780_s22 }
 0x332   : > { %s2599_s22 = smov %s1784_s23  ;;  %s2600_s23 = smov %s1975_s10 }
 0x333   : > { %s2601_s25 = smov %s1800_s27  ;;  %22 = sbr.rel (!%p20_p2) target bundleno = 11 (0xb), region = 102 }
 0x337   : > { %s2602_s27 = smov %s2597_s7 }
 0x33a   :  { %1104 = vsyncpa [#allocation5], 1 }
 0x33b   :  { %1106 = vsyncpa [#allocation5 + $0x1], 1 }
 0x33c   :  { %1107 = vsyncpa [#allocation8], 1 }
 0x33d   :  { %1108 = vsyncpa [#allocation6], 1 }
 0x33e   :  { %1110 = vsyncpa [#allocation6 + $0x1], 1 }
 0x33f   :  { %1111 = vsyncmov [#allocation3] }
 0x342   :  { %s1112_s15 = vpop.sfrf %1111 }
 0x343   :  { %p1231_p11 = scmp.ne.s32.totalorder %s1112_s15, 0 }
 0x345   :  { %1116 = shalt.err (%p1231_p11)  }
 0x346   :  { %1118 = vsyncmov [#allocation3 + $0x1] }
 0x349   :  { %s1119_s10 = vpop.sfrf %1118 }
 0x34a   :  { %p1232_p4 = scmp.ne.s32.totalorder %s1119_s10, 0 }
 0x34c   :  { %1123 = shalt.err (%p1232_p4)  }

</bundles_post_ra>
